<compile_context>
chip_gen: v7x
topology: tpu7x:2x2x1
jax: 0.10.0
libtpu: 0.0.40
codegen_flags: <defaults>
</compile_context>

<pallas_src>
import functools
import math

import jax
import jax.numpy as jnp
from jax.experimental import pallas as pl
from jax.experimental.pallas import tpu as pltpu

LN_EPS = 1e-12   # BERT LayerNorm eps
_LANE = 128
_SUBLANE = 8

_VMEM_CAP = None
_SINGLE_BUFFER_OK = None


def _round_up(x, m):
    return (x + m - 1) // m * m


def _vmem_capacity_bytes():
    global _VMEM_CAP
    if _VMEM_CAP is None:
        try:
            _VMEM_CAP = int(pltpu.get_tpu_info().vmem_capacity_bytes)
        except Exception:
            # Narrow capability query only; default to the smallest generation
            # (v7x: 64 MiB per TensorCore).
            _VMEM_CAP = 64 * 1024 * 1024
    return _VMEM_CAP


def _vmem_limit(entries):
    """entries: iterable of (n_elements, itemsize, n_buffers)."""
    ws = sum(int(n) * int(isz) * int(bufs) for n, isz, bufs in entries)
    cap = int(0.75 * _vmem_capacity_bytes())   # headroom for Mosaic scratch/DMA
    return int(min(cap, 2 * ws + (8 << 20)))


def _choose_row_tile(m, requested):
    """Largest sublane-aligned row tile <= requested that divides m (prefer
    >=2 grid steps so both v7x TensorCores get work); pad path otherwise."""
    requested = max(_SUBLANE, int(requested))
    cap = min(requested, m)
    best = None
    t = _SUBLANE
    while t <= cap:
        if m % t == 0:
            best = t
        t += _SUBLANE
    if best is None or best * 4 < cap:
        # No reasonable divisor: prefer one large padded tile over tiny steps.
        return _round_up(cap, _SUBLANE)
    if best == m and m >= 2 * _SUBLANE and (m // 2) % _SUBLANE == 0:
        best = m // 2
    return best


def _choose_heads_per_block(num_heads, head_dim, requested=None):
    """Smallest head group whose width (hb * d) is lane-dense (multiple of 128)."""
    if requested is not None and num_heads % requested == 0 \
            and (requested * head_dim) % _LANE == 0:
        return requested
    for hb in range(1, num_heads + 1):
        if num_heads % hb == 0 and (hb * head_dim) % _LANE == 0:
            return hb
    return num_heads   # H itself is a multiple of 128, so this always works


# ---------------------------------------------------------------------------
# One-time capability probe: single-buffered (Buffered(1)) grid-invariant
# operands.  Replaces the previous broad try/except around the whole forward.
# ---------------------------------------------------------------------------
def _probe_kernel(x_ref, c_ref, o_ref):
    o_ref[...] = x_ref[...] + c_ref[...]


def _single_buffer_supported():
    global _SINGLE_BUFFER_OK
    if _SINGLE_BUFFER_OK is not None:
        return _SINGLE_BUFFER_OK
    try:
        x = jnp.zeros((16, 128), jnp.float32)
        c = jnp.ones((8, 128), jnp.float32)
        f = pl.pallas_call(
            _probe_kernel,
            out_shape=jax.ShapeDtypeStruct((16, 128), jnp.float32),
            grid_spec=pltpu.PrefetchScalarGridSpec(
                num_scalar_prefetch=0,
                grid=(2,),
                in_specs=[
                    pl.BlockSpec((8, 128), lambda i: (i, 0)),
                    pl.BlockSpec((8, 128), lambda i: (0, 0),
                                 pipeline_mode=pl.Buffered(1)),
                ],
                out_specs=pl.BlockSpec((8, 128), lambda i: (i, 0)),
            ),
        )
        jax.block_until_ready(f(x, c))
        _SINGLE_BUFFER_OK = True
    except Exception:
        _SINGLE_BUFFER_OK = False
    return _SINGLE_BUFFER_OK


# ---------------------------------------------------------------------------
# Kernel 1: fused former_final_layernorm + QKV projection, tiled over rows.
# ---------------------------------------------------------------------------
def _ln_qkv_kernel(x_ref, ln_ref, w_ref, b_ref, o_ref):
    # x_ref : (tm, H)   raw hidden_states rows (f32)
    # ln_ref: (2, H)    row 0 = gamma, row 1 = beta   (former_final_layernorm)
    # w_ref : (H, 3H)   [W_q | W_k | W_v], bf16
    # b_ref : (1, 3H)   [b_q | b_k | b_v]
    # o_ref : (tm, 3H)  [q | k | v], bf16
    x = x_ref[...].astype(jnp.float32)
    mean = jnp.mean(x, axis=-1, keepdims=True)
    cent = x - mean
    var = jnp.mean(cent * cent, axis=-1, keepdims=True)
    normed = cent * jax.lax.rsqrt(var + LN_EPS)
    normed = normed * ln_ref[0:1, :] + ln_ref[1:2, :]
    h = jnp.dot(normed.astype(w_ref.dtype), w_ref[...],
                preferred_element_type=jnp.float32)
    o_ref[...] = (h + b_ref[...]).astype(o_ref.dtype)


# ---------------------------------------------------------------------------
# Kernel 2: per (batch, head-group) attention reading head-column slices of the
# qkv slab.  bf16 MXU matmuls, f32 softmax statistics, deferred normalization.
# ---------------------------------------------------------------------------
def _attention_kernel(q_ref, k_ref, v_ref, o_ref, *, head_dim, heads_per_block):
    # q_ref/k_ref/v_ref/o_ref : (1, S, hb*d) bf16 blocks
    d = head_dim
    scale = 1.0 / math.sqrt(d)
    # Scale q once on the (S, hb*d) block instead of every (S, S) score tile.
    q = (q_ref[0].astype(jnp.float32) * scale).astype(q_ref.dtype)
    k = k_ref[0]
    v = v_ref[0]
    ctxs = []
    for h in range(heads_per_block):
        sl = slice(h * d, (h + 1) * d)
        qh, kh, vh = q[:, sl], k[:, sl], v[:, sl]
        # QK^T contracting the last dims (no pre-transposed K operand);
        # bf16 x bf16 -> f32 on the MXU.
        scores = jax.lax.dot_general(qh, kh, (((1,), (1,)), ((), ())),
                                     preferred_element_type=jnp.float32)
        s_max = jnp.max(scores, axis=-1, keepdims=True)
        p = jnp.exp(scores - s_max)
        denom = jnp.sum(p, axis=-1, keepdims=True)
        ctx = jax.lax.dot_general(p.astype(vh.dtype), vh,
                                  (((1,), (0,)), ((), ())),
                                  preferred_element_type=jnp.float32)
        # Deferred softmax normalization on the (S, d) result (EUP reciprocal).
        ctxs.append(ctx * pl.reciprocal(denom, approx=True))
    # Single lane-dense store of the whole head group.
    o_ref[0] = jnp.concatenate(ctxs, axis=-1).astype(o_ref.dtype)


# ---------------------------------------------------------------------------
# Kernel 3: fused output dense + residual add + LayerNorm, tiled over rows.
# ---------------------------------------------------------------------------
def _out_dense_ln_kernel(ctx_ref, res_ref, w_ref, c_ref, o_ref):
    # ctx_ref: (tm, H)  attention context rows (bf16)
    # res_ref: (tm, H)  residual rows = ORIGINAL pre-LN hidden_states (f32)
    # w_ref  : (H, H)   output dense weight, bf16
    # c_ref  : (3, H)   row 0 = dense bias, row 1 = LN gamma, row 2 = LN beta
    h = jnp.dot(ctx_ref[...].astype(w_ref.dtype), w_ref[...],
                preferred_element_type=jnp.float32)
    h = h + c_ref[0:1, :]
    h = h + res_ref[...].astype(jnp.float32)   # residual add in f32
    mean = jnp.mean(h, axis=-1, keepdims=True)
    cent = h - mean
    var = jnp.mean(cent * cent, axis=-1, keepdims=True)
    normed = cent * jax.lax.rsqrt(var + LN_EPS)
    o_ref[...] = (normed * c_ref[1:2, :] + c_ref[2:3, :]).astype(o_ref.dtype)


@functools.partial(
    jax.jit,
    static_argnames=("num_heads", "heads_per_block", "row_tile", "mm_dtype",
                     "single_buffer_consts"),
)
def _forward(x, ln0_gamma, ln0_beta, w_qkv, b_qkv, w_o, b_o, ln1_gamma, ln1_beta,
             *, num_heads, heads_per_block, row_tile, mm_dtype,
             single_buffer_consts):
    B, S, H = x.shape
    assert H % _LANE == 0, "hidden size must be a multiple of 128 (lane-dense)"
    assert H % num_heads == 0
    d = H // num_heads
    hb = heads_per_block
    assert num_heads % hb == 0 and (hb * d) % _LANE == 0
    n_groups = num_heads // hb
    grp_w = hb * d
    M = B * S

    tm = _choose_row_tile(M, row_tile)
    M_pad = _round_up(M, tm)
    grid_rows = M_pad // tm

    in_isz = x.dtype.itemsize
    mm_isz = jnp.dtype(mm_dtype).itemsize
    cbuf = 1 if single_buffer_consts else 2

    def _const_spec(shape):
        idx = lambda i, _n=len(shape): (0,) * _n
        if single_buffer_consts:
            # Grid-invariant operand: a second pipeline buffer is VMEM waste.
            return pl.BlockSpec(shape, idx, pipeline_mode=pl.Buffered(1))
        return pl.BlockSpec(shape, idx)

    # ---- pack parameters -----------------------------------------------------
    w_qkv_mm = w_qkv.astype(mm_dtype)                                   # (H, 3H)
    b_qkv2 = b_qkv.reshape(1, 3 * H).astype(jnp.float32)                # (1, 3H)
    ln0 = jnp.stack([ln0_gamma, ln0_beta]).astype(jnp.float32)          # (2, H)
    w_o_mm = w_o.astype(mm_dtype)                                       # (H, H)
    out_consts = jnp.stack([b_o, ln1_gamma, ln1_beta]).astype(jnp.float32)  # (3, H)

    x2 = x.reshape(M, H)
    x2p = jnp.pad(x2, ((0, M_pad - M), (0, 0))) if M_pad != M else x2

    # ---- kernel 1: LayerNorm + QKV projection (bf16 output slab) -------------
    vmem_qkv = _vmem_limit([
        (tm * H, in_isz, 2),           # hidden_states rows (double-buffered)
        (2 * H, 4, cbuf),              # LN0 gamma/beta
        (H * 3 * H, mm_isz, cbuf),     # W_qkv (resident)
        (3 * H, 4, cbuf),              # b_qkv
        (tm * 3 * H, mm_isz, 2),       # qkv output rows (bf16)
        (tm * 3 * H, 4, 1),            # f32 matmul accumulator
    ])
    qkv = pl.pallas_call(
        _ln_qkv_kernel,
        out_shape=jax.ShapeDtypeStruct((M_pad, 3 * H), mm_dtype),
        grid_spec=pltpu.PrefetchScalarGridSpec(
            num_scalar_prefetch=0,
            grid=(grid_rows,),
            in_specs=[
                pl.BlockSpec((tm, H), lambda i: (i, 0)),
                _const_spec((2, H)),
                _const_spec((H, 3 * H)),
                _const_spec((1, 3 * H)),
            ],
            out_specs=pl.BlockSpec((tm, 3 * H), lambda i: (i, 0)),
        ),
        compiler_params=pltpu.CompilerParams(
            dimension_semantics=("parallel",),
            vmem_limit_bytes=vmem_qkv,
        ),
        cost_estimate=pl.CostEstimate(
            flops=int(2 * M_pad * H * 3 * H + 8 * M_pad * H),
            transcendentals=int(M_pad),
            bytes_accessed=int(M_pad * H * in_isz + H * 3 * H * mm_isz
                               + M_pad * 3 * H * mm_isz + 6 * H * 4),
        ),
    )(x2p, ln0, w_qkv_mm, b_qkv2)

    if M_pad != M:
        qkv = qkv[:M]
    qkv3 = qkv.reshape(B, S, 3 * H)     # free reshape; q|k|v column sections

    # ---- kernel 2: attention per (batch, head-group) --------------------------
    attn_kernel = functools.partial(_attention_kernel, head_dim=d,
                                    heads_per_block=hb)
    vmem_attn = _vmem_limit([
        (S * grp_w, mm_isz, 8),        # q / k / v / ctx blocks, double-buffered
        (hb * S * S, 4, 3),            # scores / exp intermediates (f32)
        (S * grp_w, 4, 2),             # f32 ctx pieces before the final store
    ])
    ctx = pl.pallas_call(
        attn_kernel,
        out_shape=jax.ShapeDtypeStruct((B, S, H), mm_dtype),
        grid_spec=pltpu.PrefetchScalarGridSpec(
            num_scalar_prefetch=0,
            grid=(B, n_groups),
            in_specs=[
                pl.BlockSpec((1, S, grp_w), lambda b, g: (b, 0, g)),
                pl.BlockSpec((1, S, grp_w), lambda b, g: (b, 0, n_groups + g)),
                pl.BlockSpec((1, S, grp_w), lambda b, g: (b, 0, 2 * n_groups + g)),
            ],
            out_specs=pl.BlockSpec((1, S, grp_w), lambda b, g: (b, 0, g)),
        ),
        compiler_params=pltpu.CompilerParams(
            dimension_semantics=("parallel", "parallel"),
            vmem_limit_bytes=vmem_attn,
        ),
        cost_estimate=pl.CostEstimate(
            flops=int(4 * B * num_heads * S * S * d + 6 * B * num_heads * S * S),
            transcendentals=int(B * num_heads * S * S),
            bytes_accessed=int(4 * B * S * H * mm_isz),
        ),
    )(qkv3, qkv3, qkv3)

    # ctx is already in (B, S, H) head-major layout -> just flatten rows.
    ctx2 = ctx.reshape(M, H)
    res = x2
    if M_pad != M:
        ctx2 = jnp.pad(ctx2, ((0, M_pad - M), (0, 0)))
        res = jnp.pad(res, ((0, M_pad - M), (0, 0)))

    # ---- kernel 3: output dense + residual + LayerNorm ------------------------
    vmem_out = _vmem_limit([
        (tm * H, mm_isz, 2),          # context rows (bf16)
        (tm * H, in_isz, 2),          # residual rows
        (H * H, mm_isz, cbuf),        # W_o (resident)
        (3 * H, 4, cbuf),             # bias / gamma / beta
        (tm * H, in_isz, 2),          # output rows
        (tm * H, 4, 1),               # f32 matmul accumulator
    ])
    out = pl.pallas_call(
        _out_dense_ln_kernel,
        out_shape=jax.ShapeDtypeStruct((M_pad, H), x.dtype),
        grid_spec=pltpu.PrefetchScalarGridSpec(
            num_scalar_prefetch=0,
            grid=(grid_rows,),
            in_specs=[
                pl.BlockSpec((tm, H), lambda i: (i, 0)),
                pl.BlockSpec((tm, H), lambda i: (i, 0)),
                _const_spec((H, H)),
                _const_spec((3, H)),
            ],
            out_specs=pl.BlockSpec((tm, H), lambda i: (i, 0)),
        ),
        compiler_params=pltpu.CompilerParams(
            dimension_semantics=("parallel",),
            vmem_limit_bytes=vmem_out,
        ),
        cost_estimate=pl.CostEstimate(
            flops=int(2 * M_pad * H * H + 10 * M_pad * H),
            transcendentals=int(M_pad),
            bytes_accessed=int(M_pad * H * (mm_isz + 2 * in_isz)
                               + H * H * mm_isz + 3 * H * 4),
        ),
    )(ctx2, res, w_o_mm, out_consts)

    out = out[:M] if M_pad != M else out
    return out.reshape(B, S, H)


def quant_bert_attention(hidden_states, params, *, num_heads, row_tile=512,
                         mm_dtype=jnp.bfloat16, heads_per_block=None):
    """Forward pass of QuantBertAttention_2to12 (quantization disabled)."""
    H = hidden_states.shape[-1]
    d = H // num_heads
    hb = _choose_heads_per_block(num_heads, d, heads_per_block)
    _vmem_capacity_bytes()          # populate memo outside jit tracing
    return _forward(
        hidden_states,
        params["ln0_gamma"], params["ln0_beta"],
        params["w_qkv"], params["b_qkv"],
        params["w_o"], params["b_o"],
        params["ln1_gamma"], params["ln1_beta"],
        num_heads=num_heads, heads_per_block=hb, row_tile=row_tile,
        mm_dtype=mm_dtype, single_buffer_consts=_single_buffer_supported())


def _reference(hidden_states, params, num_heads, mm_dtype):
    """Pure-JAX reference mirroring the kernel's mixed precision."""
    B, S, H = hidden_states.shape
    d = H // num_heads
    f32 = jnp.float32

    def layer_norm(v, g, b):
        m = jnp.mean(v, axis=-1, keepdims=True)
        c = v - m
        var = jnp.mean(c * c, axis=-1, keepdims=True)
        return c * jax.lax.rsqrt(var + LN_EPS) * g + b

    def dense(a, w, b):
        return jnp.dot(a.astype(mm_dtype), w.astype(mm_dtype),
                       preferred_element_type=f32) + b

    x = hidden_states.astype(f32)
    ln_x = layer_norm(x, params["ln0_gamma"], params["ln0_beta"])
    qkv = dense(ln_x, params["w_qkv"], params["b_qkv"])
    q, k, v = jnp.split(qkv, 3, axis=-1)

    def heads(t):
        return (t.reshape(B, S, num_heads, d).transpose(0, 2, 1, 3)
                 .astype(mm_dtype))

    scores = jnp.einsum("bhqd,bhkd->bhqk", heads(q), heads(k),
                        preferred_element_type=f32) / math.sqrt(d)
    probs = jax.nn.softmax(scores, axis=-1)
    ctx = jnp.einsum("bhqk,bhkd->bhqd", probs.astype(mm_dtype), heads(v),
                     preferred_element_type=f32)
    ctx = ctx.transpose(0, 2, 1, 3).reshape(B, S, H)
    y = dense(ctx, params["w_o"], params["b_o"]) + x
    out = layer_norm(y, params["ln1_gamma"], params["ln1_beta"])
    return out.astype(hidden_states.dtype)


if __name__ == "__main__":
    # Small BERT-like shapes; H chosen as a multiple of 128 (lane-dense).
    B, S, H, NUM_HEADS = 2, 128, 128, 4

    key = jax.random.PRNGKey(0)
    keys = jax.random.split(key, 12)

    hidden_states = jax.random.normal(keys[0], (B, S, H), dtype=jnp.float32)

    def lin(kw, kb, n_in, n_out):
        w = jax.random.normal(kw, (n_in, n_out), dtype=jnp.float32) * 0.02
        b = jax.random.normal(kb, (n_out,), dtype=jnp.float32) * 0.02
        return w, b

    w_q, b_q = lin(keys[1], keys[2], H, H)
    w_k, b_k = lin(keys[3], keys[4], H, H)
    w_v, b_v = lin(keys[5], keys[6], H, H)
    w_o, b_o = lin(keys[7], keys[8], H, H)

    params = dict(
        # former_final_layernorm
        ln0_gamma=1.0 + 0.1 * jax.random.normal(keys[9], (H,), dtype=jnp.float32),
        ln0_beta=0.05 * jax.random.normal(keys[10], (H,), dtype=jnp.float32),
        # fused QKV projection (weights stored (in, out) == torch W.T layout)
        w_qkv=jnp.concatenate([w_q, w_k, w_v], axis=1),
        b_qkv=jnp.concatenate([b_q, b_k, b_v]),
        # output dense + LayerNorm
        w_o=w_o,
        b_o=b_o,
        ln1_gamma=1.0 + 0.1 * jax.random.normal(keys[11], (H,), dtype=jnp.float32),
        ln1_beta=jnp.zeros((H,), dtype=jnp.float32),
    )

    out = quant_bert_attention(hidden_states, params, num_heads=NUM_HEADS)
    out = jax.block_until_ready(out)

    ref = _reference(hidden_states, params, NUM_HEADS, jnp.bfloat16)
    assert out.shape == (B, S, H)
    assert jnp.allclose(out, ref, atol=3e-2, rtol=3e-2), "mismatch vs reference"

    print("KERNEL_OK")
</pallas_src>

<mosaic_0001>
module attributes {stable_mosaic.version = 11 : i64} {
  func.func @_probe_kernel(%arg0: i32, %arg1: memref<8x128xf32, #tpu.memory_space<vmem>>, %arg2: memref<8x128xf32, #tpu.memory_space<vmem>>, %arg3: memref<8x128xf32, #tpu.memory_space<vmem>>) attributes {dimension_semantics = [#tpu.dimension_semantics<arbitrary>], iteration_bounds = array<i64: 2>, scalar_prefetch = 0 : i64, scratch_operands = 0 : i64, tpu.core_type = #tpu.core_type<tc>, window_params = [{transform_indices = @transform_0, window_bounds = array<i64: 8, 128>}, {pipeline_mode = #tpu.pipeline_mode<synchronous>, transform_indices = @transform_1, window_bounds = array<i64: 8, 128>}, {transform_indices = @transform_2, window_bounds = array<i64: 8, 128>}]} {
    %c0 = arith.constant 0 : index
    %c0_0 = arith.constant 0 : index
    %0 = vector.load %arg1[%c0, %c0_0] : memref<8x128xf32, #tpu.memory_space<vmem>>, vector<8x128xf32>
    %c0_1 = arith.constant 0 : index
    %c0_2 = arith.constant 0 : index
    %1 = vector.load %arg2[%c0_1, %c0_2] : memref<8x128xf32, #tpu.memory_space<vmem>>, vector<8x128xf32>
    %2 = arith.addf %0, %1 : vector<8x128xf32>
    %c0_3 = arith.constant 0 : index
    %c0_4 = arith.constant 0 : index
    %3 = vector.load %arg3[%c0_3, %c0_4] : memref<8x128xf32, #tpu.memory_space<vmem>>, vector<8x128xf32>
    tpu.vector_store %arg3[%c0_3, %c0_4], %2 {strides = array<i32>} : memref<8x128xf32, #tpu.memory_space<vmem>>, vector<8x128xf32>,
    return
  }
  func.func @transform_0(%arg0: i32) -> (i32, i32) {
    %c0_i32 = arith.constant 0 : i32
    %c0_i32_0 = arith.constant 0 : i32
    return %arg0, %c0_i32 : i32, i32
  }
  func.func @transform_1(%arg0: i32) -> (i32, i32) {
    %c0_i32 = arith.constant 0 : i32
    %c0_i32_0 = arith.constant 0 : i32
    %c0_i32_1 = arith.constant 0 : i32
    return %c0_i32, %c0_i32_0 : i32, i32
  }
  func.func @transform_2(%arg0: i32) -> (i32, i32) {
    %c0_i32 = arith.constant 0 : i32
    %c0_i32_0 = arith.constant 0 : i32
    return %arg0, %c0_i32 : i32, i32
  }
}

module attributes {stable_mosaic.version = 11 : i64} {
  func.func @_attention_kernel(%arg0: i32, %arg1: i32, %arg2: memref<1x128x128xbf16, #tpu.memory_space<vmem>>, %arg3: memref<1x128x128xbf16, #tpu.memory_space<vmem>>, %arg4: memref<1x128x128xbf16, #tpu.memory_space<vmem>>, %arg5: memref<1x128x128xbf16, #tpu.memory_space<vmem>>) attributes {dimension_semantics = [#tpu.dimension_semantics<parallel>, #tpu.dimension_semantics<parallel>], iteration_bounds = array<i64: 2, 1>, scalar_prefetch = 0 : i64, scratch_operands = 0 : i64, tpu.core_type = #tpu.core_type<tc>, window_params = [{transform_indices = @transform_0, window_bounds = array<i64: 1, 128, 128>}, {transform_indices = @transform_1, window_bounds = array<i64: 1, 128, 128>}, {transform_indices = @transform_2, window_bounds = array<i64: 1, 128, 128>}, {transform_indices = @transform_3, window_bounds = array<i64: 1, 128, 128>}]} {
    %c0 = arith.constant 0 : index
    %c0_0 = arith.constant 0 : index
    %c0_1 = arith.constant 0 : index
    %0 = vector.load %arg2[%c0, %c0_0, %c0_1] : memref<1x128x128xbf16, #tpu.memory_space<vmem>>, vector<1x128x128xbf16>
    %1 = vector.shape_cast %0 : vector<1x128x128xbf16> to vector<128x128xbf16>
    %2 = arith.extf %1 : vector<128x128xbf16> to vector<128x128xf32>
    %cst = arith.constant 0.176776692 : f32
    %3 = vector.broadcast %cst : f32 to vector<128x128xf32>
    %4 = arith.mulf %2, %3 : vector<128x128xf32>
    %5 = arith.truncf %4 : vector<128x128xf32> to vector<128x128xbf16>
    %c0_2 = arith.constant 0 : index
    %c0_3 = arith.constant 0 : index
    %c0_4 = arith.constant 0 : index
    %6 = vector.load %arg3[%c0_2, %c0_3, %c0_4] : memref<1x128x128xbf16, #tpu.memory_space<vmem>>, vector<1x128x128xbf16>
    %7 = vector.shape_cast %6 : vector<1x128x128xbf16> to vector<128x128xbf16>
    %c0_5 = arith.constant 0 : index
    %c0_6 = arith.constant 0 : index
    %c0_7 = arith.constant 0 : index
    %8 = vector.load %arg4[%c0_5, %c0_6, %c0_7] : memref<1x128x128xbf16, #tpu.memory_space<vmem>>, vector<1x128x128xbf16>
    %9 = vector.shape_cast %8 : vector<1x128x128xbf16> to vector<128x128xbf16>
    %10 = vector.extract_strided_slice %5 {offsets = [0, 0], sizes = [128, 32], strides = [1, 1]} : vector<128x128xbf16> to vector<128x32xbf16>
    %11 = vector.extract_strided_slice %7 {offsets = [0, 0], sizes = [128, 32], strides = [1, 1]} : vector<128x128xbf16> to vector<128x32xbf16>
    %12 = vector.extract_strided_slice %9 {offsets = [0, 0], sizes = [128, 32], strides = [1, 1]} : vector<128x128xbf16> to vector<128x32xbf16>
    %cst_8 = arith.constant dense<0.000000e+00> : vector<128x128xf32>
    %13 = tpu.matmul %10, %11, %cst_8 {dimension_numbers = #tpu.dot_dimension_numbers<[1], [1], [0], [0], [0, 0, 1, 0], [], []>} : vector<128x32xbf16>, vector<128x32xbf16>, vector<128x128xf32> -> vector<128x128xf32>
    %cst_9 = arith.constant dense<0xFF800000> : vector<128xf32>
    %14 = vector.multi_reduction <maximumf>, %13, %cst_9 [1] : vector<128x128xf32> to vector<128xf32>
    %15 = vector.shape_cast %14 : vector<128xf32> to vector<128x1xf32>
    %16 = vector.broadcast %15 : vector<128x1xf32> to vector<128x128xf32>
    %17 = arith.subf %13, %16 : vector<128x128xf32>
    %18 = math.exp %17 : vector<128x128xf32>
    %cst_10 = arith.constant dense<0.000000e+00> : vector<128xf32>
    %19 = vector.multi_reduction <add>, %18, %cst_10 [1] : vector<128x128xf32> to vector<128xf32>
    %20 = vector.shape_cast %19 : vector<128xf32> to vector<128x1xf32>
    %21 = arith.truncf %18 : vector<128x128xf32> to vector<128x128xbf16>
    %cst_11 = arith.constant dense<0.000000e+00> : vector<128x32xf32>
    %22 = tpu.matmul %21, %12, %cst_11 {dimension_numbers = #tpu.dot_dimension_numbers<[1], [0], [0], [1], [0, 0, 1, 1], [], []>} : vector<128x128xbf16>, vector<128x32xbf16>, vector<128x32xf32> -> vector<128x32xf32>
    %23 = tpu.reciprocal %20 {approx = true} : vector<128x1xf32> -> vector<128x1xf32>
    %24 = vector.broadcast %23 : vector<128x1xf32> to vector<128x32xf32>
    %25 = arith.mulf %22, %24 : vector<128x32xf32>
    %26 = vector.extract_strided_slice %5 {offsets = [0, 32], sizes = [128, 32], strides = [1, 1]} : vector<128x128xbf16> to vector<128x32xbf16>
    %27 = vector.extract_strided_slice %7 {offsets = [0, 32], sizes = [128, 32], strides = [1, 1]} : vector<128x128xbf16> to vector<128x32xbf16>
    %28 = vector.extract_strided_slice %9 {offsets = [0, 32], sizes = [128, 32], strides = [1, 1]} : vector<128x128xbf16> to vector<128x32xbf16>
    %cst_12 = arith.constant dense<0.000000e+00> : vector<128x128xf32>
    %29 = tpu.matmul %26, %27, %cst_12 {dimension_numbers = #tpu.dot_dimension_numbers<[1], [1], [0], [0], [0, 0, 1, 0], [], []>} : vector<128x32xbf16>, vector<128x32xbf16>, vector<128x128xf32> -> vector<128x128xf32>
    %cst_13 = arith.constant dense<0xFF800000> : vector<128xf32>
    %30 = vector.multi_reduction <maximumf>, %29, %cst_13 [1] : vector<128x128xf32> to vector<128xf32>
    %31 = vector.shape_cast %30 : vector<128xf32> to vector<128x1xf32>
    %32 = vector.broadcast %31 : vector<128x1xf32> to vector<128x128xf32>
    %33 = arith.subf %29, %32 : vector<128x128xf32>
    %34 = math.exp %33 : vector<128x128xf32>
    %cst_14 = arith.constant dense<0.000000e+00> : vector<128xf32>
    %35 = vector.multi_reduction <add>, %34, %cst_14 [1] : vector<128x128xf32> to vector<128xf32>
    %36 = vector.shape_cast %35 : vector<128xf32> to vector<128x1xf32>
    %37 = arith.truncf %34 : vector<128x128xf32> to vector<128x128xbf16>
    %cst_15 = arith.constant dense<0.000000e+00> : vector<128x32xf32>
    %38 = tpu.matmul %37, %28, %cst_15 {dimension_numbers = #tpu.dot_dimension_numbers<[1], [0], [0], [1], [0, 0, 1, 1], [], []>} : vector<128x128xbf16>, vector<128x32xbf16>, vector<128x32xf32> -> vector<128x32xf32>
    %39 = tpu.reciprocal %36 {approx = true} : vector<128x1xf32> -> vector<128x1xf32>
    %40 = vector.broadcast %39 : vector<128x1xf32> to vector<128x32xf32>
    %41 = arith.mulf %38, %40 : vector<128x32xf32>
    %42 = vector.extract_strided_slice %5 {offsets = [0, 64], sizes = [128, 32], strides = [1, 1]} : vector<128x128xbf16> to vector<128x32xbf16>
    %43 = vector.extract_strided_slice %7 {offsets = [0, 64], sizes = [128, 32], strides = [1, 1]} : vector<128x128xbf16> to vector<128x32xbf16>
    %44 = vector.extract_strided_slice %9 {offsets = [0, 64], sizes = [128, 32], strides = [1, 1]} : vector<128x128xbf16> to vector<128x32xbf16>
    %cst_16 = arith.constant dense<0.000000e+00> : vector<128x128xf32>
    %45 = tpu.matmul %42, %43, %cst_16 {dimension_numbers = #tpu.dot_dimension_numbers<[1], [1], [0], [0], [0, 0, 1, 0], [], []>} : vector<128x32xbf16>, vector<128x32xbf16>, vector<128x128xf32> -> vector<128x128xf32>
    %cst_17 = arith.constant dense<0xFF800000> : vector<128xf32>
    %46 = vector.multi_reduction <maximumf>, %45, %cst_17 [1] : vector<128x128xf32> to vector<128xf32>
    %47 = vector.shape_cast %46 : vector<128xf32> to vector<128x1xf32>
    %48 = vector.broadcast %47 : vector<128x1xf32> to vector<128x128xf32>
    %49 = arith.subf %45, %48 : vector<128x128xf32>
    %50 = math.exp %49 : vector<128x128xf32>
    %cst_18 = arith.constant dense<0.000000e+00> : vector<128xf32>
    %51 = vector.multi_reduction <add>, %50, %cst_18 [1] : vector<128x128xf32> to vector<128xf32>
    %52 = vector.shape_cast %51 : vector<128xf32> to vector<128x1xf32>
    %53 = arith.truncf %50 : vector<128x128xf32> to vector<128x128xbf16>
    %cst_19 = arith.constant dense<0.000000e+00> : vector<128x32xf32>
    %54 = tpu.matmul %53, %44, %cst_19 {dimension_numbers = #tpu.dot_dimension_numbers<[1], [0], [0], [1], [0, 0, 1, 1], [], []>} : vector<128x128xbf16>, vector<128x32xbf16>, vector<128x32xf32> -> vector<128x32xf32>
    %55 = tpu.reciprocal %52 {approx = true} : vector<128x1xf32> -> vector<128x1xf32>
    %56 = vector.broadcast %55 : vector<128x1xf32> to vector<128x32xf32>
    %57 = arith.mulf %54, %56 : vector<128x32xf32>
    %58 = vector.extract_strided_slice %5 {offsets = [0, 96], sizes = [128, 32], strides = [1, 1]} : vector<128x128xbf16> to vector<128x32xbf16>
    %59 = vector.extract_strided_slice %7 {offsets = [0, 96], sizes = [128, 32], strides = [1, 1]} : vector<128x128xbf16> to vector<128x32xbf16>
    %60 = vector.extract_strided_slice %9 {offsets = [0, 96], sizes = [128, 32], strides = [1, 1]} : vector<128x128xbf16> to vector<128x32xbf16>
    %cst_20 = arith.constant dense<0.000000e+00> : vector<128x128xf32>
    %61 = tpu.matmul %58, %59, %cst_20 {dimension_numbers = #tpu.dot_dimension_numbers<[1], [1], [0], [0], [0, 0, 1, 0], [], []>} : vector<128x32xbf16>, vector<128x32xbf16>, vector<128x128xf32> -> vector<128x128xf32>
    %cst_21 = arith.constant dense<0xFF800000> : vector<128xf32>
    %62 = vector.multi_reduction <maximumf>, %61, %cst_21 [1] : vector<128x128xf32> to vector<128xf32>
    %63 = vector.shape_cast %62 : vector<128xf32> to vector<128x1xf32>
    %64 = vector.broadcast %63 : vector<128x1xf32> to vector<128x128xf32>
    %65 = arith.subf %61, %64 : vector<128x128xf32>
    %66 = math.exp %65 : vector<128x128xf32>
    %cst_22 = arith.constant dense<0.000000e+00> : vector<128xf32>
    %67 = vector.multi_reduction <add>, %66, %cst_22 [1] : vector<128x128xf32> to vector<128xf32>
    %68 = vector.shape_cast %67 : vector<128xf32> to vector<128x1xf32>
    %69 = arith.truncf %66 : vector<128x128xf32> to vector<128x128xbf16>
    %cst_23 = arith.constant dense<0.000000e+00> : vector<128x32xf32>
    %70 = tpu.matmul %69, %60, %cst_23 {dimension_numbers = #tpu.dot_dimension_numbers<[1], [0], [0], [1], [0, 0, 1, 1], [], []>} : vector<128x128xbf16>, vector<128x32xbf16>, vector<128x32xf32> -> vector<128x32xf32>
    %71 = tpu.reciprocal %68 {approx = true} : vector<128x1xf32> -> vector<128x1xf32>
    %72 = vector.broadcast %71 : vector<128x1xf32> to vector<128x32xf32>
    %73 = arith.mulf %70, %72 : vector<128x32xf32>
    %74 = tpu.concatenate %25, %41, %57, %73 in 1 : vector<128x32xf32>, vector<128x32xf32>, vector<128x32xf32>, vector<128x32xf32> -> vector<128x128xf32>
    %75 = arith.truncf %74 : vector<128x128xf32> to vector<128x128xbf16>
    %c0_24 = arith.constant 0 : index
    %c0_25 = arith.constant 0 : index
    %c0_26 = arith.constant 0 : index
    %76 = vector.load %arg5[%c0_24, %c0_25, %c0_26] : memref<1x128x128xbf16, #tpu.memory_space<vmem>>, vector<1x128x128xbf16>
    %77 = vector.shape_cast %76 : vector<1x128x128xbf16> to vector<128x128xbf16>
    %78 = vector.shape_cast %75 : vector<128x128xbf16> to vector<1x128x128xbf16>
    tpu.vector_store %arg5[%c0_24, %c0_25, %c0_26], %78 {strides = array<i32>} : memref<1x128x128xbf16, #tpu.memory_space<vmem>>, vector<1x128x128xbf16>,
    return
  }
  func.func @transform_0(%arg0: i32, %arg1: i32) -> (i32, i32, i32) {
    %c0_i32 = arith.constant 0 : i32
    %c0_i32_0 = arith.constant 0 : i32
    return %arg0, %c0_i32, %arg1 : i32, i32, i32
  }
  func.func @transform_1(%arg0: i32, %arg1: i32) -> (i32, i32, i32) {
    %c1_i32 = arith.constant 1 : i32
    %0 = arith.addi %c1_i32, %arg1 : i32
    %c0_i32 = arith.constant 0 : i32
    %c0_i32_0 = arith.constant 0 : i32
    return %arg0, %c0_i32, %0 : i32, i32, i32
  }
  func.func @transform_2(%arg0: i32, %arg1: i32) -> (i32, i32, i32) {
    %c2_i32 = arith.constant 2 : i32
    %0 = arith.addi %c2_i32, %arg1 : i32
    %c0_i32 = arith.constant 0 : i32
    %c0_i32_0 = arith.constant 0 : i32
    return %arg0, %c0_i32, %0 : i32, i32, i32
  }
  func.func @transform_3(%arg0: i32, %arg1: i32) -> (i32, i32, i32) {
    %c0_i32 = arith.constant 0 : i32
    %c0_i32_0 = arith.constant 0 : i32
    return %arg0, %c0_i32, %arg1 : i32, i32, i32
  }
}

module attributes {stable_mosaic.version = 11 : i64} {
  func.func @_ln_qkv_kernel(%arg0: i32, %arg1: memref<128x128xf32, #tpu.memory_space<vmem>>, %arg2: memref<2x128xf32, #tpu.memory_space<vmem>>, %arg3: memref<128x384xbf16, #tpu.memory_space<vmem>>, %arg4: memref<1x384xf32, #tpu.memory_space<vmem>>, %arg5: memref<128x384xbf16, #tpu.memory_space<vmem>>) attributes {dimension_semantics = [#tpu.dimension_semantics<parallel>], iteration_bounds = array<i64: 2>, scalar_prefetch = 0 : i64, scratch_operands = 0 : i64, tpu.core_type = #tpu.core_type<tc>, window_params = [{transform_indices = @transform_0, window_bounds = array<i64: 128, 128>}, {pipeline_mode = #tpu.pipeline_mode<synchronous>, transform_indices = @transform_1, window_bounds = array<i64: 2, 128>}, {pipeline_mode = #tpu.pipeline_mode<synchronous>, transform_indices = @transform_2, window_bounds = array<i64: 128, 384>}, {pipeline_mode = #tpu.pipeline_mode<synchronous>, transform_indices = @transform_3, window_bounds = array<i64: 1, 384>}, {transform_indices = @transform_4, window_bounds = array<i64: 128, 384>}]} {
    %c0 = arith.constant 0 : index
    %c0_0 = arith.constant 0 : index
    %0 = vector.load %arg1[%c0, %c0_0] : memref<128x128xf32, #tpu.memory_space<vmem>>, vector<128x128xf32>
    %cst = arith.constant dense<0.000000e+00> : vector<128xf32>
    %1 = vector.multi_reduction <add>, %0, %cst [1] : vector<128x128xf32> to vector<128xf32>
    %2 = vector.shape_cast %1 : vector<128xf32> to vector<128x1xf32>
    %cst_1 = arith.constant 1.280000e+02 : f32
    %3 = vector.broadcast %cst_1 : f32 to vector<128x1xf32>
    %4 = arith.divf %2, %3 : vector<128x1xf32>
    %5 = vector.broadcast %4 : vector<128x1xf32> to vector<128x128xf32>
    %6 = arith.subf %0, %5 : vector<128x128xf32>
    %7 = arith.mulf %6, %6 : vector<128x128xf32>
    %cst_2 = arith.constant dense<0.000000e+00> : vector<128xf32>
    %8 = vector.multi_reduction <add>, %7, %cst_2 [1] : vector<128x128xf32> to vector<128xf32>
    %9 = vector.shape_cast %8 : vector<128xf32> to vector<128x1xf32>
    %cst_3 = arith.constant 1.280000e+02 : f32
    %10 = vector.broadcast %cst_3 : f32 to vector<128x1xf32>
    %11 = arith.divf %9, %10 : vector<128x1xf32>
    %cst_4 = arith.constant 9.99999996E-13 : f32
    %12 = vector.broadcast %cst_4 : f32 to vector<128x1xf32>
    %13 = arith.addf %11, %12 : vector<128x1xf32>
    %14 = math.rsqrt %13 : vector<128x1xf32>
    %15 = vector.broadcast %14 : vector<128x1xf32> to vector<128x128xf32>
    %16 = arith.mulf %6, %15 : vector<128x128xf32>
    %c0_5 = arith.constant 0 : index
    %c0_6 = arith.constant 0 : index
    %17 = vector.load %arg2[%c0_5, %c0_6] : memref<2x128xf32, #tpu.memory_space<vmem>>, vector<1x128xf32>
    %18 = vector.broadcast %17 : vector<1x128xf32> to vector<128x128xf32>
    %19 = arith.mulf %16, %18 : vector<128x128xf32>
    %c1 = arith.constant 1 : index
    %c0_7 = arith.constant 0 : index
    %20 = vector.load %arg2[%c1, %c0_7] : memref<2x128xf32, #tpu.memory_space<vmem>>, vector<1x128xf32>
    %21 = vector.broadcast %20 : vector<1x128xf32> to vector<128x128xf32>
    %22 = arith.addf %19, %21 : vector<128x128xf32>
    %23 = arith.truncf %22 : vector<128x128xf32> to vector<128x128xbf16>
    %c0_8 = arith.constant 0 : index
    %c0_9 = arith.constant 0 : index
    %24 = vector.load %arg3[%c0_8, %c0_9] : memref<128x384xbf16, #tpu.memory_space<vmem>>, vector<128x384xbf16>
    %cst_10 = arith.constant dense<0.000000e+00> : vector<128x384xf32>
    %25 = tpu.matmul %23, %24, %cst_10 {dimension_numbers = #tpu.dot_dimension_numbers<[1], [0], [0], [1], [0, 0, 1, 1], [], []>} : vector<128x128xbf16>, vector<128x384xbf16>, vector<128x384xf32> -> vector<128x384xf32>
    %c0_11 = arith.constant 0 : index
    %c0_12 = arith.constant 0 : index
    %26 = vector.load %arg4[%c0_11, %c0_12] : memref<1x384xf32, #tpu.memory_space<vmem>>, vector<1x384xf32>
    %27 = vector.broadcast %26 : vector<1x384xf32> to vector<128x384xf32>
    %28 = arith.addf %25, %27 : vector<128x384xf32>
    %29 = arith.truncf %28 : vector<128x384xf32> to vector<128x384xbf16>
    %c0_13 = arith.constant 0 : index
    %c0_14 = arith.constant 0 : index
    %30 = vector.load %arg5[%c0_13, %c0_14] : memref<128x384xbf16, #tpu.memory_space<vmem>>, vector<128x384xbf16>
    tpu.vector_store %arg5[%c0_13, %c0_14], %29 {strides = array<i32>} : memref<128x384xbf16, #tpu.memory_space<vmem>>, vector<128x384xbf16>,
    return
  }
  func.func @transform_0(%arg0: i32) -> (i32, i32) {
    %c0_i32 = arith.constant 0 : i32
    %c0_i32_0 = arith.constant 0 : i32
    return %arg0, %c0_i32 : i32, i32
  }
  func.func @transform_1(%arg0: i32) -> (i32, i32) {
    %c0_i32 = arith.constant 0 : i32
    %c0_i32_0 = arith.constant 0 : i32
    %c0_i32_1 = arith.constant 0 : i32
    return %c0_i32, %c0_i32_0 : i32, i32
  }
  func.func @transform_2(%arg0: i32) -> (i32, i32) {
    %c0_i32 = arith.constant 0 : i32
    %c0_i32_0 = arith.constant 0 : i32
    %c0_i32_1 = arith.constant 0 : i32
    return %c0_i32, %c0_i32_0 : i32, i32
  }
  func.func @transform_3(%arg0: i32) -> (i32, i32) {
    %c0_i32 = arith.constant 0 : i32
    %c0_i32_0 = arith.constant 0 : i32
    %c0_i32_1 = arith.constant 0 : i32
    return %c0_i32, %c0_i32_0 : i32, i32
  }
  func.func @transform_4(%arg0: i32) -> (i32, i32) {
    %c0_i32 = arith.constant 0 : i32
    %c0_i32_0 = arith.constant 0 : i32
    return %arg0, %c0_i32 : i32, i32
  }
}

module attributes {stable_mosaic.version = 11 : i64} {
  func.func @_out_dense_ln_kernel(%arg0: i32, %arg1: memref<128x128xbf16, #tpu.memory_space<vmem>>, %arg2: memref<128x128xf32, #tpu.memory_space<vmem>>, %arg3: memref<128x128xbf16, #tpu.memory_space<vmem>>, %arg4: memref<3x128xf32, #tpu.memory_space<vmem>>, %arg5: memref<128x128xf32, #tpu.memory_space<vmem>>) attributes {dimension_semantics = [#tpu.dimension_semantics<parallel>], iteration_bounds = array<i64: 2>, scalar_prefetch = 0 : i64, scratch_operands = 0 : i64, tpu.core_type = #tpu.core_type<tc>, window_params = [{transform_indices = @transform_0, window_bounds = array<i64: 128, 128>}, {transform_indices = @transform_1, window_bounds = array<i64: 128, 128>}, {pipeline_mode = #tpu.pipeline_mode<synchronous>, transform_indices = @transform_2, window_bounds = array<i64: 128, 128>}, {pipeline_mode = #tpu.pipeline_mode<synchronous>, transform_indices = @transform_3, window_bounds = array<i64: 3, 128>}, {transform_indices = @transform_4, window_bounds = array<i64: 128, 128>}]} {
    %c0 = arith.constant 0 : index
    %c0_0 = arith.constant 0 : index
    %0 = vector.load %arg1[%c0, %c0_0] : memref<128x128xbf16, #tpu.memory_space<vmem>>, vector<128x128xbf16>
    %c0_1 = arith.constant 0 : index
    %c0_2 = arith.constant 0 : index
    %1 = vector.load %arg3[%c0_1, %c0_2] : memref<128x128xbf16, #tpu.memory_space<vmem>>, vector<128x128xbf16>
    %cst = arith.constant dense<0.000000e+00> : vector<128x128xf32>
    %2 = tpu.matmul %0, %1, %cst {dimension_numbers = #tpu.dot_dimension_numbers<[1], [0], [0], [1], [0, 0, 1, 1], [], []>} : vector<128x128xbf16>, vector<128x128xbf16>, vector<128x128xf32> -> vector<128x128xf32>
    %c0_3 = arith.constant 0 : index
    %c0_4 = arith.constant 0 : index
    %3 = vector.load %arg4[%c0_3, %c0_4] : memref<3x128xf32, #tpu.memory_space<vmem>>, vector<1x128xf32>
    %4 = vector.broadcast %3 : vector<1x128xf32> to vector<128x128xf32>
    %5 = arith.addf %2, %4 : vector<128x128xf32>
    %c0_5 = arith.constant 0 : index
    %c0_6 = arith.constant 0 : index
    %6 = vector.load %arg2[%c0_5, %c0_6] : memref<128x128xf32, #tpu.memory_space<vmem>>, vector<128x128xf32>
    %7 = arith.addf %5, %6 : vector<128x128xf32>
    %cst_7 = arith.constant dense<0.000000e+00> : vector<128xf32>
    %8 = vector.multi_reduction <add>, %7, %cst_7 [1] : vector<128x128xf32> to vector<128xf32>
    %9 = vector.shape_cast %8 : vector<128xf32> to vector<128x1xf32>
    %cst_8 = arith.constant 1.280000e+02 : f32
    %10 = vector.broadcast %cst_8 : f32 to vector<128x1xf32>
    %11 = arith.divf %9, %10 : vector<128x1xf32>
    %12 = vector.broadcast %11 : vector<128x1xf32> to vector<128x128xf32>
    %13 = arith.subf %7, %12 : vector<128x128xf32>
    %14 = arith.mulf %13, %13 : vector<128x128xf32>
    %cst_9 = arith.constant dense<0.000000e+00> : vector<128xf32>
    %15 = vector.multi_reduction <add>, %14, %cst_9 [1] : vector<128x128xf32> to vector<128xf32>
    %16 = vector.shape_cast %15 : vector<128xf32> to vector<128x1xf32>
    %cst_10 = arith.constant 1.280000e+02 : f32
    %17 = vector.broadcast %cst_10 : f32 to vector<128x1xf32>
    %18 = arith.divf %16, %17 : vector<128x1xf32>
    %cst_11 = arith.constant 9.99999996E-13 : f32
    %19 = vector.broadcast %cst_11 : f32 to vector<128x1xf32>
    %20 = arith.addf %18, %19 : vector<128x1xf32>
    %21 = math.rsqrt %20 : vector<128x1xf32>
    %22 = vector.broadcast %21 : vector<128x1xf32> to vector<128x128xf32>
    %23 = arith.mulf %13, %22 : vector<128x128xf32>
    %c1 = arith.constant 1 : index
    %c0_12 = arith.constant 0 : index
    %24 = vector.load %arg4[%c1, %c0_12] : memref<3x128xf32, #tpu.memory_space<vmem>>, vector<1x128xf32>
    %25 = vector.broadcast %24 : vector<1x128xf32> to vector<128x128xf32>
    %26 = arith.mulf %23, %25 : vector<128x128xf32>
    %c2 = arith.constant 2 : index
    %c0_13 = arith.constant 0 : index
    %27 = vector.load %arg4[%c2, %c0_13] : memref<3x128xf32, #tpu.memory_space<vmem>>, vector<1x128xf32>
    %28 = vector.broadcast %27 : vector<1x128xf32> to vector<128x128xf32>
    %29 = arith.addf %26, %28 : vector<128x128xf32>
    %c0_14 = arith.constant 0 : index
    %c0_15 = arith.constant 0 : index
    %30 = vector.load %arg5[%c0_14, %c0_15] : memref<128x128xf32, #tpu.memory_space<vmem>>, vector<128x128xf32>
    tpu.vector_store %arg5[%c0_14, %c0_15], %29 {strides = array<i32>} : memref<128x128xf32, #tpu.memory_space<vmem>>, vector<128x128xf32>,
    return
  }
  func.func @transform_0(%arg0: i32) -> (i32, i32) {
    %c0_i32 = arith.constant 0 : i32
    %c0_i32_0 = arith.constant 0 : i32
    return %arg0, %c0_i32 : i32, i32
  }
  func.func @transform_1(%arg0: i32) -> (i32, i32) {
    %c0_i32 = arith.constant 0 : i32
    %c0_i32_0 = arith.constant 0 : i32
    return %arg0, %c0_i32 : i32, i32
  }
  func.func @transform_2(%arg0: i32) -> (i32, i32) {
    %c0_i32 = arith.constant 0 : i32
    %c0_i32_0 = arith.constant 0 : i32
    %c0_i32_1 = arith.constant 0 : i32
    return %c0_i32, %c0_i32_0 : i32, i32
  }
  func.func @transform_3(%arg0: i32) -> (i32, i32) {
    %c0_i32 = arith.constant 0 : i32
    %c0_i32_0 = arith.constant 0 : i32
    %c0_i32_1 = arith.constant 0 : i32
    return %c0_i32, %c0_i32_0 : i32, i32
  }
  func.func @transform_4(%arg0: i32) -> (i32, i32) {
    %c0_i32 = arith.constant 0 : i32
    %c0_i32_0 = arith.constant 0 : i32
    return %arg0, %c0_i32 : i32, i32
  }
}

</mosaic_0001>

<bundles_post_ra>
// kernel: tpu_custom_call.1
= control target key start
LH: loop header
LB: loop body
LE: loop exit
PB: predicated region body
PF: predicated region fallthrough
CT: control target
= control target key end

     0   :  { %7 = vsyncpa [#allocation3], 0  ;;  %s690_s0 = inlined_call_operand.hbm [shape: f32[16,128], index: 0, kind: input, shape index: {}]   ;;  %s691_s1 = inlined_call_operand.hbm [shape: f32[8,128], index: 1, kind: input, shape index: {}]   ;;  %s692_s2 = inlined_call_operand.hbm [shape: f32[16,128], index: 2, kind: output, shape index: {}]  }
   0x1   :  { %9 = vsyncpa [#allocation3 + $0x1], 0 }
   0x2   :  { %10 = vsyncpa [#allocation6], 0 }
   0x3   :  { %11 = vsyncpa [#allocation4], 0 }
   0x4   :  { %13 = vsyncpa [#allocation4 + $0x1], 0  ;;  %s489_s9 = smov 0   ;;  %s491_s10 = smov 0  }
   0x5   :  { %s493_s11 = smov 0   ;;  %s495_s12 = smov 0  }
   0x6 LB: > { %s510_s13 = sadd.s32 4294967295, %s469_s12   ;;  %s270_s14 = sadd.s32 4294967294, %s469_s12   ;;  %s469_s12 = sphi %s495_s12, %s716_s12   ;;  %s465_s11 = sphi %s493_s11, %s715_s11   ;;  %s461_s10 = sphi %s491_s10, %s714_s10   ;;  %s457_s9 = sphi %s489_s9, %s713_s9  }
   0x7   : > { %p39_p0 = scmp.ne.s32.totalorder %s461_s10, %s457_s9  ;;  %p693_p1 = scmp.eq.s32.totalorder %s510_s13, 0 }
   0x8   : > { %p90_p3 = scmp.eq.s32.totalorder %s270_s14, 1  ;;  %p271_p5 = scmp.ge.s32.totalorder %s469_s12, 1 }
   0x9   : > { %p519_p4 = por %p693_p1, %p39_p0  ;;  %p97_p7 = scmp.lt.s32.totalorder %s469_s12, 3 }
   0xa   : > { %p524_p6 = por %p90_p3, %p39_p0  ;;  %s471_s18 = smov [#allocation5]  }
   0xb   : > { %s696_s15 = scalar_select %p519_p4, 1, 0 }
   0xc   : > { %s697_s16 = scalar_select %p524_p6, 1, 0 }
   0xd   : > { %p529_p8 = pnand %p271_p5, %p97_p7  ;;  %s110_s19 = sshll.u32 %s471_s18, 4  ;;  %s111_s19 = int_to_ptr.vmem [resolvable:$true] %s110_s19 }
   0xe   : > { %s537_s20 = sadd.s32 1, %s469_s12   ;;  %s26_s24 = sadd.s32 1, %s465_s11 }
   0xf   : > { %s698_s17 = scalar_select %p529_p8, 1, 0 }
  0x10   : > { %p292_p10 = pneg %p529_p8  ;;  %s23_s22 = ssub.s32 %s469_s12, %s537_s20 }
  0x11   : > { %p547_p12 = scmp.eq.s32.totalorder %s23_s22, 0  ;;  %s341_s27 = scalar_lea.hbm %s691_s1, 128 }
  0x12   : > { %p541_p11 = pnand %p292_p10, %p693_p1  ;;  %p342_p0 = scmp.ne.s32.totalorder %s691_s1, %s341_s27 }
  0x13   : > { %s700_s23 = scalar_select %p547_p12, 1, 0 }
  0x14   : > { %p343_p3 = pneg %p541_p11  ;;  %p348_p10 = scmp.lt.u32.totalorder %s341_s27, %s691_s1 }
  0x16   : > { %p344_p5 = pnand %p343_p3, %p342_p0 }
  0x18   : > { %p345_p7 = pneg %p344_p5 }
  0x1a   : > { %p350_p9 = pnand %p348_p10, %p345_p7 }
  0x1c   : > { %353 = shalt.err (!%p350_p9)
}
  0x1d   : > { %s354_s4 = scalar_lea.vmem %s111_s19, 128  ;;  %p362_p6 = scmp.lt.s32.totalorder %s111_s19, %s111_s19 }
  0x1e   : > { %p355_p1 = scmp.ne.s32.totalorder %s111_s19, %s354_s4  ;;  %p363_p4 = scmp.lt.s32.totalorder %s354_s4, %s354_s4 }
  0x20   : > { %p357_p2 = pnand %p355_p1, %p343_p3  ;;  %p364_p8 = por %p363_p4, %p362_p6 }
  0x22   : > { %p358_p13 = pneg %p357_p2 }
  0x24   : > { %p365_p12 = pnand %p364_p8, %p358_p13 }
  0x26   : > { %368 = shalt.err (!%p365_p12)
}
  0x27   : > { %295 = dma.hbm_to_vmem [thread:$0]  (!%p541_p11), %s691_s1, 128, %s111_s19, [#allocation6]  }
  0x28   : > { %p701_p1 = scmp.ne.s32.totalorder %s700_s23, 0  ;;  %p34_p2 = scmp.eq.s32.totalorder %s469_s12, 0 }
  0x29   : > { %p702_p4 = scmp.ne.s32.totalorder %s465_s11, %s461_s10  ;;  %p703_p6 = scmp.eq.s32.totalorder %s510_s13, 1 }
  0x2a   : > { %s573_s7 = scalar_select %p701_p1, %s465_s11, %s26_s24  }
  0x2b   : > { %p581_p8 = por %p703_p6, %p702_p4  ;;  %p305_p9 = scmp.lt.s32.totalorder %s469_s12, 2 }
  0x2c   : > { %s121_s14 = sand.u32 1, %s465_s11   ;;  %p705_p12 = pmov %p702_p4 }
  0x2d   : > { %s274_s18 = sshll.u32 %s121_s14, 3  ;;  %s275_s21 = sshll.u32 %s469_s12, 7 }
  0x2e   : > { %p35_p13 = por %p34_p2, %p705_p12  ;;  %s594_s19 = scalar_lea.hbm %s690_s0, %s275_s21 }
  0x2f   : > { %s125_s23 = scalar_lea.vmem [#allocation2], %s274_s18  ;;  %s122_s27 = scalar_lea.sflag [#allocation3], %s121_s14 }
  0x30   : > { %s132_s24 = sshll.u32 %s125_s23, 4  ;;  %p596_p11 = pnand %p305_p9, %p35_p13  ;;  %s600_s24 = int_to_ptr.vmem [resolvable:$true] %s132_s24 }
  0x31   : > { %s369_s28 = scalar_lea.hbm %s594_s19, 128  ;;  %s374_s3 = scalar_lea.hbm %s690_s0, 256 }
  0x32   : > { %p370_p0 = scmp.ne.s32.totalorder %s594_s19, %s369_s28  ;;  %p371_p3 = pneg %p596_p11 }
  0x33   : > { %p375_p10 = scmp.lt.u32.totalorder %s594_s19, %s690_s0  ;;  %p376_p1 = scmp.lt.u32.totalorder %s374_s3, %s369_s28 }
  0x34   : > { %p372_p5 = pnand %p371_p3, %p370_p0  ;;  %p378_p4 = scmp.lt.u32.totalorder %s369_s28, %s594_s19 }
  0x35   : > { %p377_p2 = por %p376_p1, %p375_p10 }
  0x36   : > { %p373_p7 = pneg %p372_p5 }
  0x37   : > { %p379_p6 = por %p378_p4, %p377_p2 }
  0x39   : > { %p380_p9 = pnand %p379_p6, %p373_p7 }
  0x3b   : > { %383 = shalt.err (!%p380_p9)
}
  0x3c   : > { %s384_s6 = scalar_lea.vmem %s600_s24, 128  ;;  %s472_s14 = smov [#allocation2]  }
  0x3d   : > { %p385_p12 = scmp.ne.s32.totalorder %s600_s24, %s384_s6  ;;  %s389_s18 = sshll.u32 %s472_s14, 4  ;;  %s390_s18 = int_to_ptr.vmem [resolvable:$false] %s389_s18 }
  0x3e   : > { %s391_s21 = scalar_lea.vmem %s390_s18, 256  ;;  %p392_p5 = scmp.lt.s32.totalorder %s600_s24, %s390_s18 }
  0x3f   : > { %p387_p13 = pnand %p385_p12, %p371_p3  ;;  %p393_p10 = scmp.lt.s32.totalorder %s391_s21, %s384_s6 }
  0x41   : > { %p388_p0 = pneg %p387_p13  ;;  %p394_p1 = por %p393_p10, %p392_p5 }
  0x43   : > { %p395_p2 = pnand %p394_p1, %p388_p0 }
  0x45   : > { %398 = shalt.err (!%p395_p2)
}
  0x46   : > { %299 = dma.hbm_to_vmem [thread:$0]  (!%p596_p11), %s594_s19, 128, %s600_s24, %s122_s27  }
  0x47   : > { %p707_p7 = scmp.ne.s32.totalorder %s698_s17, 0 }
  0x48   : > { %s630_s22 = sand.u32 (!%p707_p7), 1, %s461_s10   ;;  %p708_p3 = scmp.ne.s32.totalorder (!%p707_p7), %s696_s15, 0 }
  0x49   : > { %141 = sbr.rel (%p707_p7) target bundleno = 109 (0x6d), region = 28  ;;  %s277_s25 = sshll.u32 (!%p707_p7), %s630_s22, 3 }
  0x4a   : > { %s144_s23 = scalar_lea.sflag (!%p707_p7), [#allocation3], %s630_s22  ;;  %s147_s28 = scalar_lea.vmem (!%p707_p7), [#allocation2], %s277_s25 }
  0x50   : > { %444 = dma.done.wait (%p708_p3), %s144_s23, 128  }
  0x51   : > { %446 = vsyncadd (%p708_p3), %s144_s23, 4294967168  ;;  %p709_p4 = scmp.eq.s32.totalorder %s510_s13, 0 }
  0x53   : > { %448 = dma.done.wait (%p709_p4), [#allocation6], 128   ;;  %p710_p11 = pmov %p709_p4 }
  0x54   : > { %s171_s17 = scalar_lea.vmem [#allocation7], %s277_s25  ;;  %s281_s24 = sshll.u32 %s510_s13, 7  ;;  %v172_v0 = vld [vmem:[%s147_s28] sm:$0xff]  ;;  %v173_v1 = vld [vmem:[#allocation5] sm:$0xff] }
  0x55   : > { %450 = vsyncadd (%p710_p11), [#allocation6], 4294967168  ;;  %s190_s19 = sshll.u32 %s171_s17, 4  ;;  %v174_v2 = vadd.f32 %v173_v1, %v172_v0  ;;  %s648_s27 = scalar_lea.hbm %s692_s2, %s281_s24  ;;  %s643_s19 = int_to_ptr.vmem [resolvable:$true] %s190_s19 }
  0x56   : > { %s177_s29 = scalar_lea.sflag [#allocation4], %s630_s22  ;;  %s399_s30 = scalar_lea.vmem %s643_s19, 128 }
  0x57   : > { %175 = vst [vmem:[%s171_s17] sm:$0xff] %v174_v2  ;;  %p400_p6 = scmp.ne.s32.totalorder %s643_s19, %s399_s30  ;;  %s473_s13 = smov [#allocation7]  }
  0x58   : > { %s403_s3 = sshll.u32 %s473_s13, 4  ;;  %s404_s3 = int_to_ptr.vmem [resolvable:$false] %s403_s3 }
  0x59   : > { %p401_p9 = pnand %p400_p6, %p581_p8  ;;  %s405_s4 = scalar_lea.vmem %s404_s3, 256 }
  0x5a   : > { %p406_p13 = scmp.lt.s32.totalorder %s643_s19, %s404_s3  ;;  %p407_p0 = scmp.lt.s32.totalorder %s405_s4, %s399_s30 }
  0x5b   : > { %p402_p12 = pneg %p401_p9 }
  0x5c   : > { %p408_p5 = por %p407_p0, %p406_p13 }
  0x5e   : > { %p409_p10 = pnand %p408_p5, %p402_p12 }
  0x60   : > { %412 = shalt.err (!%p409_p10)
}
  0x61   : > { %s413_s5 = scalar_lea.hbm %s648_s27, 128  ;;  %s417_s18 = scalar_lea.hbm %s692_s2, 256 }
  0x62   : > { %p414_p1 = scmp.ne.s32.totalorder %s648_s27, %s413_s5  ;;  %p418_p3 = scmp.lt.u32.totalorder %s648_s27, %s692_s2 }
  0x63   : > { %p419_p4 = scmp.lt.u32.totalorder %s417_s18, %s413_s5  ;;  %p421_p6 = scmp.lt.u32.totalorder %s413_s5, %s648_s27 }
  0x64   : > { %p415_p2 = pnand %p414_p1, %p581_p8 }
  0x65   : > { %p420_p11 = por %p419_p4, %p418_p3 }
  0x66   : > { %p416_p7 = pneg %p415_p2 }
  0x67   : > { %p422_p9 = por %p421_p6, %p420_p11 }
  0x69   : > { %p423_p12 = pnand %p422_p9, %p416_p7 }
  0x6b   : > { %426 = shalt.err (!%p423_p12)
}
  0x6c   : > { %290 = dma.vmem_to_hbm [thread:$0]  (%p581_p8), %s643_s19, 128, %s648_s27, %s177_s29  }
  0x6d PF: > { %s202_s25 = sand.u32 1, %s457_s9   ;;  %p711_p13 = scmp.ne.s32.totalorder %s697_s16, 0 }
  0x6e   : > { %p712_p0 = scmp.ge.s32.totalorder %s469_s12, 2  ;;  %s203_s23 = scalar_lea.sflag [#allocation4], %s202_s25 }
  0x70   : > { %p301_p5 = pnand %p712_p0, %p711_p13 }
  0x72   : > { %452 = dma.done.wait (!%p301_p5), %s203_s23, 128  }
  0x73   : > { %454 = vsyncadd (!%p301_p5), %s203_s23, 4294967168  ;;  %p16_p10 = scmp.ge.s32.totalorder %s537_s20, 4   ;;  %s713_s9 = smov %s461_s10 }
  0x74   : > { %s714_s10 = smov %s465_s11  ;;  %s715_s11 = smov %s573_s7 }
  0x75   : > { %s716_s12 = smov %s537_s20  ;;  %18 = sbr.rel (!%p16_p10) target bundleno = 6 (0x6), region = 77 }
  0x7c   :  { %208 = vsyncpa [#allocation3], 1 }
  0x7d   :  { %210 = vsyncpa [#allocation3 + $0x1], 1 }
  0x7e   :  { %211 = vsyncpa [#allocation6], 1 }
  0x7f   :  { %212 = vsyncpa [#allocation4], 1 }
  0x80   :  { %214 = vsyncpa [#allocation4 + $0x1], 1 }

// kernel: _forward.5
= control target key start
LH: loop header
LB: loop body
LE: loop exit
PB: predicated region body
PF: predicated region fallthrough
CT: control target
= control target key end

     0   :  { %9 = vsyncpa [#allocation3], 0  ;;  %s1473_s0 = inlined_call_operand.vmem [shape: bf16[256,128], index: 0, kind: input, shape index: {}]   ;;  %s1474_s1 = inlined_call_operand.vmem [shape: f32[256,128], index: 1, kind: input, shape index: {}]   ;;  %s1475_s2 = inlined_call_operand.vmem [shape: bf16[128,128], index: 2, kind: input, shape index: {}]   ;;  %s1476_s3 = inlined_call_operand.vmem [shape: f32[3,128], index: 3, kind: input, shape index: {}]   ;;  %s1477_s4 = inlined_call_operand.hbm [shape: f32[256,128], index: 4, kind: output, shape index: {}]  }
   0x1   :  { %11 = vsyncpa [#allocation3 + $0x1], 0  ;;  %s1086_s15 = smov 0   ;;  %s1088_s16 = smov 0  }
   0x2   :  { %s1090_s17 = smov 0   ;;  %s1092_s18 = smov 0  }
   0x3 LB: > { %s1107_s19 = sadd.s32 4294967295, %s1056_s18   ;;  %s807_s20 = sadd.s32 4294967294, %s1056_s18   ;;  %s1056_s18 = sphi %s1092_s18, %s1483_s18   ;;  %s1052_s17 = sphi %s1090_s17, %s1482_s17   ;;  %s1048_s16 = sphi %s1088_s16, %s1481_s16   ;;  %s1044_s15 = sphi %s1086_s15, %s1480_s15  }
   0x4   : > { %s1111_s21 = sadd.s32 1, %s1056_s18   ;;  %s118_s22 = sadd.s32 1, %s1052_s17 }
   0x5   : > { %s115_s23 = ssub.s32 %s1056_s18, %s1111_s21  ;;  %p128_p0 = scmp.ne.s32.totalorder %s1052_s17, %s1048_s16 }
   0x6   : > { %p116_p1 = scmp.eq.s32.totalorder %s115_s23, 0  ;;  %p129_p2 = scmp.eq.s32.totalorder %s1107_s19, 1 }
   0x7   : > { %p134_p3 = scmp.ne.s32.totalorder %s1048_s16, %s1044_s15  ;;  %p135_p4 = scmp.eq.s32.totalorder %s807_s20, 1 }
   0x8   : > { %s1122_s24 = scalar_select %p116_p1, %s1052_s17, %s118_s22  }
   0x9   : > { %p1124_p5 = por %p129_p2, %p128_p0  ;;  %p1128_p6 = por %p135_p4, %p134_p3 }
   0xa   : > { %p810_p7 = scmp.ge.s32.totalorder %s1056_s18, 1  ;;  %p177_p8 = scmp.lt.s32.totalorder %s1056_s18, 3 }
   0xc   : > { %p178_p9 = pnand %p810_p7, %p177_p8 }
   0xd   : > { %v946_v0 = vld [vmem:[%s1475_s2] sm:$0xff] (!%p178_p9)   ;;  %s812_s29 = sshll.u32 (!%p178_p9), %s1107_s19, 4  ;;  %v947_v1 = vld [vmem:[%s1475_s2 + $0x8] sm:$0xff] (!%p178_p9)   ;;  %v948_v2 = vld [vmem:[%s1475_s2 + $0x10] sm:$0xff] (!%p178_p9)   ;;  %s840_s27 = sshll.u32 (!%p178_p9), %s1107_s19, 11 }
   0xe   : > { %181 = sbr.rel (%p178_p9) target bundleno = 620 (0x26c), region = 36  ;;  %p209_p10 = scmp.lt.s32.totalorder (!%p178_p9), %s812_s29, 31  ;;  %857 = vmatprep.subr.bf16.mxu0 (!%p178_p9), %v946_v0  ;;  %889 = vmatprep.subr.bf16.mxu1 (!%p178_p9), %v946_v0  ;;  %v949_v3 = vld [vmem:[%s1475_s2 + $0x18] sm:$0xff] (!%p178_p9)   ;;  %v950_v6 = vld [vmem:[%s1475_s2 + $0x20] sm:$0xff] (!%p178_p9)   ;;  %v951_v7 = vld [vmem:[%s1475_s2 + $0x28] sm:$0xff] (!%p178_p9)  }
   0xf   : > { %858 = vmatpush3.bf16.msra.mxu0 (!%p178_p9), %v946_v0  ;;  %897 = vmatpush3.bf16.msra.mxu1 (!%p178_p9), %v946_v0  ;;  %v952_v8 = vld [vmem:[%s1475_s2 + $0x30] sm:$0xff] (!%p178_p9)   ;;  %v953_v9 = vld [vmem:[%s1475_s2 + $0x38] sm:$0xff] (!%p178_p9)   ;;  %v1184_v16 = vld [vmem:[%s1476_s3] ss:$0 sm:$0xff] (!%p178_p9) }
  0x10   : > { %859 = vmatprep.subr.bf16.mxu0 (!%p178_p9), %v947_v1  ;;  %890 = vmatprep.subr.bf16.mxu1 (!%p178_p9), %v947_v1 }
  0x13   : > { %860 = vmatpush3.bf16.msra.mxu0 (!%p178_p9), %v947_v1  ;;  %898 = vmatpush3.bf16.msra.mxu1 (!%p178_p9), %v947_v1 }
  0x14   : > { %861 = vmatprep.subr.bf16.mxu0 (!%p178_p9), %v948_v2  ;;  %891 = vmatprep.subr.bf16.mxu1 (!%p178_p9), %v948_v2 }
  0x15   : > { %s1485_s29 = smov (!%p209_p10, %s812_s29), 31 }
  0x16   : > { %s813_s8 = sshll.u32 %s1485_s29, 2  ;;  %s815_s6 = sshll.u32 %s1485_s29, 3 }
  0x17   : > { %s1150_s11 = scalar_lea.vmem %s1473_s0, %s813_s8  ;;  %862 = vmatpush3.bf16.msra.mxu0 %v948_v2  ;;  %899 = vmatpush3.bf16.msra.mxu1 %v948_v2  ;;  %s1179_s9 = scalar_lea.vmem %s1474_s1, %s815_s6 }
  0x18   : > { %v954_v4 = vld [vmem:[%s1150_s11] sm:$0xff]   ;;  %863 = vmatprep.subr.bf16.mxu0 %v949_v3  ;;  %892 = vmatprep.subr.bf16.mxu1 %v949_v3  ;;  %v956_v10 = vld [vmem:[%s1150_s11 + $0x8] sm:$0xff]   ;;  %v958_v12 = vld [vmem:[%s1150_s11 + $0x10] sm:$0xff]   ;;  %s205_s29 = sand.u32 1, %s1048_s16   ;;  %s1424_s6 = scalar_lea.hbm %s1477_s4, %s840_s27 }
  0x19   : > { %v955_v5 = vld [vmem:[%s1150_s11 + $0x20] sm:$0xff]   ;;  %873 = vmatprep.mubr.bf16.mxu0 %v954_v4  ;;  %v957_v11 = vld [vmem:[%s1150_s11 + $0x28] sm:$0xff]   ;;  %v960_v13 = vld [vmem:[%s1150_s11 + $0x30] sm:$0xff]   ;;  %s811_s14 = sshll.u32 %s205_s29, 7  ;;  %s1432_s19 = scalar_lea.sflag [#allocation3], %s205_s29 }
  0x1a   : > { %881 = vmatprep.mubr.bf16.mxu1 %v955_v5  ;;  %v959_v14 = vld [vmem:[%s1150_s11 + $0x18] sm:$0xff]   ;;  %v462_v19 = vld [vmem:[%s1179_s9 + $0x50] sm:$0xff]  ;;  %v452_v34 = vld [vmem:[%s1179_s9] sm:$0xff]  ;;  %s1360_s23 = scalar_lea.vmem [#allocation2], %s811_s14  ;;  %s1058_s8 = smov [#allocation2]  }
  0x1b   : > { %864 = vmatpush3.bf16.msra.mxu0 %v949_v3  ;;  %900 = vmatpush3.bf16.msra.mxu1 %v949_v3  ;;  %v961_v15 = vld [vmem:[%s1150_s11 + $0x38] sm:$0xff]   ;;  %v454_v20 = vld [vmem:[%s1179_s9 + $0x10] sm:$0xff]  ;;  %v460_v40 = vld [vmem:[%s1179_s9 + $0x40] sm:$0xff]  ;;  %s733_s28 = sshll.u32 %s1360_s23, 4  ;;  %s1426_s28 = int_to_ptr.vmem [resolvable:$true] %s733_s28 }
  0x1c   : > { %865 = vmatprep.subr.bf16.mxu0 %v950_v6  ;;  %893 = vmatprep.subr.bf16.mxu1 %v950_v6  ;;  %v455_v33 = vld [vmem:[%s1179_s9 + $0x18] sm:$0xff]  ;;  %v461_v53 = vld [vmem:[%s1179_s9 + $0x48] sm:$0xff]  ;;  %v458_v58 = vld [vmem:[%s1179_s9 + $0x30] sm:$0xff]  ;;  %s994_s7 = scalar_lea.vmem %s1426_s28, 2048 }
  0x1d   : > { %v463_v39 = vld [vmem:[%s1179_s9 + $0x58] sm:$0xff]  ;;  %v453_v54 = vld [vmem:[%s1179_s9 + $0x8] sm:$0xff]  ;;  %v456_v2 = vld [vmem:[%s1179_s9 + $0x20] sm:$0xff]  ;;  %p995_p11 = scmp.ne.s32.totalorder %s1426_s28, %s994_s7 }
  0x1e   : > { %v459_v57 = vld [vmem:[%s1179_s9 + $0x38] sm:$0xff]  ;;  %v457_v1 = vld [vmem:[%s1179_s9 + $0x28] sm:$0xff] }
  0x1f   : > { %866 = vmatpush3.bf16.msra.mxu0 %v950_v6  ;;  %901 = vmatpush3.bf16.msra.mxu1 %v950_v6  ;;  %v465_v5 = vld [vmem:[%s1179_s9 + $0x68] sm:$0xff]  ;;  %v464_v6 = vld [vmem:[%s1179_s9 + $0x60] sm:$0xff]  ;;  %p996_p12 = pnand %p995_p11, %p1124_p5 }
  0x20   : > { %867 = vmatprep.subr.bf16.mxu0 %v951_v7  ;;  %894 = vmatprep.subr.bf16.mxu1 %v951_v7 }
  0x21   : > { %p997_p13 = pneg %p996_p12 }
  0x23   : > { %868 = vmatpush3.bf16.msra.mxu0 %v951_v7  ;;  %902 = vmatpush3.bf16.msra.mxu1 %v951_v7 }
  0x24   : > { %869 = vmatprep.subr.bf16.mxu0 %v952_v8  ;;  %895 = vmatprep.subr.bf16.mxu1 %v952_v8 }
  0x27   : > { %870 = vmatpush3.bf16.msra.mxu0 %v952_v8  ;;  %903 = vmatpush3.bf16.msra.mxu1 %v952_v8 }
  0x28   : > { %871 = vmatprep.subr.bf16.mxu0 %v953_v9  ;;  %896 = vmatprep.subr.bf16.mxu1 %v953_v9 }
  0x2b   : > { %872 = vmatpush3.bf16.msra.mxu0 %v953_v9  ;;  %904 = vmatpush3.bf16.msra.mxu1 %v953_v9 }
  0x2e   : > { %874 = vmatmul.mubr.bf16.vlgmr.msra.gmra.mrb[0].mxu0 %v956_v10  ;;  %882 = vmatmul.mubr.bf16.vlgmr.msra.gmra.mrb[0].mxu1 %v957_v11 }
  0x2f   : > { %877 = vmatprep.mubr.bf16.mxu0 %v958_v12  ;;  %885 = vmatprep.mubr.bf16.mxu1 %v960_v13  ;;  %v467_v13 = vld [vmem:[%s1179_s9 + $0x78] sm:$0xff] }
  0x36   : > { %878 = vmatmul.mubr.bf16.gmra.mrb[4].mxu0 %v959_v14  ;;  %886 = vmatmul.mubr.bf16.gmra.mrb[4].mxu1 %v961_v15  ;;  %v466_v14 = vld [vmem:[%s1179_s9 + $0x70] sm:$0xff]  ;;  %s998_s9 = sshll.u32 %s1058_s8, 4  ;;  %s999_s9 = int_to_ptr.vmem [resolvable:$false] %s998_s9 }
  0x37   : > { %s1000_s10 = scalar_lea.vmem %s999_s9, 4096  ;;  %p1001_p0 = scmp.lt.s32.totalorder %s1426_s28, %s999_s9 }
  0x38   : > { %p1002_p1 = scmp.lt.s32.totalorder %s1000_s10, %s994_s7 }
  0x3a   : > { %p1003_p2 = por %p1002_p1, %p1001_p0 }
  0x3c   : > { %p1004_p3 = pnand %p1003_p2, %p997_p13 }
 0x101   : > { %v875_v17 = vpop.f32.mrb[0].mxu0  ;;  %v883_v18 = vpop.f32.mrb[0].mxu1 }
 0x102   : > { %v398_v21 = vadd.f32 %v875_v17, %v1184_v16  ;;  %v430_v22 = vadd.f32 %v883_v18, %v1184_v16  ;;  %v389_v23 = vpop.f32.mrb[1].mxu0  ;;  %v421_v24 = vpop.f32.mrb[1].mxu1 }
 0x103   : > { %v876_v25 = vpop.f32.mrb[2].mxu0  ;;  %v884_v26 = vpop.f32.mrb[2].mxu1  ;;  %v390_v27 = vadd.f32 %v1184_v16, %v389_v23  ;;  %v422_v35 = vadd.f32 %v1184_v16, %v421_v24 }
 0x104   : > { %v401_v28 = vadd.f32 %v876_v25, %v1184_v16  ;;  %v392_v29 = vpop.f32.mrb[3].mxu0  ;;  %v424_v30 = vpop.f32.mrb[3].mxu1  ;;  %v1192_v31 = vadd.f32 %v462_v19, %v430_v22  ;;  %v1194_v32 = vadd.f32 %v454_v20, %v398_v21  ;;  %v433_v36 = vadd.f32 %v884_v26, %v1184_v16 }
 0x105   : > { %v1204_v38 = vadd.f32 %v452_v34, %v390_v27  ;;  %v393_v47 = vadd.f32 %v1184_v16, %v392_v29  ;;  %v425_v48 = vadd.f32 %v1184_v16, %v424_v30  ;;  %v1214_v50 = vadd.f32 %v460_v40, %v422_v35 }
 0x106   : > { %504 = vadd.xlane.f32.xlu0 %v1192_v31  ;;  %488 = vadd.xlane.f32.xlu1 %v1194_v32  ;;  %v1202_v37 = vadd.f32 %v455_v33, %v401_v28  ;;  %v1212_v49 = vadd.f32 %v463_v39, %v433_v36 }
 0x107   : > { %v1224_v59 = vadd.f32 %v461_v53, %v425_v48  ;;  %v469_v60 = vadd.f32 %v453_v54, %v393_v47 }
 0x109   : > { %v879_v41 = vpop.f32.mrb[4].mxu0  ;;  %v887_v42 = vpop.f32.mrb[4].mxu1 }
 0x10a   : > { %490 = vadd.xlane.f32.xlu1 %v1202_v37  ;;  %484 = vadd.xlane.f32.xlu0 %v1204_v38  ;;  %v405_v43 = vpop.f32.mrb[5].mxu0  ;;  %v437_v44 = vpop.f32.mrb[5].mxu1  ;;  %v414_v55 = vadd.f32 %v879_v41, %v1184_v16  ;;  %v446_v11 = vadd.f32 %v887_v42, %v1184_v16 }
 0x10b   : > { %v880_v45 = vpop.f32.mrb[6].mxu0  ;;  %v888_v46 = vpop.f32.mrb[6].mxu1  ;;  %v406_v63 = vadd.f32 %v1184_v16, %v405_v43  ;;  %v438_v3 = vadd.f32 %v1184_v16, %v437_v44 }
 0x10c   : > { %v408_v51 = vpop.f32.mrb[7].mxu0  ;;  %v440_v52 = vpop.f32.mrb[7].mxu1  ;;  %v417_v56 = vadd.f32 %v880_v45, %v1184_v16  ;;  %v1229_v62 = vadd.f32 %v458_v58, %v414_v55  ;;  %v449_v12 = vadd.f32 %v888_v46, %v1184_v16  ;;  %v1259_v17 = vadd.f32 %v466_v14, %v446_v11 }
 0x10d   : > { %v409_v0 = vadd.f32 %v1184_v16, %v408_v51  ;;  %v441_v4 = vadd.f32 %v1184_v16, %v440_v52  ;;  %v1243_v8 = vadd.f32 %v456_v2, %v406_v63  ;;  %v1249_v10 = vadd.f32 %v464_v6, %v438_v3 }
 0x10e   : > { %506 = vadd.xlane.f32.xlu1 %v1212_v49  ;;  %500 = vadd.xlane.f32.xlu0 %v1214_v50  ;;  %v1227_v61 = vadd.f32 %v459_v57, %v417_v56  ;;  %v1257_v15 = vadd.f32 %v467_v13, %v449_v12 }
 0x10f   : > { %v1241_v7 = vadd.f32 %v457_v1, %v409_v0  ;;  %v1247_v9 = vadd.f32 %v465_v5, %v441_v4 }
 0x112   : > { %502 = vadd.xlane.f32.xlu1 %v1224_v59  ;;  %486 = vadd.xlane.f32.xlu0 %v469_v60 }
 0x116   : > { %498 = vadd.xlane.f32.xlu1 %v1227_v61  ;;  %496 = vadd.xlane.f32.xlu0 %v1229_v62 }
 0x11a   : > { %494 = vadd.xlane.f32.xlu1 %v1241_v7  ;;  %492 = vadd.xlane.f32.xlu0 %v1243_v8 }
 0x11e   : > { %510 = vadd.xlane.f32.xlu1 %v1247_v9  ;;  %508 = vadd.xlane.f32.xlu0 %v1249_v10 }
 0x122   : > { %514 = vadd.xlane.f32.xlu1 %v1257_v15  ;;  %512 = vadd.xlane.f32.xlu0 %v1259_v17 }
 0x193   : > { %v505_v18 = vpop.xlane.xlu0 %504  ;;  %v489_v19 = vpop.xlane.xlu1 %488 }
 0x194   : > { %v527_v20 = vmul.f32 0.0078125, %v505_v18  ;;  %v519_v21 = vmul.f32 0.0078125, %v489_v19 }
 0x196   : > { %v1264_v16 = vsub.f32 %v1194_v32, %v519_v21  ;;  %v1267_v24 = vsub.f32 %v1192_v31, %v527_v20 }
 0x197   : > { %v491_v22 = vpop.xlane.xlu1 %490  ;;  %v485_v23 = vpop.xlane.xlu0 %484 }
 0x198   : > { %v520_v25 = vmul.f32 0.0078125, %v491_v22  ;;  %v517_v26 = vmul.f32 0.0078125, %v485_v23  ;;  %v551_v27 = vmul.f32 %v1264_v16, %v1264_v16  ;;  %v559_v35 = vmul.f32 %v1267_v24, %v1267_v24 }
 0x19a   : > { %v1272_v28 = vsub.f32 %v1202_v37, %v520_v25  ;;  %569 = vadd.xlane.f32.xlu0 %v551_v27  ;;  %v1275_v29 = vsub.f32 %v1204_v38, %v517_v26 }
 0x19b   : > { %v507_v30 = vpop.xlane.xlu1 %506  ;;  %v501_v32 = vpop.xlane.xlu0 %500 }
 0x19c   : > { %v528_v33 = vmul.f32 0.0078125, %v507_v30  ;;  %v525_v34 = vmul.f32 0.0078125, %v501_v32  ;;  %v552_v31 = vmul.f32 %v1272_v28, %v1272_v28  ;;  %v549_v38 = vmul.f32 %v1275_v29, %v1275_v29 }
 0x19e   : > { %v1282_v36 = vsub.f32 %v1212_v49, %v528_v33  ;;  %571 = vadd.xlane.f32.xlu1 %v552_v31  ;;  %585 = vadd.xlane.f32.xlu0 %v559_v35  ;;  %v1287_v40 = vsub.f32 %v1214_v50, %v525_v34 }
 0x19f   : > { %v503_v37 = vpop.xlane.xlu1 %502  ;;  %v487_v39 = vpop.xlane.xlu0 %486 }
 0x1a0   : > { %v526_v41 = vmul.f32 0.0078125, %v503_v37  ;;  %v518_v42 = vmul.f32 0.0078125, %v487_v39  ;;  %v560_v43 = vmul.f32 %v1282_v36, %v1282_v36  ;;  %v557_v50 = vmul.f32 %v1287_v40, %v1287_v40 }
 0x1a2   : > { %v1291_v44 = vsub.f32 %v469_v60, %v518_v42  ;;  %587 = vadd.xlane.f32.xlu1 %v560_v43  ;;  %565 = vadd.xlane.f32.xlu0 %v549_v38  ;;  %v1294_v45 = vsub.f32 %v1224_v59, %v526_v41  ;;  %v1346_v43 = vld [vmem:[%s1476_s3 + $0x1] ss:$0 sm:$0xff] }
 0x1a3   : > { %v499_v46 = vpop.xlane.xlu1 %498  ;;  %v497_v47 = vpop.xlane.xlu0 %496 }
 0x1a4   : > { %v524_v48 = vmul.f32 0.0078125, %v499_v46  ;;  %v523_v49 = vmul.f32 0.0078125, %v497_v47  ;;  %v550_v51 = vmul.f32 %v1291_v44, %v1291_v44  ;;  %v558_v55 = vmul.f32 %v1294_v45, %v1294_v45 }
 0x1a6   : > { %v1301_v52 = vsub.f32 %v1229_v62, %v523_v49  ;;  %581 = vadd.xlane.f32.xlu0 %v557_v50  ;;  %567 = vadd.xlane.f32.xlu1 %v550_v51  ;;  %v1306_v56 = vsub.f32 %v1227_v61, %v524_v48  ;;  %v1354_v51 = vld [vmem:[%s1476_s3 + $0x2] ss:$0 sm:$0xff] }
 0x1a7   : > { %v495_v53 = vpop.xlane.xlu1 %494  ;;  %v493_v54 = vpop.xlane.xlu0 %492 }
 0x1a8   : > { %v522_v57 = vmul.f32 0.0078125, %v495_v53  ;;  %v521_v58 = vmul.f32 0.0078125, %v493_v54  ;;  %v555_v59 = vmul.f32 %v1301_v52, %v1301_v52  ;;  %v556_v61 = vmul.f32 %v1306_v56, %v1306_v56 }
 0x1aa   : > { %v1311_v60 = vsub.f32 %v1243_v8, %v521_v58  ;;  %583 = vadd.xlane.f32.xlu1 %v558_v55  ;;  %577 = vadd.xlane.f32.xlu0 %v555_v59  ;;  %v1314_v62 = vsub.f32 %v1241_v7, %v522_v57 }
 0x1ab   : > { %v511_v63 = vpop.xlane.xlu1 %510  ;;  %v509_v0 = vpop.xlane.xlu0 %508 }
 0x1ac   : > { %v530_v1 = vmul.f32 0.0078125, %v511_v63  ;;  %v529_v2 = vmul.f32 0.0078125, %v509_v0  ;;  %v553_v3 = vmul.f32 %v1311_v60, %v1311_v60  ;;  %v554_v7 = vmul.f32 %v1314_v62, %v1314_v62 }
 0x1ae   : > { %v1321_v4 = vsub.f32 %v1249_v10, %v529_v2  ;;  %579 = vadd.xlane.f32.xlu1 %v556_v61  ;;  %573 = vadd.xlane.f32.xlu0 %v553_v3  ;;  %v1326_v8 = vsub.f32 %v1247_v9, %v530_v1 }
 0x1af   : > { %v515_v5 = vpop.xlane.xlu1 %514  ;;  %v513_v6 = vpop.xlane.xlu0 %512 }
 0x1b0   : > { %v532_v11 = vmul.f32 0.0078125, %v515_v5  ;;  %v531_v12 = vmul.f32 0.0078125, %v513_v6  ;;  %v561_v13 = vmul.f32 %v1321_v4, %v1321_v4  ;;  %v562_v18 = vmul.f32 %v1326_v8, %v1326_v8 }
 0x1b2   : > { %v1331_v14 = vsub.f32 %v1259_v17, %v531_v12  ;;  %575 = vadd.xlane.f32.xlu1 %v554_v7  ;;  %589 = vadd.xlane.f32.xlu0 %v561_v13  ;;  %v1334_v10 = vsub.f32 %v1257_v15, %v532_v11 }
 0x1b4   : > { %v563_v9 = vmul.f32 %v1331_v14, %v1331_v14  ;;  %v564_v19 = vmul.f32 %v1334_v10, %v1334_v10 }
 0x1b6   : > { %591 = vadd.xlane.f32.xlu1 %v562_v18  ;;  %593 = vadd.xlane.f32.xlu0 %v563_v9 }
 0x1ba   : > { %595 = vadd.xlane.f32.xlu1 %v564_v19 }
 0x227   : > { %v570_v20 = vpop.xlane.xlu0 %569 }
 0x228   : > { %v599_v17 = vmul.f32 0.0078125, %v570_v20 }
 0x22a   : > { %v615_v21 = vadd.f32 1e-12, %v599_v17 }
 0x22b   : > { %v572_v22 = vpop.xlane.xlu1 %571  ;;  %v586_v23 = vpop.xlane.xlu0 %585 }
 0x22c   : > { %962 = vrsqrt.f32 %v615_v21  ;;  %v600_v15 = vmul.f32 0.0078125, %v572_v22  ;;  %v607_v25 = vmul.f32 0.0078125, %v586_v23 }
 0x22e   : > { %v616_v26 = vadd.f32 1e-12, %v600_v15  ;;  %v623_v27 = vadd.f32 1e-12, %v607_v25 }
 0x22f   : > { %v588_v30 = vpop.xlane.xlu1 %587  ;;  %v566_v32 = vpop.xlane.xlu0 %565 }
 0x230   : > { %964 = vrsqrt.f32 %v616_v26  ;;  %v608_v33 = vmul.f32 0.0078125, %v588_v30  ;;  %v597_v34 = vmul.f32 0.0078125, %v566_v32 }
 0x231   : > { %966 = vrsqrt.f32 %v623_v27 }
 0x232   : > { %v624_v31 = vadd.f32 1e-12, %v608_v33  ;;  %v613_v35 = vadd.f32 1e-12, %v597_v34 }
 0x233   : > { %v568_v37 = vpop.xlane.xlu1 %567  ;;  %v582_v39 = vpop.xlane.xlu0 %581 }
 0x234   : > { %968 = vrsqrt.f32 %v624_v31  ;;  %v598_v38 = vmul.f32 0.0078125, %v568_v37  ;;  %v605_v41 = vmul.f32 0.0078125, %v582_v39 }
 0x235   : > { %970 = vrsqrt.f32 %v613_v35 }
 0x236   : > { %v963_v42 = vpop.eup %962  ;;  %v614_v46 = vadd.f32 1e-12, %v598_v38  ;;  %v621_v47 = vadd.f32 1e-12, %v605_v41 }
 0x237   : > { %v647_v48 = vmul.f32 %v963_v42, %v1264_v16  ;;  %v584_v49 = vpop.xlane.xlu1 %583  ;;  %v578_v50 = vpop.xlane.xlu0 %577 }
 0x238   : > { %972 = vrsqrt.f32 %v614_v46  ;;  %v606_v53 = vmul.f32 0.0078125, %v584_v49  ;;  %v603_v54 = vmul.f32 0.0078125, %v578_v50 }
 0x239   : > { %v668_v55 = vmul.f32 %v1346_v43, %v647_v48  ;;  %974 = vrsqrt.f32 %v621_v47 }
 0x23a   : > { %v965_v57 = vpop.eup %964  ;;  %v622_v58 = vadd.f32 1e-12, %v606_v53  ;;  %v619_v59 = vadd.f32 1e-12, %v603_v54 }
 0x23b   : > { %v967_v63 = vpop.eup %966  ;;  %v689_v0 = vadd.f32 %v1354_v51, %v668_v55  ;;  %v648_v16 = vmul.f32 %v965_v57, %v1272_v28  ;;  %v580_v1 = vpop.xlane.xlu1 %579 }
 0x23c   : > { %v574_v2 = vpop.xlane.xlu0 %573  ;;  %v655_v61 = vmul.f32 %v967_v63, %v1267_v24  ;;  %976 = vrsqrt.f32 %v622_v58  ;;  %v604_v3 = vmul.f32 0.0078125, %v580_v1 }
 0x23d   : > { %v601_v5 = vmul.f32 0.0078125, %v574_v2  ;;  %705 = vst [vmem:[%s1360_s23 + $0x10] sm:$0xff] %v689_v0  ;;  %v669_v6 = vmul.f32 %v1346_v43, %v648_v16  ;;  %978 = vrsqrt.f32 %v619_v59 }
 0x23e   : > { %v969_v7 = vpop.eup %968  ;;  %v676_v11 = vmul.f32 %v1346_v43, %v655_v61  ;;  %v620_v12 = vadd.f32 1e-12, %v604_v3 }
 0x23f   : > { %v617_v28 = vadd.f32 1e-12, %v601_v5  ;;  %v971_v13 = vpop.eup %970  ;;  %v690_v24 = vadd.f32 %v1354_v51, %v669_v6  ;;  %v656_v18 = vmul.f32 %v969_v7, %v1282_v36  ;;  %v576_v9 = vpop.xlane.xlu1 %575 }
 0x240   : > { %v590_v19 = vpop.xlane.xlu0 %589  ;;  %v697_v20 = vadd.f32 %v1354_v51, %v676_v11  ;;  %v645_v17 = vmul.f32 %v971_v13, %v1275_v29  ;;  %980 = vrsqrt.f32 %v620_v12  ;;  %v602_v21 = vmul.f32 0.0078125, %v576_v9 }
 0x241   : > { %706 = vst [vmem:[%s1360_s23 + $0x18] sm:$0xff] %v690_v24  ;;  %v677_v22 = vmul.f32 %v1346_v43, %v656_v18  ;;  %982 = vrsqrt.f32 %v617_v28  ;;  %v609_v23 = vmul.f32 0.0078125, %v590_v19 }
 0x242   : > { %v973_v15 = vpop.eup %972  ;;  %713 = vst [vmem:[%s1360_s23 + $0x50] sm:$0xff] %v697_v20  ;;  %v666_v25 = vmul.f32 %v1346_v43, %v645_v17  ;;  %v618_v26 = vadd.f32 1e-12, %v602_v21 }
 0x243   : > { %v975_v36 = vpop.eup %974  ;;  %v698_v27 = vadd.f32 %v1354_v51, %v677_v22  ;;  %v646_v30 = vmul.f32 %v973_v15, %v1291_v44  ;;  %v625_v29 = vadd.f32 1e-12, %v609_v23  ;;  %v592_v32 = vpop.xlane.xlu1 %591 }
 0x244   : > { %v594_v33 = vpop.xlane.xlu0 %593  ;;  %v687_v34 = vadd.f32 %v1354_v51, %v666_v25  ;;  %v653_v31 = vmul.f32 %v975_v36, %v1287_v40  ;;  %984 = vrsqrt.f32 %v618_v26  ;;  %v610_v35 = vmul.f32 0.0078125, %v592_v32 }
 0x245   : > { %714 = vst [vmem:[%s1360_s23 + $0x58] sm:$0xff] %v698_v27  ;;  %v667_v37 = vmul.f32 %v1346_v43, %v646_v30  ;;  %986 = vrsqrt.f32 %v625_v29  ;;  %v611_v39 = vmul.f32 0.0078125, %v594_v33 }
 0x246   : > { %v977_v38 = vpop.eup %976  ;;  %703 = vst [vmem:[%s1360_s23] sm:$0xff] %v687_v34  ;;  %v674_v44 = vmul.f32 %v1346_v43, %v653_v31  ;;  %v626_v41 = vadd.f32 1e-12, %v610_v35 }
 0x247   : > { %v979_v42 = vpop.eup %978  ;;  %v688_v46 = vadd.f32 %v1354_v51, %v667_v37  ;;  %v654_v47 = vmul.f32 %v977_v38, %v1294_v45  ;;  %v627_v40 = vadd.f32 1e-12, %v611_v39  ;;  %v596_v48 = vpop.xlane.xlu1 %595 }
 0x248   : > { %v695_v49 = vadd.f32 %v1354_v51, %v674_v44  ;;  %v651_v50 = vmul.f32 %v979_v42, %v1301_v52  ;;  %988 = vrsqrt.f32 %v626_v41  ;;  %v612_v53 = vmul.f32 0.0078125, %v596_v48 }
 0x249   : > { %704 = vst [vmem:[%s1360_s23 + $0x8] sm:$0xff] %v688_v46  ;;  %v675_v54 = vmul.f32 %v1346_v43, %v654_v47  ;;  %990 = vrsqrt.f32 %v627_v40 }
 0x24a   : > { %v981_v55 = vpop.eup %980  ;;  %711 = vst [vmem:[%s1360_s23 + $0x40] sm:$0xff] %v695_v49  ;;  %v672_v57 = vmul.f32 %v1346_v43, %v651_v50  ;;  %v628_v58 = vadd.f32 1e-12, %v612_v53 }
 0x24b   : > { %v983_v45 = vpop.eup %982  ;;  %v696_v59 = vadd.f32 %v1354_v51, %v675_v54  ;;  %v652_v63 = vmul.f32 %v981_v55, %v1306_v56 }
 0x24c   : > { %v693_v52 = vadd.f32 %v1354_v51, %v672_v57  ;;  %v649_v0 = vmul.f32 %v983_v45, %v1311_v60  ;;  %992 = vrsqrt.f32 %v628_v58 }
 0x24d   : > { %712 = vst [vmem:[%s1360_s23 + $0x48] sm:$0xff] %v696_v59  ;;  %v673_v16 = vmul.f32 %v1346_v43, %v652_v63 }
 0x24e   : > { %v985_v1 = vpop.eup %984  ;;  %709 = vst [vmem:[%s1360_s23 + $0x30] sm:$0xff] %v693_v52  ;;  %v670_v2 = vmul.f32 %v1346_v43, %v649_v0 }
 0x24f   : > { %v987_v61 = vpop.eup %986  ;;  %v694_v3 = vadd.f32 %v1354_v51, %v673_v16  ;;  %v650_v5 = vmul.f32 %v985_v1, %v1314_v62 }
 0x250   : > { %v691_v56 = vadd.f32 %v1354_v51, %v670_v2  ;;  %v657_v6 = vmul.f32 %v987_v61, %v1321_v4 }
 0x251   : > { %710 = vst [vmem:[%s1360_s23 + $0x38] sm:$0xff] %v694_v3  ;;  %v671_v60 = vmul.f32 %v1346_v43, %v650_v5 }
 0x252   : > { %v989_v7 = vpop.eup %988  ;;  %707 = vst [vmem:[%s1360_s23 + $0x20] sm:$0xff] %v691_v56  ;;  %v678_v11 = vmul.f32 %v1346_v43, %v657_v6 }
 0x253   : > { %v991_v12 = vpop.eup %990  ;;  %v692_v28 = vadd.f32 %v1354_v51, %v671_v60  ;;  %v658_v62 = vmul.f32 %v989_v7, %v1326_v8 }
 0x254   : > { %v699_v13 = vadd.f32 %v1354_v51, %v678_v11  ;;  %v659_v4 = vmul.f32 %v991_v12, %v1331_v14 }
 0x255   : > { %708 = vst [vmem:[%s1360_s23 + $0x28] sm:$0xff] %v692_v28  ;;  %v679_v24 = vmul.f32 %v1346_v43, %v658_v62 }
 0x256   : > { %v993_v18 = vpop.eup %992  ;;  %715 = vst [vmem:[%s1360_s23 + $0x60] sm:$0xff] %v699_v13  ;;  %v680_v9 = vmul.f32 %v1346_v43, %v659_v4 }
 0x257   : > { %v700_v19 = vadd.f32 %v1354_v51, %v679_v24  ;;  %v660_v20 = vmul.f32 %v993_v18, %v1334_v10 }
 0x258   : > { %v701_v8 = vadd.f32 %v1354_v51, %v680_v9 }
 0x259   : > { %716 = vst [vmem:[%s1360_s23 + $0x68] sm:$0xff] %v700_v19  ;;  %v681_v14 = vmul.f32 %v1346_v43, %v660_v20 }
 0x25a   : > { %717 = vst [vmem:[%s1360_s23 + $0x70] sm:$0xff] %v701_v8 }
 0x25b   : > { %v702_v10 = vadd.f32 %v1354_v51, %v681_v14 }
 0x25d   : > { %718 = vst [vmem:[%s1360_s23 + $0x78] sm:$0xff] %v702_v10 }
 0x25e   : > { %1007 = shalt.err (!%p1004_p3)
}
 0x25f   : > { %s1008_s12 = scalar_lea.hbm %s1424_s6, 2048  ;;  %s1012_s13 = scalar_lea.hbm %s1477_s4, 4096 }
 0x260   : > { %p1009_p4 = scmp.ne.s32.totalorder %s1424_s6, %s1008_s12  ;;  %p1013_p9 = scmp.lt.u32.totalorder %s1424_s6, %s1477_s4 }
 0x261   : > { %p1014_p10 = scmp.lt.u32.totalorder %s1012_s13, %s1008_s12  ;;  %p1016_p12 = scmp.lt.u32.totalorder %s1008_s12, %s1424_s6 }
 0x262   : > { %p1010_p7 = pnand %p1009_p4, %p1124_p5 }
 0x263   : > { %p1015_p11 = por %p1014_p10, %p1013_p9 }
 0x264   : > { %p1011_p8 = pneg %p1010_p7 }
 0x265   : > { %p1017_p13 = por %p1016_p12, %p1015_p11 }
 0x267   : > { %p1018_p0 = pnand %p1017_p13, %p1011_p8 }
 0x269   : > { %1021 = shalt.err (!%p1018_p0)
}
 0x26a   : > { %s1059_s22 = smov 128   ;;  %s1060_s23 = smov 8  }
 0x26b   : > { %905 = dma.vmem_to_hbm [thread:$0]  (%p1124_p5), %s1426_s28, 2048, %s1424_s6, %s1432_s19, %s1059_s22, %s1059_s22, %s1060_s23  }
 0x26c PF: > { %p911_p1 = scmp.ge.s32.totalorder %s1056_s18, 2  ;;  %s748_s27 = sand.u32 1, %s1044_s15  }
 0x26d   : > { %s749_s30 = scalar_lea.sflag [#allocation3], %s748_s27 }
 0x26e   : > { %p908_p2 = pnand %p911_p1, %p1128_p6 }
 0x270   : > { %1039 = dma.done.wait (!%p908_p2), %s749_s30, 2048  }
 0x271   : > { %1041 = vsyncadd (!%p908_p2), %s749_s30, 4294965248  ;;  %p14_p3 = scmp.ge.s32.totalorder %s1111_s21, 4   ;;  %s1480_s15 = smov %s1048_s16 }
 0x272   : > { %s1481_s16 = smov %s1052_s17  ;;  %s1482_s17 = smov %s1122_s24 }
 0x273   : > { %s1483_s18 = smov %s1111_s21  ;;  %16 = sbr.rel (!%p14_p3) target bundleno = 3 (0x3), region = 74 }
 0x27a   :  { %754 = vsyncpa [#allocation3], 1 }
 0x27b   :  { %756 = vsyncpa [#allocation3 + $0x1], 1 }

// kernel: _forward.3
= control target key start
LH: loop header
LB: loop body
LE: loop exit
PB: predicated region body
PF: predicated region fallthrough
CT: control target
= control target key end

     0   :  { %s1341_s15 = smov 0   ;;  %s1687_s0 = inlined_call_operand.vmem [shape: f32[256,128], index: 0, kind: input, shape index: {}]   ;;  %s1688_s1 = inlined_call_operand.vmem [shape: f32[2,128], index: 1, kind: input, shape index: {}]   ;;  %s1689_s2 = inlined_call_operand.vmem [shape: bf16[128,384], index: 2, kind: input, shape index: {}]   ;;  %s1690_s3 = inlined_call_operand.vmem [shape: f32[1,384], index: 3, kind: input, shape index: {}]   ;;  %s1691_s4 = inlined_call_operand.vmem [shape: bf16[256,384], index: 4, kind: output, shape index: {}]  }
   0x1 LB: > { %s1084_s16 = sadd.s32 4294967295, %s1313_s15   ;;  %p1088_p0 = scmp.ge.s32.totalorder %s1313_s15, 1  ;;  %s1313_s15 = sphi %s1341_s15, %s14_s15  }
   0x2   : > { %p163_p1 = scmp.lt.s32.totalorder %s1313_s15, 3 }
   0x4   : > { %p164_p2 = pnand %p1088_p0, %p163_p1 }
   0x5   : > { %s1089_s17 = sshll.u32 (!%p164_p2), %s1084_s16, 4  ;;  %v1243_v16 = vld [vmem:[%s1689_s2 + $0x4] ss:$12 sps:$4 sm:$0xff] (!%p164_p2)   ;;  %v1245_v17 = vld [vmem:[%s1689_s2] ss:$12 sps:$4 sm:$0xff] (!%p164_p2)  }
   0x6   : > { %167 = sbr.rel (%p164_p2) target bundleno = 610 (0x262), region = 36  ;;  %p191_p3 = scmp.lt.s32.totalorder (!%p164_p2), %s1089_s17, 31  ;;  %v1246_v18 = vld [vmem:[%s1689_s2 + $0x1c] ss:$12 sps:$4 sm:$0xff] (!%p164_p2)   ;;  %624 = vmatprep.subr.bf16.mxu0 (!%p164_p2), %v1243_v16  ;;  %v1249_v58 = vld [vmem:[%s1689_s2 + $0x18] ss:$12 sps:$4 sm:$0xff] (!%p164_p2)  }
   0x7   : > { %v1248_v19 = vld [vmem:[%s1689_s2 + $0x8] ss:$12 sps:$4 sm:$0xff] (!%p164_p2)   ;;  %625 = vmatpush1.bf16.msra.mxu0 (!%p164_p2), %v1245_v17 }
   0x8   : > { %1201 = vmatprep.subr.bf16.mxu1 (!%p164_p2), %v1248_v19  ;;  %626 = vmatprep.subr.bf16.mxu0 (!%p164_p2), %v1246_v18  ;;  %v1254_v18 = vld [vmem:[%s1689_s2 + $0x4c] ss:$12 sps:$4 sm:$0xff] (!%p164_p2)  }
   0x9   : > { %1202 = vmatpush3.bf16.msra.mxu1 (!%p164_p2), %v1248_v19  ;;  %v1256_v19 = vld [vmem:[%s1689_s2 + $0x38] ss:$12 sps:$4 sm:$0xff] (!%p164_p2)  }
   0xb   : > { %627 = vmatpush1.bf16.msra.mxu0 (!%p164_p2), %v1249_v58 }
   0xd   : > { %s1693_s17 = smov (!%p191_p3, %s1089_s17), 31 }
   0xe   : > { %s1090_s18 = sshll.u32 %s1693_s17, 3  ;;  %s1233_s28 = smul.u32 12, %s1693_s17 }
   0xf   : > { %s194_s21 = scalar_lea.vmem %s1687_s0, %s1090_s18 }
  0x10   : > { %v204_v0 = vld [vmem:[%s194_s21] sm:$0xff]  ;;  %v206_v1 = vld [vmem:[%s194_s21 + $0x10] sm:$0xff]  ;;  %v205_v2 = vld [vmem:[%s194_s21 + $0x8] sm:$0xff]  ;;  %s1604_s5 = scalar_lea.vmem %s1691_s4, %s1233_s28 }
  0x11   : > { %220 = vadd.xlane.f32.xlu0 %v204_v0  ;;  %224 = vadd.xlane.f32.xlu1 %v206_v1  ;;  %v207_v3 = vld [vmem:[%s194_s21 + $0x18] sm:$0xff]  ;;  %v208_v4 = vld [vmem:[%s194_s21 + $0x20] sm:$0xff]  ;;  %v209_v5 = vld [vmem:[%s194_s21 + $0x28] sm:$0xff] }
  0x12   : > { %v210_v6 = vld [vmem:[%s194_s21 + $0x30] sm:$0xff]  ;;  %v211_v7 = vld [vmem:[%s194_s21 + $0x38] sm:$0xff]  ;;  %v1355_v8 = vld [vmem:[%s194_s21 + $0x40] sm:$0xff] }
  0x13   : > { %v1357_v9 = vld [vmem:[%s194_s21 + $0x48] sm:$0xff]  ;;  %v1361_v10 = vld [vmem:[%s194_s21 + $0x50] sm:$0xff]  ;;  %v1363_v11 = vld [vmem:[%s194_s21 + $0x58] sm:$0xff] }
  0x14   : > { %v1367_v12 = vld [vmem:[%s194_s21 + $0x60] sm:$0xff]  ;;  %v1369_v13 = vld [vmem:[%s194_s21 + $0x68] sm:$0xff]  ;;  %v1373_v14 = vld [vmem:[%s194_s21 + $0x70] sm:$0xff] }
  0x15   : > { %222 = vadd.xlane.f32.xlu0 %v205_v2  ;;  %226 = vadd.xlane.f32.xlu1 %v207_v3  ;;  %v1375_v15 = vld [vmem:[%s194_s21 + $0x78] sm:$0xff] }
  0x19   : > { %228 = vadd.xlane.f32.xlu0 %v208_v4  ;;  %230 = vadd.xlane.f32.xlu1 %v209_v5 }
  0x1d   : > { %232 = vadd.xlane.f32.xlu0 %v210_v6  ;;  %234 = vadd.xlane.f32.xlu1 %v211_v7 }
  0x21   : > { %236 = vadd.xlane.f32.xlu0 %v1355_v8  ;;  %238 = vadd.xlane.f32.xlu1 %v1357_v9 }
  0x25   : > { %240 = vadd.xlane.f32.xlu0 %v1361_v10  ;;  %242 = vadd.xlane.f32.xlu1 %v1363_v11 }
  0x29   : > { %244 = vadd.xlane.f32.xlu0 %v1367_v12  ;;  %246 = vadd.xlane.f32.xlu1 %v1369_v13 }
  0x2d   : > { %248 = vadd.xlane.f32.xlu0 %v1373_v14  ;;  %250 = vadd.xlane.f32.xlu1 %v1375_v15 }
  0x9e   : > { %v221_v20 = vpop.xlane.xlu0 %220  ;;  %v225_v21 = vpop.xlane.xlu1 %224 }
  0x9f   : > { %v253_v22 = vmul.f32 0.0078125, %v221_v20  ;;  %v255_v23 = vmul.f32 0.0078125, %v225_v21 }
  0xa1   : > { %v1391_v24 = vsub.f32 %v204_v0, %v253_v22  ;;  %v1393_v25 = vsub.f32 %v206_v1, %v255_v23  ;;  %v1250_v0 = vld [vmem:[%s1689_s2 + $0x34] ss:$12 sps:$4 sm:$0xff]  }
  0xa2   : > { %v223_v26 = vpop.xlane.xlu0 %222  ;;  %v227_v27 = vpop.xlane.xlu1 %226  ;;  %v1252_v1 = vld [vmem:[%s1689_s2 + $0x20] ss:$12 sps:$4 sm:$0xff]   ;;  %628 = vmatprep.subr.bf16.mxu0 %v1250_v0 }
  0xa3   : > { %v254_v28 = vmul.f32 0.0078125, %v223_v26  ;;  %v285_v29 = vmul.f32 %v1391_v24, %v1391_v24  ;;  %v256_v30 = vmul.f32 0.0078125, %v227_v27  ;;  %v287_v33 = vmul.f32 %v1393_v25, %v1393_v25  ;;  %1203 = vmatprep.subr.bf16.mxu1 %v1252_v1 }
  0xa4   : > { %1204 = vmatpush3.bf16.msra.mxu1 %v1252_v1 }
  0xa5   : > { %v1397_v31 = vsub.f32 %v205_v2, %v254_v28  ;;  %301 = vadd.xlane.f32.xlu0 %v285_v29  ;;  %v1399_v32 = vsub.f32 %v207_v3, %v256_v30  ;;  %1205 = vmatprep.subr.bf16.mxu1 %v1256_v19  ;;  %v1258_v29 = vld [vmem:[%s1689_s2 + $0x64] ss:$12 sps:$4 sm:$0xff]  }
  0xa6   : > { %v229_v34 = vpop.xlane.xlu0 %228  ;;  %v231_v35 = vpop.xlane.xlu1 %230  ;;  %v1260_v30 = vld [vmem:[%s1689_s2 + $0x50] ss:$12 sps:$4 sm:$0xff]  }
  0xa7   : > { %v257_v36 = vmul.f32 0.0078125, %v229_v34  ;;  %v286_v37 = vmul.f32 %v1397_v31, %v1397_v31  ;;  %v258_v38 = vmul.f32 0.0078125, %v231_v35  ;;  %v288_v41 = vmul.f32 %v1399_v32, %v1399_v32  ;;  %v1262_v34 = vld [vmem:[%s1689_s2 + $0x7c] ss:$12 sps:$4 sm:$0xff]  }
  0xa8   : > { %1206 = vmatpush3.bf16.msra.mxu1 %v1256_v19  ;;  %v1264_v35 = vld [vmem:[%s1689_s2 + $0x68] ss:$12 sps:$4 sm:$0xff]  }
  0xa9   : > { %v1405_v39 = vsub.f32 %v208_v4, %v257_v36  ;;  %305 = vadd.xlane.f32.xlu0 %v287_v33  ;;  %303 = vadd.xlane.f32.xlu1 %v286_v37  ;;  %v1407_v40 = vsub.f32 %v209_v5, %v258_v38  ;;  %v1265_v36 = vld [vmem:[%s1689_s2 + $0x78] ss:$12 sps:$4 sm:$0xff]   ;;  %v1266_v37 = vld [vmem:[%s1689_s2 + $0x94] ss:$12 sps:$4 sm:$0xff]  }
  0xaa   : > { %v233_v42 = vpop.xlane.xlu0 %232  ;;  %v235_v43 = vpop.xlane.xlu1 %234  ;;  %1207 = vmatprep.subr.bf16.mxu1 %v1260_v30  ;;  %v1268_v38 = vld [vmem:[%s1689_s2 + $0x80] ss:$12 sps:$4 sm:$0xff]  }
  0xab   : > { %v259_v44 = vmul.f32 0.0078125, %v233_v42  ;;  %v289_v45 = vmul.f32 %v1405_v39, %v1405_v39  ;;  %v260_v46 = vmul.f32 0.0078125, %v235_v43  ;;  %v290_v49 = vmul.f32 %v1407_v40, %v1407_v40  ;;  %v1270_v42 = vld [vmem:[%s1689_s2 + $0xac] ss:$12 sps:$4 sm:$0xff]  }
  0xac   : > { %1208 = vmatpush3.bf16.msra.mxu1 %v1260_v30  ;;  %v1272_v43 = vld [vmem:[%s1689_s2 + $0x98] ss:$12 sps:$4 sm:$0xff]  }
  0xad   : > { %v1413_v47 = vsub.f32 %v210_v6, %v259_v44  ;;  %307 = vadd.xlane.f32.xlu1 %v288_v41  ;;  %309 = vadd.xlane.f32.xlu0 %v289_v45  ;;  %v1415_v48 = vsub.f32 %v211_v7, %v260_v46  ;;  %v1253_v7 = vld [vmem:[%s1689_s2 + $0x30] ss:$12 sps:$4 sm:$0xff]   ;;  %v1273_v44 = vld [vmem:[%s1689_s2 + $0xa8] ss:$12 sps:$4 sm:$0xff]   ;;  %v1315_v46 = vmov 0  }
  0xae   : > { %v237_v50 = vpop.xlane.xlu0 %236  ;;  %v239_v51 = vpop.xlane.xlu1 %238  ;;  %629 = vmatpush1.bf16.msra.mxu0 %v1253_v7  ;;  %1209 = vmatprep.subr.bf16.mxu1 %v1264_v35  ;;  %v1269_v41 = vld [vmem:[%s1689_s2 + $0x90] ss:$12 sps:$4 sm:$0xff]  }
  0xaf   : > { %v261_v52 = vmul.f32 0.0078125, %v237_v50  ;;  %v291_v53 = vmul.f32 %v1413_v47, %v1413_v47  ;;  %v262_v54 = vmul.f32 0.0078125, %v239_v51  ;;  %v292_v57 = vmul.f32 %v1415_v48, %v1415_v48  ;;  %630 = vmatprep.subr.bf16.mxu0 %v1254_v18  ;;  %v1274_v45 = vld [vmem:[%s1689_s2 + $0xb0] ss:$12 sps:$4 sm:$0xff]   ;;  %656 = vmatprep.mubr.bf16.mxu0 %v1315_v46 }
  0xb0   : > { %1210 = vmatpush3.bf16.msra.mxu1 %v1264_v35 }
  0xb1   : > { %v1422_v55 = vsub.f32 %v1355_v8, %v261_v52  ;;  %311 = vadd.xlane.f32.xlu1 %v290_v49  ;;  %313 = vadd.xlane.f32.xlu0 %v291_v53  ;;  %v1425_v56 = vsub.f32 %v1357_v9, %v262_v54 }
  0xb2   : > { %v241_v59 = vpop.xlane.xlu0 %240  ;;  %v243_v60 = vpop.xlane.xlu1 %242  ;;  %1211 = vmatprep.subr.bf16.mxu1 %v1268_v38 }
  0xb3   : > { %v263_v61 = vmul.f32 0.0078125, %v241_v59  ;;  %v293_v62 = vmul.f32 %v1422_v55, %v1422_v55  ;;  %v264_v63 = vmul.f32 0.0078125, %v243_v60  ;;  %v294_v4 = vmul.f32 %v1425_v56, %v1425_v56 }
  0xb4   : > { %1212 = vmatpush3.bf16.msra.mxu1 %v1268_v38 }
  0xb5   : > { %v1441_v2 = vsub.f32 %v1361_v10, %v263_v61  ;;  %315 = vadd.xlane.f32.xlu1 %v292_v57  ;;  %317 = vadd.xlane.f32.xlu0 %v293_v62  ;;  %v1444_v3 = vsub.f32 %v1363_v11, %v264_v63 }
  0xb6   : > { %v245_v5 = vpop.xlane.xlu0 %244  ;;  %v247_v6 = vpop.xlane.xlu1 %246  ;;  %1213 = vmatprep.subr.bf16.mxu1 %v1272_v43 }
  0xb7   : > { %v265_v8 = vmul.f32 0.0078125, %v245_v5  ;;  %v295_v9 = vmul.f32 %v1441_v2, %v1441_v2  ;;  %v266_v10 = vmul.f32 0.0078125, %v247_v6  ;;  %v296_v17 = vmul.f32 %v1444_v3, %v1444_v3 }
  0xb8   : > { %1214 = vmatpush3.bf16.msra.mxu1 %v1272_v43 }
  0xb9   : > { %v1454_v11 = vsub.f32 %v1367_v12, %v265_v8  ;;  %319 = vadd.xlane.f32.xlu1 %v294_v4  ;;  %321 = vadd.xlane.f32.xlu0 %v295_v9  ;;  %v1457_v16 = vsub.f32 %v1369_v13, %v266_v10  ;;  %v1257_v12 = vld [vmem:[%s1689_s2 + $0x48] ss:$12 sps:$4 sm:$0xff]  }
  0xba   : > { %v249_v20 = vpop.xlane.xlu0 %248  ;;  %v251_v21 = vpop.xlane.xlu1 %250  ;;  %631 = vmatpush1.bf16.msra.mxu0 %v1257_v12  ;;  %1215 = vmatprep.subr.bf16.mxu1 %v1274_v45  ;;  %v1528_v12 = vld [vmem:[%s1688_s1] ss:$0 sm:$0xff] }
  0xbb   : > { %v267_v22 = vmul.f32 0.0078125, %v249_v20  ;;  %v297_v13 = vmul.f32 %v1454_v11, %v1454_v11  ;;  %v268_v23 = vmul.f32 0.0078125, %v251_v21  ;;  %v298_v28 = vmul.f32 %v1457_v16, %v1457_v16  ;;  %632 = vmatprep.subr.bf16.mxu0 %v1258_v29 }
  0xbc   : > { %1216 = vmatpush3.bf16.msra.mxu1 %v1274_v45 }
  0xbd   : > { %v1473_v26 = vsub.f32 %v1373_v14, %v267_v22  ;;  %323 = vadd.xlane.f32.xlu1 %v296_v17  ;;  %325 = vadd.xlane.f32.xlu0 %v297_v13  ;;  %v1476_v27 = vsub.f32 %v1375_v15, %v268_v23  ;;  %v1261_v14 = vld [vmem:[%s1689_s2 + $0x60] ss:$12 sps:$4 sm:$0xff]  }
  0xbe   : > { %633 = vmatpush1.bf16.msra.mxu0 %v1261_v14 }
  0xbf   : > { %v299_v33 = vmul.f32 %v1473_v26, %v1473_v26  ;;  %v300_v15 = vmul.f32 %v1476_v27, %v1476_v27  ;;  %634 = vmatprep.subr.bf16.mxu0 %v1262_v34  ;;  %v1535_v34 = vld [vmem:[%s1688_s1 + $0x1] ss:$0 sm:$0xff] }
  0xc1   : > { %327 = vadd.xlane.f32.xlu1 %v298_v28  ;;  %329 = vadd.xlane.f32.xlu0 %v299_v33 }
  0xc2   : > { %635 = vmatpush1.bf16.msra.mxu0 %v1265_v36 }
  0xc3   : > { %636 = vmatprep.subr.bf16.mxu0 %v1266_v37 }
  0xc5   : > { %331 = vadd.xlane.f32.xlu1 %v300_v15 }
  0xc6   : > { %637 = vmatpush1.bf16.msra.mxu0 %v1269_v41 }
  0xc7   : > { %638 = vmatprep.subr.bf16.mxu0 %v1270_v42 }
  0xca   : > { %639 = vmatpush1.bf16.msra.mxu0 %v1273_v44 }
 0x132   : > { %v302_v49 = vpop.xlane.xlu0 %301 }
 0x133   : > { %v333_v50 = vmul.f32 0.0078125, %v302_v49 }
 0x135   : > { %v349_v51 = vadd.f32 1e-12, %v333_v50 }
 0x136   : > { %v304_v52 = vpop.xlane.xlu1 %303  ;;  %v306_v53 = vpop.xlane.xlu0 %305 }
 0x137   : > { %1275 = vrsqrt.f32 %v349_v51  ;;  %v334_v54 = vmul.f32 0.0078125, %v304_v52  ;;  %v335_v57 = vmul.f32 0.0078125, %v306_v53 }
 0x139   : > { %v350_v58 = vadd.f32 1e-12, %v334_v54  ;;  %v351_v59 = vadd.f32 1e-12, %v335_v57 }
 0x13a   : > { %v308_v60 = vpop.xlane.xlu1 %307  ;;  %v310_v61 = vpop.xlane.xlu0 %309 }
 0x13b   : > { %1277 = vrsqrt.f32 %v350_v58  ;;  %v336_v62 = vmul.f32 0.0078125, %v308_v60  ;;  %v337_v63 = vmul.f32 0.0078125, %v310_v61 }
 0x13c   : > { %1279 = vrsqrt.f32 %v351_v59 }
 0x13d   : > { %v352_v0 = vadd.f32 1e-12, %v336_v62  ;;  %v353_v1 = vadd.f32 1e-12, %v337_v63 }
 0x13e   : > { %v312_v4 = vpop.xlane.xlu1 %311  ;;  %v314_v5 = vpop.xlane.xlu0 %313 }
 0x13f   : > { %1281 = vrsqrt.f32 %v352_v0  ;;  %v338_v6 = vmul.f32 0.0078125, %v312_v4  ;;  %v339_v7 = vmul.f32 0.0078125, %v314_v5 }
 0x140   : > { %1283 = vrsqrt.f32 %v353_v1 }
 0x141   : > { %v1276_v8 = vpop.eup %1275  ;;  %v354_v9 = vadd.f32 1e-12, %v338_v6  ;;  %v355_v10 = vadd.f32 1e-12, %v339_v7 }
 0x142   : > { %v316_v17 = vpop.xlane.xlu1 %315  ;;  %v318_v18 = vpop.xlane.xlu0 %317  ;;  %v381_v19 = vmul.f32 %v1276_v8, %v1391_v24 }
 0x143   : > { %1285 = vrsqrt.f32 %v354_v9  ;;  %v340_v20 = vmul.f32 0.0078125, %v316_v17  ;;  %v341_v21 = vmul.f32 0.0078125, %v318_v18 }
 0x144   : > { %1287 = vrsqrt.f32 %v355_v10  ;;  %v402_v33 = vmul.f32 %v1528_v12, %v381_v19 }
 0x145   : > { %v1278_v22 = vpop.eup %1277  ;;  %v356_v13 = vadd.f32 1e-12, %v340_v20  ;;  %v357_v23 = vadd.f32 1e-12, %v341_v21 }
 0x146   : > { %v1280_v28 = vpop.eup %1279  ;;  %v320_v29 = vpop.xlane.xlu1 %319  ;;  %v382_v14 = vmul.f32 %v1278_v22, %v1397_v31  ;;  %v423_v45 = vadd.f32 %v1535_v34, %v402_v33 }
 0x147   : > { %v322_v30 = vpop.xlane.xlu0 %321  ;;  %1289 = vrsqrt.f32 %v356_v13  ;;  %v342_v24 = vmul.f32 0.0078125, %v320_v29  ;;  %v383_v35 = vmul.f32 %v1280_v28, %v1393_v25 }
 0x148   : > { %v343_v15 = vmul.f32 0.0078125, %v322_v30  ;;  %1291 = vrsqrt.f32 %v357_v23  ;;  %v403_v36 = vmul.f32 %v1528_v12, %v382_v14 }
 0x149   : > { %v1282_v37 = vpop.eup %1281  ;;  %v358_v38 = vadd.f32 1e-12, %v342_v24  ;;  %v404_v31 = vmul.f32 %v1528_v12, %v383_v35 }
 0x14a   : > { %v359_v41 = vadd.f32 1e-12, %v343_v15  ;;  %v1284_v42 = vpop.eup %1283  ;;  %v324_v43 = vpop.xlane.xlu1 %323  ;;  %v424_v49 = vadd.f32 %v1535_v34, %v403_v36  ;;  %v384_v50 = vmul.f32 %v1282_v37, %v1399_v32 }
 0x14b   : > { %v326_v44 = vpop.xlane.xlu0 %325  ;;  %1293 = vrsqrt.f32 %v358_v38  ;;  %v344_v51 = vmul.f32 0.0078125, %v324_v43  ;;  %v385_v54 = vmul.f32 %v1284_v42, %v1405_v39  ;;  %v425_v60 = vadd.f32 %v1535_v34, %v404_v31 }
 0x14c   : > { %v345_v25 = vmul.f32 0.0078125, %v326_v44  ;;  %1295 = vrsqrt.f32 %v359_v41  ;;  %v439_v52 = vpack.c.bf16 %v424_v49, %v423_v45  ;;  %v405_v53 = vmul.f32 %v1528_v12, %v384_v50 }
 0x14d   : > { %v1286_v57 = vpop.eup %1285  ;;  %v360_v58 = vadd.f32 1e-12, %v344_v51  ;;  %v406_v1 = vmul.f32 %v1528_v12, %v385_v54 }
 0x14e   : > { %v361_v59 = vadd.f32 1e-12, %v345_v25  ;;  %v1288_v61 = vpop.eup %1287  ;;  %v328_v62 = vpop.xlane.xlu1 %327  ;;  %657 = vmatmul.mubr.bf16.vlgmr.msra.gmra.mrb[0].mxu0 %v439_v52  ;;  %1217 = vmatprep.mubr.bf16.mxu1 %v439_v52  ;;  %v426_v32 = vadd.f32 %v1535_v34, %v405_v53  ;;  %v386_v0 = vmul.f32 %v1286_v57, %v1407_v40 }
 0x14f   : > { %v330_v63 = vpop.xlane.xlu0 %329  ;;  %1297 = vrsqrt.f32 %v360_v58  ;;  %v346_v4 = vmul.f32 0.0078125, %v328_v62  ;;  %666 = vmatprep.mubr.bf16.mxu0 %v1315_v46  ;;  %v387_v39 = vmul.f32 %v1288_v61, %v1413_v47  ;;  %v427_v19 = vadd.f32 %v1535_v34, %v406_v1 }
 0x150   : > { %v347_v5 = vmul.f32 0.0078125, %v330_v63  ;;  %1299 = vrsqrt.f32 %v361_v59  ;;  %v440_v6 = vpack.c.bf16 %v426_v32, %v425_v60  ;;  %v407_v7 = vmul.f32 %v1528_v12, %v386_v0 }
 0x151   : > { %v1290_v8 = vpop.eup %1289  ;;  %v362_v9 = vadd.f32 1e-12, %v346_v4  ;;  %v408_v17 = vmul.f32 %v1528_v12, %v387_v39 }
 0x152   : > { %v363_v10 = vadd.f32 1e-12, %v347_v5  ;;  %v1292_v18 = vpop.eup %1291  ;;  %v332_v40 = vpop.xlane.xlu1 %331  ;;  %1218 = vmatmul.mubr.bf16.vlgmr.msra.gmra.mrb[0].mxu1 %v440_v6  ;;  %v428_v20 = vadd.f32 %v1535_v34, %v407_v7  ;;  %v388_v21 = vmul.f32 %v1290_v8, %v1415_v48 }
 0x153   : > { %1301 = vrsqrt.f32 %v362_v9  ;;  %v348_v47 = vmul.f32 0.0078125, %v332_v40  ;;  %v389_v22 = vmul.f32 %v1292_v18, %v1422_v55  ;;  %v429_v30 = vadd.f32 %v1535_v34, %v408_v17 }
 0x154   : > { %1303 = vrsqrt.f32 %v363_v10  ;;  %v441_v13 = vpack.c.bf16 %v428_v20, %v427_v19  ;;  %v409_v23 = vmul.f32 %v1528_v12, %v388_v21 }
 0x155   : > { %v1294_v28 = vpop.eup %1293  ;;  %v364_v29 = vadd.f32 1e-12, %v348_v47  ;;  %v410_v48 = vmul.f32 %v1528_v12, %v389_v22 }
 0x156   : > { %v1296_v14 = vpop.eup %1295  ;;  %667 = vmatmul.mubr.bf16.gmra.mrb[4].mxu0 %v440_v6  ;;  %1221 = vmatprep.mubr.bf16.mxu1 %v441_v13  ;;  %v430_v33 = vadd.f32 %v1535_v34, %v409_v23  ;;  %v390_v24 = vmul.f32 %v1294_v28, %v1425_v56 }
 0x157   : > { %1305 = vrsqrt.f32 %v364_v29  ;;  %676 = vmatprep.mubr.bf16.mxu0 %v1315_v46  ;;  %v391_v55 = vmul.f32 %v1296_v14, %v1441_v2  ;;  %v431_v41 = vadd.f32 %v1535_v34, %v410_v48 }
 0x158   : > { %v442_v15 = vpack.c.bf16 %v430_v33, %v429_v30  ;;  %v411_v35 = vmul.f32 %v1528_v12, %v390_v24 }
 0x159   : > { %v1298_v36 = vpop.eup %1297  ;;  %v412_v37 = vmul.f32 %v1528_v12, %v391_v55 }
 0x15a   : > { %v1300_v38 = vpop.eup %1299  ;;  %1222 = vmatmul.mubr.bf16.gmra.mrb[4].mxu1 %v442_v15  ;;  %v432_v31 = vadd.f32 %v1535_v34, %v411_v35  ;;  %v392_v56 = vmul.f32 %v1298_v36, %v1444_v3 }
 0x15b   : > { %v393_v42 = vmul.f32 %v1300_v38, %v1454_v11  ;;  %v433_v45 = vadd.f32 %v1535_v34, %v412_v37 }
 0x15c   : > { %v443_v43 = vpack.c.bf16 %v432_v31, %v431_v41  ;;  %v413_v44 = vmul.f32 %v1528_v12, %v392_v56 }
 0x15d   : > { %v1302_v2 = vpop.eup %1301  ;;  %v414_v25 = vmul.f32 %v1528_v12, %v393_v42 }
 0x15e   : > { %v1304_v49 = vpop.eup %1303  ;;  %677 = vmatmul.mubr.bf16.gmra.mrb[8].mxu0 %v441_v13  ;;  %1225 = vmatprep.mubr.bf16.mxu1 %v443_v43  ;;  %v434_v50 = vadd.f32 %v1535_v34, %v413_v44  ;;  %v394_v51 = vmul.f32 %v1302_v2, %v1457_v16 }
 0x15f   : > { %686 = vmatprep.mubr.bf16.mxu0 %v1315_v46  ;;  %v395_v3 = vmul.f32 %v1304_v49, %v1473_v26  ;;  %v435_v54 = vadd.f32 %v1535_v34, %v414_v25 }
 0x160   : > { %v444_v11 = vpack.c.bf16 %v434_v50, %v433_v45  ;;  %v415_v52 = vmul.f32 %v1528_v12, %v394_v51 }
 0x161   : > { %v1306_v53 = vpop.eup %1305  ;;  %v416_v59 = vmul.f32 %v1528_v12, %v395_v3 }
 0x162   : > { %1226 = vmatmul.mubr.bf16.gmra.mrb[8].mxu1 %v444_v11  ;;  %v436_v57 = vadd.f32 %v1535_v34, %v415_v52  ;;  %v396_v58 = vmul.f32 %v1306_v53, %v1476_v27  ;;  %v481_v27 = vlaneseq }
 0x163   : > { %v437_v26 = vadd.f32 %v1535_v34, %v416_v59 }
 0x164   : > { %v445_v16 = vpack.c.bf16 %v436_v57, %v435_v54  ;;  %v417_v60 = vmul.f32 %v1528_v12, %v396_v58  ;;  %v482_v12 = vshrl.u32 %v481_v27, 7 }
 0x166   : > { %687 = vmatmul.mubr.bf16.gmra.mrb[12].mxu0 %v442_v15  ;;  %1229 = vmatprep.mubr.bf16.mxu1 %v445_v16  ;;  %v438_v61 = vadd.f32 %v1535_v34, %v417_v60  ;;  %v483_v63 = vsub.s32 0, %v482_v12  ;;  %v479_v34 = vld [vmem:[%s1690_s3] sm:$0x7]  ;;  %v487_v32 = vsub.s32 1, %v482_v12  ;;  %v491_v1 = vsub.s32 2, %v482_v12 }
 0x167   : > { %696 = vmatprep.mubr.bf16.mxu0 %v1315_v46 }
 0x168   : > { %v446_v62 = vpack.c.bf16 %v438_v61, %v437_v26  ;;  %v1592_v0 = vrot.slane %v479_v34, %v483_v63  ;;  %v1594_v4 = vrot.slane %v479_v34, %v487_v32 }
 0x16a   : > { %1230 = vmatmul.mubr.bf16.gmra.mrb[12].mxu1 %v446_v62 }
 0x16e   : > { %697 = vmatmul.mubr.bf16.gmra.mrb[16].mxu0 %v443_v43 }
 0x16f   : > { %706 = vmatprep.mubr.bf16.mxu0 %v1315_v46 }
 0x176   : > { %707 = vmatmul.mubr.bf16.gmra.mrb[20].mxu0 %v444_v11 }
 0x177   : > { %716 = vmatprep.mubr.bf16.mxu0 %v1315_v46 }
 0x17e   : > { %717 = vmatmul.mubr.bf16.gmra.mrb[24].mxu0 %v445_v16 }
 0x17f   : > { %726 = vmatprep.mubr.bf16.mxu0 %v1315_v46  ;;  %v1598_v46 = vrot.slane %v479_v34, %v491_v1 }
 0x186   : > { %727 = vmatmul.mubr.bf16.gmra.mrb[28].mxu0 %v446_v62 }
 0x221   : > { %v658_v5 = vpop.f32.mrb[0].mxu0 }
 0x222   : > { %v659_v39 = vadd.f32 %v658_v5, %v1592_v0  ;;  %v660_v6 = vpop.f32.mrb[1].mxu0 }
 0x223   : > { %v661_v7 = vadd.f32 %v660_v6, %v1594_v4  ;;  %v662_v8 = vpop.f32.mrb[2].mxu0 }
 0x224   : > { %v663_v9 = vadd.f32 %v662_v8, %v1592_v0  ;;  %v664_v10 = vpop.f32.mrb[3].mxu0 }
 0x225   : > { %v1153_v17 = vpack.c.bf16 %v661_v7, %v659_v39  ;;  %v665_v18 = vadd.f32 %v664_v10, %v1594_v4  ;;  %v1219_v40 = vpop.f32.mrb[0].mxu1 }
 0x226   : > { %v780_v19 = vadd.f32 %v1219_v40, %v1598_v46  ;;  %v771_v20 = vpop.f32.mrb[1].mxu1 }
 0x227   : > { %994 = vst [vmem:[%s1604_s5] sm:$0xff] %v1153_v17  ;;  %v1155_v21 = vpack.c.bf16 %v665_v18, %v663_v9  ;;  %v772_v47 = vadd.f32 %v771_v20, %v1598_v46  ;;  %v1220_v22 = vpop.f32.mrb[2].mxu1 }
 0x228   : > { %v1158_v13 = vpack.c.bf16 %v780_v19, %v780_v19  ;;  %v783_v23 = vadd.f32 %v1220_v22, %v1598_v46  ;;  %v774_v28 = vpop.f32.mrb[3].mxu1 }
 0x229   : > { %996 = vst [vmem:[%s1604_s5 + $0xc] sm:$0xff] %v1155_v21  ;;  %v1154_v29 = vpack.c.bf16 %v772_v47, %v772_v47  ;;  %v775_v30 = vadd.f32 %v774_v28, %v1598_v46  ;;  %v668_v14 = vpop.f32.mrb[4].mxu0 }
 0x22a   : > { %999 = vst [vmem:[%s1604_s5 + $0x20] sm:$0xf] %v1158_v13  ;;  %v1160_v33 = vpack.c.bf16 %v783_v23, %v783_v23  ;;  %v669_v24 = vadd.f32 %v668_v14, %v1592_v0  ;;  %v670_v48 = vpop.f32.mrb[5].mxu0 }
 0x22b   : > { %995 = vst [vmem:[%s1604_s5 + $0x8] sm:$0xf] %v1154_v29  ;;  %v1156_v55 = vpack.c.bf16 %v775_v30, %v775_v30  ;;  %v671_v15 = vadd.f32 %v670_v48, %v1594_v4  ;;  %v672_v35 = vpop.f32.mrb[6].mxu0 }
 0x22c   : > { %1001 = vst [vmem:[%s1604_s5 + $0x2c] sm:$0xf] %v1160_v33  ;;  %v673_v36 = vadd.f32 %v672_v35, %v1592_v0  ;;  %v674_v37 = vpop.f32.mrb[7].mxu0 }
 0x22d   : > { %997 = vst [vmem:[%s1604_s5 + $0x14] sm:$0xf] %v1156_v55  ;;  %v1157_v38 = vpack.c.bf16 %v671_v15, %v669_v24  ;;  %v675_v41 = vadd.f32 %v674_v37, %v1594_v4  ;;  %v1223_v31 = vpop.f32.mrb[4].mxu1 }
 0x22e   : > { %v796_v56 = vadd.f32 %v1223_v31, %v1598_v46  ;;  %v787_v42 = vpop.f32.mrb[5].mxu1 }
 0x22f   : > { %998 = vst [vmem:[%s1604_s5 + $0x18] sm:$0xff] %v1157_v38  ;;  %v1159_v43 = vpack.c.bf16 %v675_v41, %v673_v36  ;;  %v788_v44 = vadd.f32 %v787_v42, %v1598_v46  ;;  %v1224_v2 = vpop.f32.mrb[6].mxu1 }
 0x230   : > { %v1166_v45 = vpack.c.bf16 %v796_v56, %v796_v56  ;;  %v799_v49 = vadd.f32 %v1224_v2, %v1598_v46  ;;  %v790_v50 = vpop.f32.mrb[7].mxu1 }
 0x231   : > { %1000 = vst [vmem:[%s1604_s5 + $0x24] sm:$0xff] %v1159_v43  ;;  %v1162_v51 = vpack.c.bf16 %v788_v44, %v788_v44  ;;  %v791_v25 = vadd.f32 %v790_v50, %v1598_v46  ;;  %v678_v3 = vpop.f32.mrb[8].mxu0 }
 0x232   : > { %1007 = vst [vmem:[%s1604_s5 + $0x50] sm:$0xf] %v1166_v45  ;;  %v1168_v11 = vpack.c.bf16 %v799_v49, %v799_v49  ;;  %v679_v52 = vadd.f32 %v678_v3, %v1592_v0  ;;  %v680_v53 = vpop.f32.mrb[9].mxu0 }
 0x233   : > { %1003 = vst [vmem:[%s1604_s5 + $0x38] sm:$0xf] %v1162_v51  ;;  %v1164_v54 = vpack.c.bf16 %v791_v25, %v791_v25  ;;  %v681_v57 = vadd.f32 %v680_v53, %v1594_v4  ;;  %v682_v58 = vpop.f32.mrb[10].mxu0 }
 0x234   : > { %1009 = vst [vmem:[%s1604_s5 + $0x5c] sm:$0xf] %v1168_v11  ;;  %v683_v59 = vadd.f32 %v682_v58, %v1592_v0  ;;  %v684_v16 = vpop.f32.mrb[11].mxu0 }
 0x235   : > { %1005 = vst [vmem:[%s1604_s5 + $0x44] sm:$0xf] %v1164_v54  ;;  %v1161_v60 = vpack.c.bf16 %v681_v57, %v679_v52  ;;  %v685_v26 = vadd.f32 %v684_v16, %v1594_v4  ;;  %v1227_v61 = vpop.f32.mrb[8].mxu1 }
 0x236   : > { %v812_v62 = vadd.f32 %v1227_v61, %v1598_v46  ;;  %v803_v27 = vpop.f32.mrb[9].mxu1 }
 0x237   : > { %1002 = vst [vmem:[%s1604_s5 + $0x30] sm:$0xff] %v1161_v60  ;;  %v1163_v12 = vpack.c.bf16 %v685_v26, %v683_v59  ;;  %v804_v63 = vadd.f32 %v803_v27, %v1598_v46  ;;  %v1228_v34 = vpop.f32.mrb[10].mxu1 }
 0x238   : > { %v1174_v32 = vpack.c.bf16 %v812_v62, %v812_v62  ;;  %v815_v1 = vadd.f32 %v1228_v34, %v1598_v46  ;;  %v806_v5 = vpop.f32.mrb[11].mxu1 }
 0x239   : > { %1004 = vst [vmem:[%s1604_s5 + $0x3c] sm:$0xff] %v1163_v12  ;;  %v1170_v39 = vpack.c.bf16 %v804_v63, %v804_v63  ;;  %v807_v6 = vadd.f32 %v806_v5, %v1598_v46  ;;  %v688_v7 = vpop.f32.mrb[12].mxu0 }
 0x23a   : > { %1015 = vst [vmem:[%s1604_s5 + $0x80] sm:$0xf] %v1174_v32  ;;  %v1176_v8 = vpack.c.bf16 %v815_v1, %v815_v1  ;;  %v689_v9 = vadd.f32 %v688_v7, %v1592_v0  ;;  %v690_v10 = vpop.f32.mrb[13].mxu0 }
 0x23b   : > { %1011 = vst [vmem:[%s1604_s5 + $0x68] sm:$0xf] %v1170_v39  ;;  %v1172_v17 = vpack.c.bf16 %v807_v6, %v807_v6  ;;  %v691_v18 = vadd.f32 %v690_v10, %v1594_v4  ;;  %v692_v40 = vpop.f32.mrb[14].mxu0 }
 0x23c   : > { %1017 = vst [vmem:[%s1604_s5 + $0x8c] sm:$0xf] %v1176_v8  ;;  %v693_v19 = vadd.f32 %v692_v40, %v1592_v0  ;;  %v694_v20 = vpop.f32.mrb[15].mxu0 }
 0x23d   : > { %1013 = vst [vmem:[%s1604_s5 + $0x74] sm:$0xf] %v1172_v17  ;;  %v1165_v21 = vpack.c.bf16 %v691_v18, %v689_v9  ;;  %v695_v47 = vadd.f32 %v694_v20, %v1594_v4  ;;  %v1231_v22 = vpop.f32.mrb[12].mxu1 }
 0x23e   : > { %v828_v13 = vadd.f32 %v1231_v22, %v1598_v46  ;;  %v819_v23 = vpop.f32.mrb[13].mxu1 }
 0x23f   : > { %1006 = vst [vmem:[%s1604_s5 + $0x48] sm:$0xff] %v1165_v21  ;;  %v1167_v28 = vpack.c.bf16 %v695_v47, %v693_v19  ;;  %v820_v29 = vadd.f32 %v819_v23, %v1598_v46  ;;  %v1232_v30 = vpop.f32.mrb[14].mxu1 }
 0x240   : > { %v1182_v14 = vpack.c.bf16 %v828_v13, %v828_v13  ;;  %v831_v33 = vadd.f32 %v1232_v30, %v1598_v46  ;;  %v822_v24 = vpop.f32.mrb[15].mxu1 }
 0x241   : > { %1008 = vst [vmem:[%s1604_s5 + $0x54] sm:$0xff] %v1167_v28  ;;  %v1178_v48 = vpack.c.bf16 %v820_v29, %v820_v29  ;;  %v823_v55 = vadd.f32 %v822_v24, %v1598_v46  ;;  %v698_v15 = vpop.f32.mrb[16].mxu0 }
 0x242   : > { %1023 = vst [vmem:[%s1604_s5 + $0xb0] sm:$0xf] %v1182_v14  ;;  %v1184_v35 = vpack.c.bf16 %v831_v33, %v831_v33  ;;  %v699_v36 = vadd.f32 %v698_v15, %v1592_v0  ;;  %v700_v37 = vpop.f32.mrb[17].mxu0 }
 0x243   : > { %1019 = vst [vmem:[%s1604_s5 + $0x98] sm:$0xf] %v1178_v48  ;;  %v1180_v38 = vpack.c.bf16 %v823_v55, %v823_v55  ;;  %v701_v41 = vadd.f32 %v700_v37, %v1594_v4  ;;  %v702_v31 = vpop.f32.mrb[18].mxu0 }
 0x244   : > { %1025 = vst [vmem:[%s1604_s5 + $0xbc] sm:$0xf] %v1184_v35  ;;  %v703_v56 = vadd.f32 %v702_v31, %v1592_v0  ;;  %v704_v42 = vpop.f32.mrb[19].mxu0 }
 0x245   : > { %1021 = vst [vmem:[%s1604_s5 + $0xa4] sm:$0xf] %v1180_v38  ;;  %v1169_v46 = vpack.c.bf16 %v701_v41, %v699_v36  ;;  %v705_v43 = vadd.f32 %v704_v42, %v1594_v4 }
 0x247   : > { %1010 = vst [vmem:[%s1604_s5 + $0x60] sm:$0xff] %v1169_v46  ;;  %v1171_v44 = vpack.c.bf16 %v705_v43, %v703_v56 }
 0x249   : > { %1012 = vst [vmem:[%s1604_s5 + $0x6c] sm:$0xff] %v1171_v44  ;;  %v708_v2 = vpop.f32.mrb[20].mxu0 }
 0x24a   : > { %v709_v45 = vadd.f32 %v708_v2, %v1592_v0  ;;  %v710_v49 = vpop.f32.mrb[21].mxu0 }
 0x24b   : > { %v711_v50 = vadd.f32 %v710_v49, %v1594_v4  ;;  %v712_v51 = vpop.f32.mrb[22].mxu0 }
 0x24c   : > { %v713_v25 = vadd.f32 %v712_v51, %v1592_v0  ;;  %v714_v3 = vpop.f32.mrb[23].mxu0 }
 0x24d   : > { %v1173_v11 = vpack.c.bf16 %v711_v50, %v709_v45  ;;  %v715_v52 = vadd.f32 %v714_v3, %v1594_v4 }
 0x24f   : > { %1014 = vst [vmem:[%s1604_s5 + $0x78] sm:$0xff] %v1173_v11  ;;  %v1175_v53 = vpack.c.bf16 %v715_v52, %v713_v25 }
 0x251   : > { %1016 = vst [vmem:[%s1604_s5 + $0x84] sm:$0xff] %v1175_v53  ;;  %v718_v54 = vpop.f32.mrb[24].mxu0 }
 0x252   : > { %v719_v57 = vadd.f32 %v718_v54, %v1592_v0  ;;  %v720_v58 = vpop.f32.mrb[25].mxu0 }
 0x253   : > { %v721_v59 = vadd.f32 %v720_v58, %v1594_v4  ;;  %v722_v16 = vpop.f32.mrb[26].mxu0 }
 0x254   : > { %v723_v60 = vadd.f32 %v722_v16, %v1592_v0  ;;  %v724_v26 = vpop.f32.mrb[27].mxu0 }
 0x255   : > { %v1177_v61 = vpack.c.bf16 %v721_v59, %v719_v57  ;;  %v725_v62 = vadd.f32 %v724_v26, %v1594_v4 }
 0x257   : > { %1018 = vst [vmem:[%s1604_s5 + $0x90] sm:$0xff] %v1177_v61  ;;  %v1179_v27 = vpack.c.bf16 %v725_v62, %v723_v60 }
 0x259   : > { %1020 = vst [vmem:[%s1604_s5 + $0x9c] sm:$0xff] %v1179_v27  ;;  %v728_v12 = vpop.f32.mrb[28].mxu0 }
 0x25a   : > { %v729_v63 = vadd.f32 %v728_v12, %v1592_v0  ;;  %v730_v34 = vpop.f32.mrb[29].mxu0 }
 0x25b   : > { %v731_v32 = vadd.f32 %v730_v34, %v1594_v4  ;;  %v732_v1 = vpop.f32.mrb[30].mxu0 }
 0x25c   : > { %v733_v5 = vadd.f32 %v732_v1, %v1592_v0  ;;  %v734_v39 = vpop.f32.mrb[31].mxu0 }
 0x25d   : > { %v1181_v6 = vpack.c.bf16 %v731_v32, %v729_v63  ;;  %v735_v7 = vadd.f32 %v734_v39, %v1594_v4 }
 0x25f   : > { %1022 = vst [vmem:[%s1604_s5 + $0xa8] sm:$0xff] %v1181_v6  ;;  %v1183_v8 = vpack.c.bf16 %v735_v7, %v733_v5 }
 0x261   : > { %1024 = vst [vmem:[%s1604_s5 + $0xb4] sm:$0xff] %v1183_v8 }
 0x262 PF: > { %s14_s15 = sadd.s32 1, %s1313_s15  }
 0x263   : > { %p11_p4 = scmp.ge.s32.totalorder %s14_s15, 4  }
 0x265   :  { %13 = sbr.rel (!%p11_p4) target bundleno = 1 (0x1), region = 66 }

// kernel: _forward.4
= control target key start
LH: loop header
LB: loop body
LE: loop exit
PB: predicated region body
PF: predicated region fallthrough
CT: control target
= control target key end

     0   :  { %s4081_s12 = smov 0   ;;  %s4083_s13 = smov 0   ;;  %s5421_s0 = inlined_call_operand.vmem [shape: bf16[2,128,384], index: 0, kind: input, shape index: {}, may-alias: {0,1,2}]   ;;  %s5422_s1 = inlined_call_operand.vmem [shape: bf16[2,128,384], index: 1, kind: input, shape index: {}, may-alias: {0,1,2}]   ;;  %s5423_s2 = inlined_call_operand.vmem [shape: bf16[2,128,384], index: 2, kind: input, shape index: {}, may-alias: {0,1,2}]   ;;  %s5424_s3 = inlined_call_operand.vmem [shape: bf16[2,128,128], index: 3, kind: output, shape index: {}]  }
   0x1   :  { %s4085_s14 = smov 0   ;;  %s4087_s15 = smov 0  }
   0x2   :  { %s4089_s16 = smov 0  }
   0x3 LB: > { %s25_s17 = sadd.s32 1, %s4052_s15  ;;  %p41_p1 = scmp.ne.s32.totalorder %s4044_s13, %s4040_s12  ;;  %s4056_s16 = sphi %s4089_s16, %s13_s16   ;;  %s4052_s15 = sphi %s4087_s15, %s5532_s15   ;;  %s4048_s14 = sphi %s4085_s14, %s5531_s14   ;;  %s4044_s13 = sphi %s4083_s13, %s5530_s13   ;;  %s4040_s12 = sphi %s4081_s12, %s5529_s12  }
   0x4   : > { %p27_p0 = scmp.ge.s32.totalorder %s25_s17, 2  ;;  %p42_p2 = scmp.eq.s32.totalorder %s4056_s16, 0 }
   0x5   : > { %s34_s20 = sadd.s32 1, %s4044_s13  ;;  %p2936_p5 = scmp.ge.s32.totalorder %s4056_s16, 2 }
   0x6   : > { %s5534_s17 = smov (%p27_p0, %s25_s17), 0  ;;  %p4112_p3 = por %p42_p2, %p41_p1 }
   0x7   : > { %s29_s19 = ssub.s32 %s4052_s15, %s5534_s17  ;;  %155 = sbr.rel (%p2936_p5) target bundleno = 59 (0x3b), region = 16 }
   0x8   : > { %p32_p4 = scmp.eq.s32.totalorder %s29_s19, 0 }
   0xa   : > { %s4120_s21 = scalar_select %p32_p4, %s4044_s13, %s34_s20  }
   0xe   : > { %158 = sbr.rel (!%p4112_p3) target bundleno = 29 (0x1d), region = 20  ;;  %s160_s22 = sand.u32 (%p4112_p3), 1, %s4044_s13  }
   0xf   : > { %s3566_s23 = smul.u32 (%p4112_p3), 192, %s4052_s15  ;;  %s2937_s24 = sshll.u32 (%p4112_p3), %s160_s22, 6 }
  0x10   : > { %s162_s28 = scalar_lea.vmem (%p4112_p3), [#allocation2], %s2937_s24 }
  0x11   : > { %s4130_s27 = scalar_lea.vmem (%p4112_p3), %s5421_s0, %s3566_s23 }
  0x12   : > { %v182_v0 = vld [vmem:[%s4130_s27] sm:$0xf] (%p4112_p3)  ;;  %v184_v1 = vld [vmem:[%s4130_s27 + $0xc] sm:$0xf] (%p4112_p3)  ;;  %v186_v2 = vld [vmem:[%s4130_s27 + $0x18] sm:$0xf] (%p4112_p3) }
  0x13   : > { %183 = vst [vmem:[%s162_s28] sm:$0xf] (%p4112_p3), %v182_v0  ;;  %185 = vst [vmem:[%s162_s28 + $0x4] sm:$0xf] (%p4112_p3), %v184_v1  ;;  %v188_v3 = vld [vmem:[%s4130_s27 + $0x24] sm:$0xf] (%p4112_p3) }
  0x14   : > { %187 = vst [vmem:[%s162_s28 + $0x8] sm:$0xf] (%p4112_p3), %v186_v2  ;;  %v190_v4 = vld [vmem:[%s4130_s27 + $0x30] sm:$0xf] (%p4112_p3)  ;;  %v192_v5 = vld [vmem:[%s4130_s27 + $0x3c] sm:$0xf] (%p4112_p3) }
  0x15   : > { %189 = vst [vmem:[%s162_s28 + $0xc] sm:$0xf] %v188_v3  ;;  %191 = vst [vmem:[%s162_s28 + $0x10] sm:$0xf] %v190_v4  ;;  %v194_v6 = vld [vmem:[%s4130_s27 + $0x48] sm:$0xf] }
  0x16   : > { %193 = vst [vmem:[%s162_s28 + $0x14] sm:$0xf] %v192_v5  ;;  %v196_v7 = vld [vmem:[%s4130_s27 + $0x54] sm:$0xf]  ;;  %v198_v8 = vld [vmem:[%s4130_s27 + $0x60] sm:$0xf] }
  0x17   : > { %195 = vst [vmem:[%s162_s28 + $0x18] sm:$0xf] %v194_v6  ;;  %197 = vst [vmem:[%s162_s28 + $0x1c] sm:$0xf] %v196_v7  ;;  %v200_v9 = vld [vmem:[%s4130_s27 + $0x6c] sm:$0xf] }
  0x18   : > { %199 = vst [vmem:[%s162_s28 + $0x20] sm:$0xf] %v198_v8  ;;  %v202_v10 = vld [vmem:[%s4130_s27 + $0x78] sm:$0xf]  ;;  %v204_v11 = vld [vmem:[%s4130_s27 + $0x84] sm:$0xf] }
  0x19   : > { %201 = vst [vmem:[%s162_s28 + $0x24] sm:$0xf] %v200_v9  ;;  %203 = vst [vmem:[%s162_s28 + $0x28] sm:$0xf] %v202_v10  ;;  %v206_v12 = vld [vmem:[%s4130_s27 + $0x90] sm:$0xf] }
  0x1a   : > { %205 = vst [vmem:[%s162_s28 + $0x2c] sm:$0xf] %v204_v11  ;;  %v208_v13 = vld [vmem:[%s4130_s27 + $0x9c] sm:$0xf]  ;;  %v210_v14 = vld [vmem:[%s4130_s27 + $0xa8] sm:$0xf] }
  0x1b   : > { %207 = vst [vmem:[%s162_s28 + $0x30] sm:$0xf] %v206_v12  ;;  %209 = vst [vmem:[%s162_s28 + $0x34] sm:$0xf] %v208_v13  ;;  %v212_v15 = vld [vmem:[%s4130_s27 + $0xb4] sm:$0xf] }
  0x1c   : > { %211 = vst [vmem:[%s162_s28 + $0x38] sm:$0xf] %v210_v14  ;;  %213 = vst [vmem:[%s162_s28 + $0x3c] sm:$0xf] %v212_v15 }
  0x1d PF: > { %268 = sbr.rel (!%p4112_p3) target bundleno = 44 (0x2c), region = 61  ;;  %s270_s29 = sand.u32 (%p4112_p3), 1, %s4044_s13  }
  0x1e   : > { %s2940_s30 = smul.u32 (%p4112_p3), 192, %s4052_s15  ;;  %s2939_s4 = sshll.u32 (%p4112_p3), %s270_s29, 6 }
  0x1f   : > { %s272_s8 = scalar_lea.vmem (%p4112_p3), [#allocation3], %s2939_s4 }
  0x20   : > { %s4155_s7 = scalar_lea.vmem (%p4112_p3), %s5422_s1, %s2940_s30 }
  0x21   : > { %v2941_v16 = vld [vmem:[%s4155_s7 + $0x4] sm:$0xf] (%p4112_p3)  ;;  %v2942_v17 = vld [vmem:[%s4155_s7 + $0x10] sm:$0xf] (%p4112_p3)  ;;  %v2943_v18 = vld [vmem:[%s4155_s7 + $0x1c] sm:$0xf] (%p4112_p3) }
  0x22   : > { %294 = vst [vmem:[%s272_s8] sm:$0xf] (%p4112_p3), %v2941_v16  ;;  %296 = vst [vmem:[%s272_s8 + $0x4] sm:$0xf] (%p4112_p3), %v2942_v17  ;;  %v2944_v19 = vld [vmem:[%s4155_s7 + $0x28] sm:$0xf] (%p4112_p3) }
  0x23   : > { %298 = vst [vmem:[%s272_s8 + $0x8] sm:$0xf] (%p4112_p3), %v2943_v18  ;;  %v2945_v20 = vld [vmem:[%s4155_s7 + $0x34] sm:$0xf] (%p4112_p3)  ;;  %v2946_v21 = vld [vmem:[%s4155_s7 + $0x40] sm:$0xf] (%p4112_p3) }
  0x24   : > { %300 = vst [vmem:[%s272_s8 + $0xc] sm:$0xf] %v2944_v19  ;;  %302 = vst [vmem:[%s272_s8 + $0x10] sm:$0xf] %v2945_v20  ;;  %v2947_v22 = vld [vmem:[%s4155_s7 + $0x4c] sm:$0xf] }
  0x25   : > { %304 = vst [vmem:[%s272_s8 + $0x14] sm:$0xf] %v2946_v21  ;;  %v2948_v23 = vld [vmem:[%s4155_s7 + $0x58] sm:$0xf]  ;;  %v2949_v24 = vld [vmem:[%s4155_s7 + $0x64] sm:$0xf] }
  0x26   : > { %306 = vst [vmem:[%s272_s8 + $0x18] sm:$0xf] %v2947_v22  ;;  %308 = vst [vmem:[%s272_s8 + $0x1c] sm:$0xf] %v2948_v23  ;;  %v2950_v25 = vld [vmem:[%s4155_s7 + $0x70] sm:$0xf] }
  0x27   : > { %310 = vst [vmem:[%s272_s8 + $0x20] sm:$0xf] %v2949_v24  ;;  %v2951_v26 = vld [vmem:[%s4155_s7 + $0x7c] sm:$0xf]  ;;  %v2952_v27 = vld [vmem:[%s4155_s7 + $0x88] sm:$0xf] }
  0x28   : > { %312 = vst [vmem:[%s272_s8 + $0x24] sm:$0xf] %v2950_v25  ;;  %314 = vst [vmem:[%s272_s8 + $0x28] sm:$0xf] %v2951_v26  ;;  %v2953_v28 = vld [vmem:[%s4155_s7 + $0x94] sm:$0xf] }
  0x29   : > { %316 = vst [vmem:[%s272_s8 + $0x2c] sm:$0xf] %v2952_v27  ;;  %v2954_v29 = vld [vmem:[%s4155_s7 + $0xa0] sm:$0xf]  ;;  %v2955_v30 = vld [vmem:[%s4155_s7 + $0xac] sm:$0xf] }
  0x2a   : > { %318 = vst [vmem:[%s272_s8 + $0x30] sm:$0xf] %v2953_v28  ;;  %320 = vst [vmem:[%s272_s8 + $0x34] sm:$0xf] %v2954_v29  ;;  %v2956_v31 = vld [vmem:[%s4155_s7 + $0xb8] sm:$0xf] }
  0x2b   : > { %322 = vst [vmem:[%s272_s8 + $0x38] sm:$0xf] %v2955_v30  ;;  %324 = vst [vmem:[%s272_s8 + $0x3c] sm:$0xf] %v2956_v31 }
  0x2c PF: > { %379 = sbr.rel (!%p4112_p3) target bundleno = 59 (0x3b), region = 102  ;;  %s381_s9 = sand.u32 (%p4112_p3), 1, %s4044_s13  }
  0x2d   : > { %s2958_s10 = smul.u32 (%p4112_p3), 192, %s4052_s15  ;;  %s2957_s11 = sshll.u32 (%p4112_p3), %s381_s9, 6 }
  0x2e   : > { %s383_s18 = scalar_lea.vmem (%p4112_p3), [#allocation4], %s2957_s11 }
  0x2f   : > { %s4180_s22 = scalar_lea.vmem (%p4112_p3), %s5423_s2, %s2958_s10 }
  0x30   : > { %v2959_v32 = vld [vmem:[%s4180_s22 + $0x8] sm:$0xf] (%p4112_p3)  ;;  %v2960_v33 = vld [vmem:[%s4180_s22 + $0x14] sm:$0xf] (%p4112_p3)  ;;  %v2961_v34 = vld [vmem:[%s4180_s22 + $0x20] sm:$0xf] (%p4112_p3) }
  0x31   : > { %405 = vst [vmem:[%s383_s18] sm:$0xf] (%p4112_p3), %v2959_v32  ;;  %407 = vst [vmem:[%s383_s18 + $0x4] sm:$0xf] (%p4112_p3), %v2960_v33  ;;  %v2962_v35 = vld [vmem:[%s4180_s22 + $0x2c] sm:$0xf] (%p4112_p3) }
  0x32   : > { %409 = vst [vmem:[%s383_s18 + $0x8] sm:$0xf] (%p4112_p3), %v2961_v34  ;;  %v2963_v36 = vld [vmem:[%s4180_s22 + $0x38] sm:$0xf] (%p4112_p3)  ;;  %v2964_v37 = vld [vmem:[%s4180_s22 + $0x44] sm:$0xf] (%p4112_p3) }
  0x33   : > { %411 = vst [vmem:[%s383_s18 + $0xc] sm:$0xf] %v2962_v35  ;;  %413 = vst [vmem:[%s383_s18 + $0x10] sm:$0xf] %v2963_v36  ;;  %v2965_v38 = vld [vmem:[%s4180_s22 + $0x50] sm:$0xf] }
  0x34   : > { %415 = vst [vmem:[%s383_s18 + $0x14] sm:$0xf] %v2964_v37  ;;  %v2966_v39 = vld [vmem:[%s4180_s22 + $0x5c] sm:$0xf]  ;;  %v2967_v40 = vld [vmem:[%s4180_s22 + $0x68] sm:$0xf] }
  0x35   : > { %417 = vst [vmem:[%s383_s18 + $0x18] sm:$0xf] %v2965_v38  ;;  %419 = vst [vmem:[%s383_s18 + $0x1c] sm:$0xf] %v2966_v39  ;;  %v2968_v41 = vld [vmem:[%s4180_s22 + $0x74] sm:$0xf] }
  0x36   : > { %421 = vst [vmem:[%s383_s18 + $0x20] sm:$0xf] %v2967_v40  ;;  %v2969_v42 = vld [vmem:[%s4180_s22 + $0x80] sm:$0xf]  ;;  %v2970_v43 = vld [vmem:[%s4180_s22 + $0x8c] sm:$0xf] }
  0x37   : > { %423 = vst [vmem:[%s383_s18 + $0x24] sm:$0xf] %v2968_v41  ;;  %425 = vst [vmem:[%s383_s18 + $0x28] sm:$0xf] %v2969_v42  ;;  %v2971_v44 = vld [vmem:[%s4180_s22 + $0x98] sm:$0xf] }
  0x38   : > { %427 = vst [vmem:[%s383_s18 + $0x2c] sm:$0xf] %v2970_v43  ;;  %v2972_v45 = vld [vmem:[%s4180_s22 + $0xa4] sm:$0xf]  ;;  %v2973_v46 = vld [vmem:[%s4180_s22 + $0xb0] sm:$0xf] }
  0x39   : > { %429 = vst [vmem:[%s383_s18 + $0x30] sm:$0xf] %v2971_v44  ;;  %431 = vst [vmem:[%s383_s18 + $0x34] sm:$0xf] %v2972_v45  ;;  %v2974_v47 = vld [vmem:[%s4180_s22 + $0xbc] sm:$0xf] }
  0x3a   : > { %433 = vst [vmem:[%s383_s18 + $0x38] sm:$0xf] %v2973_v46  ;;  %435 = vst [vmem:[%s383_s18 + $0x3c] sm:$0xf] %v2974_v47 }
  0x3b PF: > { %p2975_p6 = scmp.ge.s32.totalorder %s4056_s16, 1  ;;  %p489_p7 = scmp.lt.s32.totalorder %s4056_s16, 3 }
  0x3d   : > { %p490_p8 = pnand %p2975_p6, %p489_p7 }
  0x3f   : > { %493 = sbr.rel (%p490_p8) target bundleno = 2317 (0x90d), region = 143 }
  0x46   : > { %s496_s23 = sand.u32 1, %s4040_s12   ;;  %vm683_vm0 = vcmask 261120   ;;  %s4058_s12 = smov 96   ;;  %vm2692_vm1 = vcmask 523264   ;;  %vm2709_vm2 = vcmask 785408  }
  0x47   : > { %s4201_s24 = sshll.u32 %s496_s23, 6  ;;  %s4059_s28 = smov 64  }
  0x48   : > { %s4204_s25 = scalar_lea.vmem [#allocation3], %s4201_s24  ;;  %s4230_s26 = scalar_lea.vmem [#allocation2], %s4201_s24 }
  0x49   : > { %v4207_v48 = vld [vmem:[%s4204_s25] sm:$0xff]   ;;  %v4210_v49 = vld [vmem:[%s4204_s25 + $0x8] sm:$0xff]   ;;  %v4223_v51 = vld [vmem:[%s4204_s25 + $0x10] sm:$0xff]   ;;  %s4312_s27 = scalar_lea.vmem [#allocation4], %s4201_s24  ;;  %s4060_s29 = smov 32  }
  0x4a   : > { %3534 = vmatprep.subr.msk.bf16.mxu0 %vm683_vm0, %v4207_v48  ;;  %v709_v50 = vsel %vm683_vm0, %v4207_v48, 0  ;;  %1150 = vrot.lane.b32.xlu0 %v4207_v48, %s4058_s12  ;;  %v712_v52 = vsel %vm683_vm0, %v4210_v49, 0  ;;  %v3065_v53 = vld [vmem:[%s4230_s26] sm:$0xff]   ;;  %v715_v59 = vsel %vm683_vm0, %v4223_v51, 0  ;;  %v4242_v60 = vld [vmem:[%s4204_s25 + $0x18] sm:$0xff]   ;;  %v4256_v0 = vld [vmem:[%s4204_s25 + $0x28] sm:$0xff]  }
  0x4b   : > { %3279 = vmatpush3.bf16.xpose.msra.mxu0 %v709_v50  ;;  %1152 = vrot.lane.b32.xlu1 %v4210_v49, %s4058_s12  ;;  %v3066_v54 = vunpack.c.l.bf16 %v3065_v53  ;;  %v3067_v55 = vunpack.c.h.bf16 %v3065_v53  ;;  %v718_v61 = vsel %vm683_vm0, %v4242_v60, 0  ;;  %v4249_v62 = vld [vmem:[%s4204_s25 + $0x20] sm:$0xff]   ;;  %v724_v1 = vsel %vm683_vm0, %v4256_v0, 0  ;;  %v4263_v2 = vld [vmem:[%s4204_s25 + $0x30] sm:$0xff]   ;;  %v4270_v4 = vld [vmem:[%s4204_s25 + $0x38] sm:$0xff]   ;;  %p546_p9 = scmp.lt.s32.totalorder %s4048_s14, 1 }
  0x4c   : > { %3535 = vmatprep.subr.msk.bf16.mxu0 %vm683_vm0, %v4210_v49  ;;  %v721_v63 = vsel %vm683_vm0, %v4249_v62, 0  ;;  %v727_v3 = vsel %vm683_vm0, %v4263_v2, 0  ;;  %v3136_v5 = vld [vmem:[%s4230_s26 + $0x8] sm:$0xff]   ;;  %v3137_v6 = vld [vmem:[%s4230_s26 + $0x10] sm:$0xff]   ;;  %v730_v11 = vsel %vm683_vm0, %v4270_v4, 0  ;;  %v3138_v16 = vld [vmem:[%s4230_s26 + $0x18] sm:$0xff]  }
  0x4d   : > { %v587_v56 = vmul.f32 0.17677669, %v3066_v54  ;;  %v588_v57 = vmul.f32 0.17677669, %v3067_v55  ;;  %v3070_v7 = vunpack.c.l.bf16 %v3136_v5  ;;  %v3071_v8 = vunpack.c.h.bf16 %v3136_v5  ;;  %v3139_v17 = vld [vmem:[%s4230_s26 + $0x20] sm:$0xff]   ;;  %v3140_v28 = vld [vmem:[%s4230_s26 + $0x28] sm:$0xff]  }
  0x4e   : > { %1154 = vrot.lane.b32.xlu0 %v4223_v51, %s4058_s12  ;;  %v3074_v9 = vunpack.c.l.bf16 %v3137_v6  ;;  %v3075_v10 = vunpack.c.h.bf16 %v3137_v6  ;;  %v3078_v19 = vunpack.c.l.bf16 %v3138_v16  ;;  %v3079_v20 = vunpack.c.h.bf16 %v3138_v16  ;;  %v3141_v29 = vld [vmem:[%s4230_s26 + $0x30] sm:$0xff]   ;;  %v3142_v40 = vld [vmem:[%s4230_s26 + $0x38] sm:$0xff]   ;;  %v4315_v50 = vld [vmem:[%s4312_s27] sm:$0xff]   ;;  %s5536_s14 = smov (!%p546_p9, %s4048_s14), 1 }
  0x4f   : > { %v4235_v58 = vpack.c.bf16 %v588_v57, %v587_v56  ;;  %v589_v12 = vmul.f32 0.17677669, %v3070_v7  ;;  %v590_v13 = vmul.f32 0.17677669, %v3071_v8  ;;  %v3082_v22 = vunpack.c.l.bf16 %v3139_v17  ;;  %3310 = vmatprep.subr.bf16.mxu1 %v4315_v50  ;;  %v4325_v53 = vld [vmem:[%s4312_s27 + $0x10] sm:$0xff]   ;;  %v4330_v54 = vld [vmem:[%s4312_s27 + $0x18] sm:$0xff]  }
  0x50   : > { %v591_v14 = vmul.f32 0.17677669, %v3074_v9  ;;  %v592_v15 = vmul.f32 0.17677669, %v3075_v10  ;;  %v3083_v23 = vunpack.c.h.bf16 %v3139_v17  ;;  %v593_v24 = vmul.f32 0.17677669, %v3078_v19  ;;  %3311 = vmatpush3.bf16.msra.mxu1 %v4315_v50 }
  0x51   : > { %3294 = vmatprep.mubr.msk.bf16.mxu0 %vm683_vm0, %v4235_v58  ;;  %v4280_v18 = vpack.c.bf16 %v590_v13, %v589_v12  ;;  %v594_v25 = vmul.f32 0.17677669, %v3079_v20  ;;  %v595_v26 = vmul.f32 0.17677669, %v3082_v22  ;;  %v3086_v31 = vunpack.c.l.bf16 %v3140_v28  ;;  %v4335_v55 = vld [vmem:[%s4312_s27 + $0x20] sm:$0xff]   ;;  %v4340_v56 = vld [vmem:[%s4312_s27 + $0x28] sm:$0xff]  }
  0x52   : > { %v4282_v21 = vpack.c.bf16 %v592_v15, %v591_v14  ;;  %v596_v27 = vmul.f32 0.17677669, %v3083_v23  ;;  %v3087_v32 = vunpack.c.h.bf16 %v3140_v28  ;;  %v3090_v34 = vunpack.c.l.bf16 %v3141_v29  ;;  %v4345_v57 = vld [vmem:[%s4312_s27 + $0x30] sm:$0xff]   ;;  %s3047_s30 = sshll.u32 %s5536_s14, 6 }
  0x53   : > { %3281 = vmatpush3.bf16.xpose.msra.mxu0 %v712_v52  ;;  %v4290_v30 = vpack.c.bf16 %v594_v25, %v593_v24  ;;  %v3091_v35 = vunpack.c.h.bf16 %v3141_v29  ;;  %v597_v36 = vmul.f32 0.17677669, %v3086_v31  ;;  %v3094_v42 = vunpack.c.l.bf16 %v3142_v40  ;;  %v4320_v52 = vld [vmem:[%s4312_s27 + $0x8] sm:$0xff]   ;;  %s5337_s5 = scalar_lea.vmem %s5424_s3, %s3047_s30 }
  0x54   : > { %3536 = vmatprep.subr.msk.bf16.mxu0 %vm683_vm0, %v4223_v51  ;;  %v4292_v33 = vpack.c.bf16 %v596_v27, %v595_v26  ;;  %v598_v37 = vmul.f32 0.17677669, %v3087_v32  ;;  %v599_v38 = vmul.f32 0.17677669, %v3090_v34  ;;  %v3095_v43 = vunpack.c.h.bf16 %v3142_v40  ;;  %3312 = vmatprep.subr.bf16.mxu1 %v4320_v52 }
  0x55   : > { %v600_v39 = vmul.f32 0.17677669, %v3091_v35  ;;  %v601_v45 = vmul.f32 0.17677669, %v3094_v42  ;;  %3313 = vmatpush3.bf16.msra.mxu1 %v4320_v52 }
  0x56   : > { %v4299_v41 = vpack.c.bf16 %v598_v37, %v597_v36  ;;  %v602_v46 = vmul.f32 0.17677669, %v3095_v43  ;;  %3314 = vmatprep.subr.bf16.mxu1 %v4325_v53 }
  0x57   : > { %v4301_v44 = vpack.c.bf16 %v600_v39, %v599_v38 }
  0x58   : > { %v4307_v47 = vpack.c.bf16 %v602_v46, %v601_v45 }
  0x59   : > { %3315 = vmatpush3.bf16.msra.mxu1 %v4325_v53 }
  0x5a   : > { %3316 = vmatprep.subr.bf16.mxu1 %v4330_v54 }
  0x5b   : > { %3283 = vmatpush3.bf16.xpose.msra.mxu0 %v715_v59  ;;  %v4348_v59 = vld [vmem:[%s4312_s27 + $0x38] sm:$0xff]  }
  0x5c   : > { %3537 = vmatprep.subr.msk.bf16.mxu0 %vm683_vm0, %v4242_v60 }
  0x5d   : > { %3317 = vmatpush3.bf16.msra.mxu1 %v4330_v54 }
  0x5e   : > { %3318 = vmatprep.subr.bf16.mxu1 %v4335_v55 }
  0x61   : > { %3319 = vmatpush3.bf16.msra.mxu1 %v4335_v55 }
  0x62   : > { %3320 = vmatprep.subr.bf16.mxu1 %v4340_v56 }
  0x63   : > { %3285 = vmatpush3.bf16.xpose.msra.mxu0 %v718_v61 }
  0x64   : > { %3538 = vmatprep.subr.msk.bf16.mxu0 %vm683_vm0, %v4249_v62 }
  0x65   : > { %3321 = vmatpush3.bf16.msra.mxu1 %v4340_v56 }
  0x66   : > { %3322 = vmatprep.subr.bf16.mxu1 %v4345_v57 }
  0x69   : > { %3323 = vmatpush3.bf16.msra.mxu1 %v4345_v57 }
  0x6a   : > { %3324 = vmatprep.subr.bf16.mxu1 %v4348_v59 }
  0x6b   : > { %3287 = vmatpush3.bf16.xpose.msra.mxu0 %v721_v63 }
  0x6c   : > { %3539 = vmatprep.subr.msk.bf16.mxu0 %vm683_vm0, %v4256_v0 }
  0x6d   : > { %3325 = vmatpush3.bf16.msra.mxu1 %v4348_v59 }
  0x73   : > { %3289 = vmatpush3.bf16.xpose.msra.mxu0 %v724_v1 }
  0x74   : > { %3540 = vmatprep.subr.msk.bf16.mxu0 %vm683_vm0, %v4263_v2 }
  0x7b   : > { %3291 = vmatpush3.bf16.xpose.msra.mxu0 %v727_v3 }
  0x7c   : > { %3541 = vmatprep.subr.msk.bf16.mxu0 %vm683_vm0, %v4270_v4 }
  0x83   : > { %3293 = vmatpush3.bf16.xpose.msra.mxu0 %v730_v11 }
  0x8a   : > { %3295 = vmatmul.mubr.msk.bf16.vlgmr.msra.gmra.mrb[0].mxu0 %vm683_vm0, %v4280_v18 }
  0x8b   : > { %3298 = vmatprep.mubr.msk.bf16.mxu0 %vm683_vm0, %v4282_v21 }
  0x92   : > { %3299 = vmatmul.mubr.msk.bf16.gmra.mrb[4].mxu0 %vm683_vm0, %v4290_v30 }
  0x93   : > { %3302 = vmatprep.mubr.msk.bf16.mxu0 %vm683_vm0, %v4292_v33 }
  0x9a   : > { %3303 = vmatmul.mubr.msk.bf16.gmra.mrb[8].mxu0 %vm683_vm0, %v4299_v41 }
  0x9b   : > { %3306 = vmatprep.mubr.msk.bf16.mxu0 %vm683_vm0, %v4301_v44 }
  0xa2   : > { %3307 = vmatmul.mubr.msk.bf16.gmra.mrb[12].mxu0 %vm683_vm0, %v4307_v47 }
  0xbc   : > { %v4353_v61 = vpop.permute.xlu0 %1150 }
  0xbd   : > { %3542 = vmatprep.subr.msk.bf16.mxu1 %vm683_vm0, %v4353_v61  ;;  %v1153_v19 = vpop.permute.xlu1 %1152  ;;  %v1191_v43 = vsel %vm683_vm0, %v4353_v61, 0 }
  0xbe   : > { %v1194_v45 = vsel %vm683_vm0, %v1153_v19, 0 }
  0xc0   : > { %v1155_v20 = vpop.permute.xlu0 %1154 }
  0xc1   : > { %v1197_v46 = vsel %vm683_vm0, %v1155_v20, 0 }
 0x15d   : > { %v4358_v63 = vpop.f32.mrb[0].mxu0 }
 0x15e   : > { %833 = vmax.xlane.f32.xlu1 %v4358_v63  ;;  %v766_v1 = vpop.f32.mrb[1].mxu0 }
 0x15f   : > { %829 = vmax.xlane.f32.xlu0 %v766_v1  ;;  %v3297_v3 = vpop.f32.mrb[2].mxu0 }
 0x160   : > { %v769_v5 = vpop.f32.mrb[3].mxu0 }
 0x162   : > { %835 = vmax.xlane.f32.xlu1 %v3297_v3 }
 0x163   : > { %831 = vmax.xlane.f32.xlu0 %v769_v5 }
 0x165   : > { %v4361_v6 = vpop.f32.mrb[4].mxu0 }
 0x166   : > { %v4363_v7 = vpop.f32.mrb[5].mxu0 }
 0x167   : > { %v4365_v8 = vpop.f32.mrb[6].mxu0 }
 0x168   : > { %v4367_v9 = vpop.f32.mrb[7].mxu0 }
 0x16d   : > { %v4369_v10 = vpop.f32.mrb[8].mxu0 }
 0x16e   : > { %v4371_v11 = vpop.f32.mrb[9].mxu0 }
 0x16f   : > { %v4373_v12 = vpop.f32.mrb[10].mxu0 }
 0x170   : > { %v4375_v13 = vpop.f32.mrb[11].mxu0 }
 0x173   : > { %1156 = vrot.lane.b32.xlu1 %v4242_v60, %s4058_s12 }
 0x175   : > { %v4379_v14 = vpop.f32.mrb[12].mxu0 }
 0x176   : > { %v4381_v15 = vpop.f32.mrb[13].mxu0 }
 0x177   : > { %v4383_v16 = vpop.f32.mrb[14].mxu0 }
 0x178   : > { %v4385_v17 = vpop.f32.mrb[15].mxu0 }
 0x179   : > { %1158 = vrot.lane.b32.xlu0 %v4249_v62, %s4058_s12 }
 0x197   : > { %837 = vmax.xlane.f32.xlu1 %v4363_v7 }
 0x198   : > { %841 = vmax.xlane.f32.xlu0 %v4361_v6 }
 0x19b   : > { %843 = vmax.xlane.f32.xlu1 %v4365_v8 }
 0x19c   : > { %845 = vmax.xlane.f32.xlu0 %v4371_v11 }
 0x19f   : > { %839 = vmax.xlane.f32.xlu1 %v4367_v9 }
 0x1a0   : > { %847 = vmax.xlane.f32.xlu0 %v4375_v13 }
 0x1a3   : > { %849 = vmax.xlane.f32.xlu1 %v4369_v10 }
 0x1a4   : > { %857 = vmax.xlane.f32.xlu0 %v4379_v14 }
 0x1a7   : > { %851 = vmax.xlane.f32.xlu1 %v4373_v12 }
 0x1ab   : > { %853 = vmax.xlane.f32.xlu1 %v4381_v15 }
 0x1af   : > { %859 = vmax.xlane.f32.xlu1 %v4383_v16 }
 0x1b3   : > { %855 = vmax.xlane.f32.xlu1 %v4385_v17 }
 0x1ba   : > { %1162 = vrot.lane.b32.xlu0 %v4263_v2, %s4058_s12 }
 0x1be   : > { %1164 = vrot.lane.b32.xlu0 %v4270_v4, %s4058_s12 }
 0x1c2   : > { %1134 = vrot.lane.b32.xlu0 %v4235_v58, %s4058_s12 }
 0x1c4   : > { %1160 = vrot.lane.b32.xlu1 %v4256_v0, %s4058_s12 }
 0x1c6   : > { %1138 = vrot.lane.b32.xlu0 %v4282_v21, %s4058_s12 }
 0x1c8   : > { %1136 = vrot.lane.b32.xlu1 %v4280_v18, %s4058_s12 }
 0x1ca   : > { %1142 = vrot.lane.b32.xlu0 %v4292_v33, %s4058_s12 }
 0x1cc   : > { %1140 = vrot.lane.b32.xlu1 %v4290_v30, %s4058_s12 }
 0x1ce   : > { %1146 = vrot.lane.b32.xlu0 %v4301_v44, %s4058_s12 }
 0x1d0   : > { %1144 = vrot.lane.b32.xlu1 %v4299_v41, %s4058_s12 }
 0x1d2   : > { %1431 = vrot.lane.b32.xlu0 %v4315_v50, %s4058_s12 }
 0x1d4   : > { %1148 = vrot.lane.b32.xlu1 %v4307_v47, %s4058_s12 }
 0x1d6   : > { %1435 = vrot.lane.b32.xlu0 %v4325_v53, %s4058_s12 }
 0x1d8   : > { %1433 = vrot.lane.b32.xlu1 %v4320_v52, %s4058_s12 }
 0x1da   : > { %1443 = vrot.lane.b32.xlu0 %v4345_v57, %s4058_s12 }
 0x1dc   : > { %1437 = vrot.lane.b32.xlu1 %v4330_v54, %s4058_s12 }
 0x1de   : > { %1600 = vrot.lane.b32.xlu0 %v4207_v48, %s4059_s28 }
 0x1e0   : > { %1439 = vrot.lane.b32.xlu1 %v4335_v55, %s4058_s12 }
 0x1e2   : > { %1602 = vrot.lane.b32.xlu0 %v4210_v49, %s4059_s28 }
 0x1e4   : > { %1441 = vrot.lane.b32.xlu1 %v4340_v56, %s4058_s12 }
 0x1e6   : > { %1606 = vrot.lane.b32.xlu0 %v4242_v60, %s4059_s28 }
 0x1e8   : > { %1445 = vrot.lane.b32.xlu1 %v4348_v59, %s4058_s12 }
 0x1eb   : > { %v834_v22 = vpop.xlane.xlu1 %833 }
 0x1ec   : > { %v830_v23 = vpop.xlane.xlu0 %829  ;;  %v863_v25 = vsub.f32 %v4358_v63, %v834_v22  ;;  %1604 = vrot.lane.b32.xlu1 %v4223_v51, %s4059_s28 }
 0x1ed   : > { %v861_v24 = vsub.f32 %v766_v1, %v830_v23 }
 0x1ee   : > { %v881_v32 = vmul.f32 1.442695, %v863_v25 }
 0x1ef   : > { %v877_v26 = vmul.f32 1.442695, %v861_v24  ;;  %v836_v27 = vpop.xlane.xlu1 %835 }
 0x1f0   : > { %v864_v28 = vsub.f32 %v3297_v3, %v836_v27  ;;  %v832_v29 = vpop.xlane.xlu0 %831 }
 0x1f1   : > { %v862_v31 = vsub.f32 %v769_v5, %v832_v29  ;;  %3746 = vpow2.f32 %v877_v26 }
 0x1f2   : > { %v883_v34 = vmul.f32 1.442695, %v864_v28 }
 0x1f3   : > { %v879_v35 = vmul.f32 1.442695, %v862_v31  ;;  %v1157_v63 = vpop.permute.xlu1 %1156 }
 0x1f4   : > { %3748 = vpow2.f32 %v883_v34  ;;  %v1200_v1 = vsel %vm683_vm0, %v1157_v63, 0  ;;  %v1159_v3 = vpop.permute.xlu0 %1158 }
 0x1f5   : > { %3750 = vpow2.f32 %v879_v35  ;;  %v1203_v61 = vsel %vm683_vm0, %v1159_v3, 0 }
 0x1f6   : > { %3752 = vpow2.f32 %v881_v32 }
 0x1fb   : > { %v4440_v36 = vpop.eup %3746 }
 0x1fe   : > { %v4442_v37 = vpop.eup %3748 }
 0x1ff   : > { %v4444_v38 = vpop.eup %3750 }
 0x200   : > { %v4446_v39 = vpop.eup %3752  ;;  %v941_v40 = vpack.c.bf16 %v4444_v38, %v4440_v36 }
 0x201   : > { %v942_v42 = vpack.c.bf16 %v4442_v37, %v4446_v39 }
 0x202   : > { %3326 = vmatprep.mubr.bf16.mxu1 %v941_v40 }
 0x203   : > { %3327 = vmatmul.mubr.bf16.vlgmr.msra.gmra.mrb[0].mxu1 %v942_v42 }
 0x204   : > { %3343 = vmatpush3.bf16.xpose.msra.mxu1 %v1191_v43 }
 0x205   : > { %3543 = vmatprep.subr.msk.bf16.mxu1 %vm683_vm0, %v1153_v19 }
 0x20c   : > { %3345 = vmatpush3.bf16.xpose.msra.mxu1 %v1194_v45 }
 0x20d   : > { %3544 = vmatprep.subr.msk.bf16.mxu1 %vm683_vm0, %v1155_v20 }
 0x214   : > { %3347 = vmatpush3.bf16.xpose.msra.mxu1 %v1197_v46 }
 0x215   : > { %3545 = vmatprep.subr.msk.bf16.mxu1 %vm683_vm0, %v1157_v63 }
 0x21c   : > { %3349 = vmatpush3.bf16.xpose.msra.mxu1 %v1200_v1 }
 0x21d   : > { %3546 = vmatprep.subr.msk.bf16.mxu1 %vm683_vm0, %v1159_v3 }
 0x224   : > { %3351 = vmatpush3.bf16.xpose.msra.mxu1 %v1203_v61  ;;  %v838_v5 = vpop.xlane.xlu1 %837 }
 0x225   : > { %v865_v19 = vsub.f32 %v4363_v7, %v838_v5  ;;  %v842_v22 = vpop.xlane.xlu0 %841 }
 0x226   : > { %v867_v23 = vsub.f32 %v4361_v6, %v842_v22 }
 0x227   : > { %v885_v24 = vmul.f32 1.442695, %v865_v19 }
 0x228   : > { %v844_v20 = vpop.xlane.xlu1 %843  ;;  %v889_v27 = vmul.f32 1.442695, %v867_v23 }
 0x229   : > { %v868_v25 = vsub.f32 %v4365_v8, %v844_v20  ;;  %v846_v26 = vpop.xlane.xlu0 %845  ;;  %3754 = vpow2.f32 %v885_v24 }
 0x22a   : > { %v869_v28 = vsub.f32 %v4371_v11, %v846_v26  ;;  %3756 = vpow2.f32 %v889_v27 }
 0x22b   : > { %v891_v29 = vmul.f32 1.442695, %v868_v25 }
 0x22c   : > { %v893_v31 = vmul.f32 1.442695, %v869_v28  ;;  %v840_v32 = vpop.xlane.xlu1 %839 }
 0x22d   : > { %v866_v34 = vsub.f32 %v4367_v9, %v840_v32  ;;  %v848_v35 = vpop.xlane.xlu0 %847  ;;  %3758 = vpow2.f32 %v891_v29 }
 0x22e   : > { %v870_v7 = vsub.f32 %v4375_v13, %v848_v35  ;;  %3760 = vpow2.f32 %v893_v31 }
 0x22f   : > { %v887_v6 = vmul.f32 1.442695, %v866_v34 }
 0x230   : > { %v895_v40 = vmul.f32 1.442695, %v870_v7  ;;  %v850_v42 = vpop.xlane.xlu1 %849 }
 0x231   : > { %3762 = vpow2.f32 %v887_v6  ;;  %v871_v8 = vsub.f32 %v4369_v10, %v850_v42  ;;  %v858_v10 = vpop.xlane.xlu0 %857 }
 0x232   : > { %3764 = vpow2.f32 %v895_v40  ;;  %v875_v25 = vsub.f32 %v4379_v14, %v858_v10 }
 0x233   : > { %v897_v11 = vmul.f32 1.442695, %v871_v8  ;;  %v4470_v46 = vpop.eup %3754 }
 0x234   : > { %v852_v43 = vpop.xlane.xlu1 %851  ;;  %v4472_v63 = vpop.eup %3756  ;;  %v905_v31 = vmul.f32 1.442695, %v875_v25 }
 0x235   : > { %v872_v45 = vsub.f32 %v4373_v12, %v852_v43  ;;  %3766 = vpow2.f32 %v897_v11  ;;  %v1163_v35 = vpop.permute.xlu0 %1162 }
 0x237   : > { %v899_v9 = vmul.f32 1.442695, %v872_v45  ;;  %v4474_v1 = vpop.eup %3758 }
 0x238   : > { %v854_v13 = vpop.xlane.xlu1 %853  ;;  %v4476_v3 = vpop.eup %3760  ;;  %v944_v20 = vpack.c.bf16 %v4474_v1, %v4472_v63 }
 0x239   : > { %3768 = vpow2.f32 %v899_v9  ;;  %v873_v5 = vsub.f32 %v4381_v15, %v854_v13  ;;  %v1165_v6 = vpop.permute.xlu0 %1164 }
 0x23a   : > { %v1212_v13 = vsel %vm683_vm0, %v1165_v6, 0 }
 0x23b   : > { %v4478_v61 = vpop.eup %3762  ;;  %v901_v26 = vmul.f32 1.442695, %v873_v5 }
 0x23c   : > { %v4481_v19 = vpop.eup %3764  ;;  %v860_v12 = vpop.xlane.xlu1 %859  ;;  %v943_v22 = vpack.c.bf16 %v4478_v61, %v4470_v46 }
 0x23d   : > { %v876_v23 = vsub.f32 %v4383_v16, %v860_v12  ;;  %v945_v24 = vpack.c.bf16 %v4481_v19, %v4476_v3  ;;  %3770 = vpow2.f32 %v901_v26  ;;  %v1135_v9 = vpop.permute.xlu0 %1134 }
 0x23e   : > { %3330 = vmatprep.mubr.bf16.mxu1 %v943_v22 }
 0x23f   : > { %3331 = vmatmul.mubr.bf16.gmra.mrb[4].mxu1 %v944_v20  ;;  %v907_v15 = vmul.f32 1.442695, %v876_v23  ;;  %v4492_v29 = vpop.eup %3766 }
 0x240   : > { %3334 = vmatprep.mubr.bf16.mxu1 %v945_v24  ;;  %v856_v27 = vpop.xlane.xlu1 %855  ;;  %5429 = vst [vmem:[#allocation5_spill] sm:$0xff] %v4492_v29 }
 0x241   : > { %v874_v28 = vsub.f32 %v4385_v17, %v856_v27  ;;  %3772 = vpow2.f32 %v907_v15  ;;  %v1209_v17 = vsel %vm683_vm0, %v1163_v35, 0  ;;  %v1139_v5 = vpop.permute.xlu0 %1138 }
 0x243   : > { %v4494_v16 = vpop.eup %3768  ;;  %v903_v32 = vmul.f32 1.442695, %v874_v28 }
 0x244   : > { %v1161_v34 = vpop.permute.xlu1 %1160  ;;  %v946_v14 = vpack.c.bf16 %v4494_v16, %v4492_v29 }
 0x245   : > { %3774 = vpow2.f32 %v903_v32  ;;  %3547 = vmatprep.subr.msk.bf16.mxu1 %vm683_vm0, %v1161_v34  ;;  %v1206_v7 = vsel %vm683_vm0, %v1161_v34, 0  ;;  %v1143_v22 = vpop.permute.xlu0 %1142 }
 0x246   : > { %3776 = vpow2.f32 %v905_v31  ;;  %3353 = vmatpush3.bf16.xpose.msra.mxu1 %v1206_v7 }
 0x247   : > { %3335 = vmatmul.mubr.bf16.gmra.mrb[8].mxu1 %v946_v14  ;;  %3548 = vmatprep.subr.msk.bf16.mxu1 %vm683_vm0, %v1163_v35  ;;  %v4502_v40 = vpop.eup %3770 }
 0x248   : > { %5430 = vst [vmem:[#allocation6_spill] sm:$0xff] %v4502_v40  ;;  %v1137_v10 = vpop.permute.xlu1 %1136 }
 0x249   : > { %v1147_v23 = vpop.permute.xlu0 %1146 }
 0x24b   : > { %v4504_v42 = vpop.eup %3772 }
 0x24c   : > { %v1141_v12 = vpop.permute.xlu1 %1140 }
 0x24d   : > { %v1432_v25 = vpop.permute.xlu0 %1431 }
 0x24e   : > { %3355 = vmatpush3.bf16.xpose.msra.mxu1 %v1209_v17  ;;  %3374 = vmatprep.subr.bf16.mxu0 %v1432_v25 }
 0x24f   : > { %v4506_v8 = vpop.eup %3774  ;;  %3549 = vmatprep.subr.msk.bf16.mxu1 %vm683_vm0, %v1165_v6  ;;  %3375 = vmatpush3.bf16.msra.mxu0 %v1432_v25 }
 0x250   : > { %v4509_v11 = vpop.eup %3776  ;;  %v947_v43 = vpack.c.bf16 %v4506_v8, %v4502_v40  ;;  %v1145_v48 = vpop.permute.xlu1 %1144 }
 0x251   : > { %5431 = vst [vmem:[#allocation7_spill] sm:$0xff] %v4509_v11  ;;  %v948_v45 = vpack.c.bf16 %v4504_v42, %v4509_v11  ;;  %v1436_v15 = vpop.permute.xlu0 %1435 }
 0x252   : > { %3338 = vmatprep.mubr.bf16.mxu1 %v947_v43 }
 0x253   : > { %3339 = vmatmul.mubr.bf16.gmra.mrb[12].mxu1 %v948_v45 }
 0x254   : > { %3358 = vmatprep.mubr.msk.bf16.mxu1 %vm683_vm0, %v1135_v9  ;;  %v1149_v51 = vpop.permute.xlu1 %1148 }
 0x255   : > { %v1444_v32 = vpop.permute.xlu0 %1443 }
 0x256   : > { %3357 = vmatpush3.bf16.xpose.msra.mxu1 %v1212_v13 }
 0x258   : > { %v1434_v26 = vpop.permute.xlu1 %1433 }
 0x259   : > { %3376 = vmatprep.subr.bf16.mxu0 %v1434_v26  ;;  %v4540_v14 = vpop.permute.xlu0 %1600 }
 0x25a   : > { %3377 = vmatpush3.bf16.msra.mxu0 %v1434_v26 }
 0x25b   : > { %3378 = vmatprep.subr.bf16.mxu0 %v1436_v15 }
 0x25c   : > { %v1438_v27 = vpop.permute.xlu1 %1437 }
 0x25d   : > { %3359 = vmatmul.mubr.msk.bf16.vlgmr.msra.gmra.mrb[16].mxu1 %vm683_vm0, %v1137_v10 }
 0x25e   : > { %3362 = vmatprep.mubr.msk.bf16.mxu1 %vm683_vm0, %v1139_v5  ;;  %3379 = vmatpush3.bf16.msra.mxu0 %v1436_v15 }
 0x25f   : > { %3380 = vmatprep.subr.bf16.mxu0 %v1438_v27 }
 0x260   : > { %v1440_v28 = vpop.permute.xlu1 %1439 }
 0x262   : > { %3381 = vmatpush3.bf16.msra.mxu0 %v1438_v27 }
 0x263   : > { %3382 = vmatprep.subr.bf16.mxu0 %v1440_v28 }
 0x264   : > { %v1442_v31 = vpop.permute.xlu1 %1441 }
 0x265   : > { %3363 = vmatmul.mubr.msk.bf16.gmra.mrb[20].mxu1 %vm683_vm0, %v1141_v12 }
 0x266   : > { %3366 = vmatprep.mubr.msk.bf16.mxu1 %vm683_vm0, %v1143_v22  ;;  %3383 = vmatpush3.bf16.msra.mxu0 %v1440_v28 }
 0x267   : > { %3384 = vmatprep.subr.bf16.mxu0 %v1442_v31 }
 0x268   : > { %v1446_v34 = vpop.permute.xlu1 %1445 }
 0x26a   : > { %3385 = vmatpush3.bf16.msra.mxu0 %v1442_v31 }
 0x26b   : > { %3386 = vmatprep.subr.bf16.mxu0 %v1444_v32 }
 0x26d   : > { %3367 = vmatmul.mubr.msk.bf16.gmra.mrb[24].mxu1 %vm683_vm0, %v1145_v48 }
 0x26e   : > { %3370 = vmatprep.mubr.msk.bf16.mxu1 %vm683_vm0, %v1147_v23  ;;  %3387 = vmatpush3.bf16.msra.mxu0 %v1444_v32 }
 0x26f   : > { %3388 = vmatprep.subr.bf16.mxu0 %v1446_v34 }
 0x272   : > { %3389 = vmatpush3.bf16.msra.mxu0 %v1446_v34 }
 0x273   : > { %3550 = vmatprep.subr.msk.bf16.mxu0 %vm683_vm0, %v4540_v14 }
 0x275   : > { %3371 = vmatmul.mubr.msk.bf16.gmra.mrb[28].mxu1 %vm683_vm0, %v1149_v51 }
 0x2d6   : > { %v4532_v20 = vpop.f32.mrb[0].mxu1 }
 0x2d7   : > { %5432 = vst [vmem:[#allocation8_spill] sm:$0xff] %v4532_v20  ;;  %v4534_v49 = vpop.f32.mrb[1].mxu1 }
 0x2d8   : > { %5433 = vst [vmem:[#allocation9_spill] sm:$0xff] %v4534_v49  ;;  %v4536_v24 = vpop.f32.mrb[2].mxu1 }
 0x2d9   : > { %5434 = vst [vmem:[#allocation10_spill] sm:$0xff] %v4536_v24  ;;  %v4538_v60 = vpop.f32.mrb[3].mxu1 }
 0x2da   : > { %5435 = vst [vmem:[#allocation11_spill] sm:$0xff] %v4538_v60 }
 0x312   : > { %v4544_v35 = vpop.f32.mrb[4].mxu1 }
 0x313   : > { %5436 = vst [vmem:[#allocation12_spill] sm:$0xff] %v4544_v35  ;;  %v4546_v7 = vpop.f32.mrb[5].mxu1 }
 0x314   : > { %5437 = vst [vmem:[#allocation13_spill] sm:$0xff] %v4546_v7  ;;  %v4548_v17 = vpop.f32.mrb[6].mxu1 }
 0x315   : > { %5438 = vst [vmem:[#allocation14_spill] sm:$0xff] %v4548_v17  ;;  %v4550_v6 = vpop.f32.mrb[7].mxu1 }
 0x316   : > { %5439 = vst [vmem:[#allocation15_spill] sm:$0xff] %v4550_v6 }
 0x31a   : > { %v4552_v43 = vpop.f32.mrb[8].mxu1 }
 0x31b   : > { %5440 = vst [vmem:[#allocation16_spill] sm:$0xff] %v4552_v43  ;;  %v4554_v45 = vpop.f32.mrb[9].mxu1 }
 0x31c   : > { %5441 = vst [vmem:[#allocation17_spill] sm:$0xff] %v4554_v45  ;;  %v4556_v9 = vpop.f32.mrb[10].mxu1 }
 0x31d   : > { %5442 = vst [vmem:[#allocation18_spill] sm:$0xff] %v4556_v9  ;;  %v4558_v13 = vpop.f32.mrb[11].mxu1 }
 0x31e   : > { %5443 = vst [vmem:[#allocation19_spill] sm:$0xff] %v4558_v13 }
 0x326   : > { %v4560_v10 = vpop.f32.mrb[12].mxu1 }
 0x327   : > { %5444 = vst [vmem:[#allocation20_spill] sm:$0xff] %v4560_v10  ;;  %v4562_v5 = vpop.f32.mrb[13].mxu1 }
 0x328   : > { %5445 = vst [vmem:[#allocation21_spill] sm:$0xff] %v4562_v5  ;;  %v4564_v12 = vpop.f32.mrb[14].mxu1 }
 0x329   : > { %5446 = vst [vmem:[#allocation22_spill] sm:$0xff] %v4564_v12  ;;  %v4566_v22 = vpop.f32.mrb[15].mxu1 }
 0x32a   : > { %5447 = vst [vmem:[#allocation23_spill] sm:$0xff] %v4566_v22 }
 0x330   : > { %v4568_v48 = vpop.f32.mrb[16].mxu1 }
 0x331   : > { %1315 = vmax.xlane.f32.xlu0 %v4568_v48  ;;  %v1248_v23 = vpop.f32.mrb[17].mxu1 }
 0x332   : > { %v4571_v51 = vpop.f32.mrb[18].mxu1 }
 0x333   : > { %v1251_v25 = vpop.f32.mrb[19].mxu1 }
 0x334   : > { %1313 = vmax.xlane.f32.xlu1 %v1251_v25 }
 0x335   : > { %1311 = vmax.xlane.f32.xlu0 %v1248_v23 }
 0x338   : > { %v4573_v26 = vpop.f32.mrb[20].mxu1 }
 0x339   : > { %1317 = vmax.xlane.f32.xlu0 %v4571_v51  ;;  %1323 = vmax.xlane.f32.xlu1 %v4573_v26  ;;  %v4577_v15 = vpop.f32.mrb[21].mxu1 }
 0x33a   : > { %v4579_v27 = vpop.f32.mrb[22].mxu1 }
 0x33b   : > { %v4581_v28 = vpop.f32.mrb[23].mxu1 }
 0x33d   : > { %1319 = vmax.xlane.f32.xlu1 %v4577_v15  ;;  %1321 = vmax.xlane.f32.xlu0 %v4581_v28 }
 0x340   : > { %v4585_v31 = vpop.f32.mrb[24].mxu1 }
 0x341   : > { %1325 = vmax.xlane.f32.xlu1 %v4579_v27  ;;  %1331 = vmax.xlane.f32.xlu0 %v4585_v31  ;;  %v4589_v32 = vpop.f32.mrb[25].mxu1 }
 0x342   : > { %v4591_v34 = vpop.f32.mrb[26].mxu1 }
 0x343   : > { %v4593_v43 = vpop.f32.mrb[27].mxu1 }
 0x345   : > { %1327 = vmax.xlane.f32.xlu1 %v4589_v32 }
 0x348   : > { %v4596_v10 = vpop.f32.mrb[28].mxu1 }
 0x349   : > { %1333 = vmax.xlane.f32.xlu1 %v4591_v34  ;;  %v4599_v5 = vpop.f32.mrb[29].mxu1 }
 0x34a   : > { %1335 = vmax.xlane.f32.xlu0 %v4599_v5  ;;  %v4602_v12 = vpop.f32.mrb[30].mxu1 }
 0x34b   : > { %v4604_v22 = vpop.f32.mrb[31].mxu1 }
 0x34d   : > { %1329 = vmax.xlane.f32.xlu1 %v4593_v43 }
 0x351   : > { %1339 = vmax.xlane.f32.xlu1 %v4596_v10 }
 0x355   : > { %1341 = vmax.xlane.f32.xlu1 %v4602_v12 }
 0x360   : > { %1610 = vrot.lane.b32.xlu0 %v4256_v0, %s4059_s28 }
 0x366   : > { %1608 = vrot.lane.b32.xlu1 %v4249_v62, %s4059_s28  ;;  %v4648_v62 = vpop.permute.xlu0 %1602 }
 0x36a   : > { %1586 = vrot.lane.b32.xlu1 %v4280_v18, %s4059_s28  ;;  %v4652_v0 = vpop.permute.xlu0 %1606 }
 0x36e   : > { %1590 = vrot.lane.b32.xlu1 %v4290_v30, %s4059_s28 }
 0x372   : > { %1594 = vrot.lane.b32.xlu1 %v4299_v41, %s4059_s28 }
 0x376   : > { %1598 = vrot.lane.b32.xlu1 %v4307_v47, %s4059_s28 }
 0x37a   : > { %1883 = vrot.lane.b32.xlu1 %v4320_v52, %s4059_s28 }
 0x37e   : > { %1887 = vrot.lane.b32.xlu1 %v4330_v54, %s4059_s28 }
 0x37f   : > { %1337 = vmax.xlane.f32.xlu0 %v4604_v22 }
 0x382   : > { %1889 = vrot.lane.b32.xlu1 %v4335_v55, %s4059_s28 }
 0x386   : > { %1891 = vrot.lane.b32.xlu1 %v4340_v56, %s4059_s28 }
 0x38a   : > { %1895 = vrot.lane.b32.xlu1 %v4348_v59, %s4059_s28 }
 0x395   : > { %1612 = vrot.lane.b32.xlu0 %v4263_v2, %s4059_s28  ;;  %v4654_v2 = vpop.permute.xlu1 %1604 }
 0x399   : > { %1614 = vrot.lane.b32.xlu0 %v4270_v4, %s4059_s28 }
 0x39d   : > { %1584 = vrot.lane.b32.xlu0 %v4235_v58, %s4059_s28 }
 0x3a1   : > { %1588 = vrot.lane.b32.xlu0 %v4282_v21, %s4059_s28 }
 0x3a5   : > { %1592 = vrot.lane.b32.xlu0 %v4292_v33, %s4059_s28 }
 0x3a9   : > { %1596 = vrot.lane.b32.xlu0 %v4301_v44, %s4059_s28 }
 0x3ad   : > { %1881 = vrot.lane.b32.xlu0 %v4315_v50, %s4059_s28 }
 0x3b1   : > { %1885 = vrot.lane.b32.xlu0 %v4325_v53, %s4059_s28 }
 0x3b5   : > { %1893 = vrot.lane.b32.xlu0 %v4345_v57, %s4059_s28 }
 0x3be   : > { %v1316_v4 = vpop.xlane.xlu0 %1315 }
 0x3bf   : > { %v1345_v54 = vsub.f32 %v4568_v48, %v1316_v4 }
 0x3c1   : > { %v1314_v52 = vpop.xlane.xlu1 %1313  ;;  %v1363_v13 = vmul.f32 1.442695, %v1345_v54 }
 0x3c2   : > { %v1344_v55 = vsub.f32 %v1251_v25, %v1314_v52  ;;  %v1312_v56 = vpop.xlane.xlu0 %1311 }
 0x3c3   : > { %v1343_v59 = vsub.f32 %v1248_v23, %v1312_v56 }
 0x3c4   : > { %v1361_v50 = vmul.f32 1.442695, %v1344_v55 }
 0x3c5   : > { %v1359_v9 = vmul.f32 1.442695, %v1343_v59  ;;  %v1641_v59 = vsel %vm683_vm0, %v4540_v14, 0 }
 0x3c6   : > { %3778 = vpow2.f32 %v1361_v50  ;;  %v1318_v53 = vpop.xlane.xlu0 %1317  ;;  %v1324_v17 = vpop.xlane.xlu1 %1323 }
 0x3c7   : > { %3780 = vpow2.f32 %v1359_v9  ;;  %v1346_v57 = vsub.f32 %v4571_v51, %v1318_v53  ;;  %v1349_v45 = vsub.f32 %v4573_v26, %v1324_v17 }
 0x3c8   : > { %3782 = vpow2.f32 %v1363_v13 }
 0x3c9   : > { %v1365_v6 = vmul.f32 1.442695, %v1346_v57  ;;  %v1371_v54 = vmul.f32 1.442695, %v1349_v45 }
 0x3ca   : > { %v1322_v24 = vpop.xlane.xlu0 %1321  ;;  %v1320_v60 = vpop.xlane.xlu1 %1319 }
 0x3cb   : > { %3784 = vpow2.f32 %v1365_v6  ;;  %v1348_v48 = vsub.f32 %v4581_v28, %v1322_v24  ;;  %v1347_v23 = vsub.f32 %v4577_v15, %v1320_v60 }
 0x3cd   : > { %v1369_v25 = vmul.f32 1.442695, %v1348_v48  ;;  %v1367_v4 = vmul.f32 1.442695, %v1347_v23 }
 0x3ce   : > { %v1326_v52 = vpop.xlane.xlu1 %1325  ;;  %v1332_v45 = vpop.xlane.xlu0 %1331 }
 0x3cf   : > { %3786 = vpow2.f32 %v1369_v25  ;;  %v1350_v9 = vsub.f32 %v4579_v27, %v1326_v52  ;;  %v1353_v56 = vsub.f32 %v4585_v31, %v1332_v45 }
 0x3d0   : > { %v4662_v55 = vpop.eup %3778  ;;  %3788 = vpow2.f32 %v1367_v4 }
 0x3d1   : > { %v4664_v13 = vpop.eup %3780  ;;  %v1373_v51 = vmul.f32 1.442695, %v1350_v9  ;;  %3790 = vpow2.f32 %v1371_v54 }
 0x3d2   : > { %v1328_v6 = vpop.xlane.xlu1 %1327  ;;  %v1423_v17 = vpack.c.bf16 %v4662_v55, %v4664_v13  ;;  %v4668_v24 = vpop.eup %3782 }
 0x3d3   : > { %3792 = vpow2.f32 %v1373_v51  ;;  %v1351_v26 = vsub.f32 %v4589_v32, %v1328_v6 }
 0x3d4   : > { %3390 = vmatprep.mubr.bf16.mxu0 %v1423_v17  ;;  %v1647_v17 = vsel %vm683_vm0, %v4654_v2, 0 }
 0x3d5   : > { %v4670_v60 = vpop.eup %3784  ;;  %v1375_v53 = vmul.f32 1.442695, %v1351_v26 }
 0x3d6   : > { %v1334_v15 = vpop.xlane.xlu1 %1333  ;;  %v1424_v27 = vpack.c.bf16 %v4670_v60, %v4668_v24 }
 0x3d7   : > { %v1354_v28 = vsub.f32 %v4591_v34, %v1334_v15  ;;  %v1379_v34 = vmul.f32 1.442695, %v1353_v56  ;;  %3794 = vpow2.f32 %v1375_v53 }
 0x3d8   : > { %3391 = vmatmul.mubr.bf16.vlgmr.msra.gmra.mrb[16].mxu0 %v1424_v27 }
 0x3d9   : > { %v4679_v50 = vpop.eup %3786  ;;  %3407 = vmatpush3.bf16.xpose.msra.mxu0 %v1641_v59  ;;  %v1381_v48 = vmul.f32 1.442695, %v1354_v28  ;;  %v1650_v28 = vsel %vm683_vm0, %v4652_v0, 0 }
 0x3da   : > { %v4681_v57 = vpop.eup %3788  ;;  %3551 = vmatprep.subr.msk.bf16.mxu0 %vm683_vm0, %v4648_v62  ;;  %v1330_v32 = vpop.xlane.xlu1 %1329 }
 0x3db   : > { %v1352_v23 = vsub.f32 %v4593_v43, %v1330_v32  ;;  %v1425_v31 = vpack.c.bf16 %v4679_v50, %v4681_v57  ;;  %v4688_v25 = vpop.eup %3790  ;;  %3796 = vpow2.f32 %v1381_v48  ;;  %v1644_v43 = vsel %vm683_vm0, %v4648_v62, 0 }
 0x3dd   : > { %v1377_v14 = vmul.f32 1.442695, %v1352_v23  ;;  %3394 = vmatprep.mubr.bf16.mxu0 %v1425_v31  ;;  %v4690_v4 = vpop.eup %3792 }
 0x3de   : > { %v1426_v52 = vpack.c.bf16 %v4690_v4, %v4688_v25  ;;  %v1340_v54 = vpop.xlane.xlu1 %1339 }
 0x3df   : > { %3798 = vpow2.f32 %v1377_v14  ;;  %v1357_v23 = vsub.f32 %v4596_v10, %v1340_v54 }
 0x3e0   : > { %3800 = vpow2.f32 %v1379_v34  ;;  %3395 = vmatmul.mubr.bf16.gmra.mrb[20].mxu0 %v1426_v52 }
 0x3e1   : > { %3409 = vmatpush3.bf16.xpose.msra.mxu0 %v1644_v43  ;;  %v4698_v9 = vpop.eup %3794  ;;  %v1387_v52 = vmul.f32 1.442695, %v1357_v23 }
 0x3e2   : > { %3552 = vmatprep.subr.msk.bf16.mxu0 %vm683_vm0, %v4654_v2  ;;  %v1342_v15 = vpop.xlane.xlu1 %1341  ;;  %v1336_v2 = vpop.xlane.xlu0 %1335 }
 0x3e3   : > { %v1355_v48 = vsub.f32 %v4599_v5, %v1336_v2  ;;  %v1358_v32 = vsub.f32 %v4602_v12, %v1342_v15 }
 0x3e5   : > { %v4700_v51 = vpop.eup %3796  ;;  %v1389_v31 = vmul.f32 1.442695, %v1358_v32 }
 0x3e6   : > { %v1609_v27 = vpop.permute.xlu1 %1608  ;;  %v1611_v59 = vpop.permute.xlu0 %1610 }
 0x3e7   : > { %v1653_v56 = vsel %vm683_vm0, %v1609_v27, 0  ;;  %v1656_v53 = vsel %vm683_vm0, %v1611_v59, 0 }
 0x3e9   : > { %v4702_v6 = vpop.eup %3798  ;;  %3411 = vmatpush3.bf16.xpose.msra.mxu0 %v1647_v17 }
 0x3ea   : > { %v4706_v45 = vpop.eup %3800  ;;  %v1427_v62 = vpack.c.bf16 %v4702_v6, %v4698_v9  ;;  %3553 = vmatprep.subr.msk.bf16.mxu0 %vm683_vm0, %v4652_v0  ;;  %v1383_v0 = vmul.f32 1.442695, %v1355_v48  ;;  %v1587_v2 = vpop.permute.xlu1 %1586 }
 0x3eb   : > { %v1428_v26 = vpack.c.bf16 %v4700_v51, %v4706_v45 }
 0x3ec   : > { %3398 = vmatprep.mubr.bf16.mxu0 %v1427_v62  ;;  %3802 = vpow2.f32 %v1383_v0  ;;  %v4002_v0 = vld [vmem:[%s4204_s25] sm:$0xff]  }
 0x3ed   : > { %3399 = vmatmul.mubr.bf16.gmra.mrb[24].mxu0 %v1428_v26  ;;  %3804 = vpow2.f32 %v1389_v31  ;;  %2050 = vrot.lane.b32.xlu0 %v4002_v0, %s4060_s29  ;;  %v4003_v31 = vld [vmem:[%s4204_s25 + $0x10] sm:$0xff]  }
 0x3ee   : > { %2054 = vrot.lane.b32.xlu1 %v4003_v31, %s4060_s29 }
 0x3f1   : > { %3413 = vmatpush3.bf16.xpose.msra.mxu0 %v1650_v28 }
 0x3f2   : > { %3554 = vmatprep.subr.msk.bf16.mxu0 %vm683_vm0, %v1609_v27 }
 0x3f6   : > { %v4728_v12 = vpop.eup %3802 }
 0x3f9   : > { %3415 = vmatpush3.bf16.xpose.msra.mxu0 %v1653_v56 }
 0x3fa   : > { %3555 = vmatprep.subr.msk.bf16.mxu0 %vm683_vm0, %v1611_v59  ;;  %v1591_v59 = vpop.permute.xlu1 %1590 }
 0x3fe   : > { %v1595_v48 = vpop.permute.xlu1 %1594 }
 0x401   : > { %3417 = vmatpush3.bf16.xpose.msra.mxu0 %v1656_v53 }
 0x402   : > { %v1599_v23 = vpop.permute.xlu1 %1598 }
 0x40c   : > { %v1338_v34 = vpop.xlane.xlu0 %1337 }
 0x40d   : > { %v1356_v14 = vsub.f32 %v4604_v22, %v1338_v34  ;;  %v4730_v22 = vpop.eup %3804  ;;  %v4004_v34 = vld [vmem:[%s4204_s25 + $0x8] sm:$0xff]  }
 0x40e   : > { %2052 = vrot.lane.b32.xlu0 %v4004_v34, %s4060_s29 }
 0x40f   : > { %v1385_v43 = vmul.f32 1.442695, %v1356_v14  ;;  %v4005_v14 = vld [vmem:[%s4204_s25 + $0x18] sm:$0xff]  }
 0x410   : > { %v1613_v17 = vpop.permute.xlu0 %1612 }
 0x411   : > { %3806 = vpow2.f32 %v1385_v43  ;;  %3556 = vmatprep.subr.msk.bf16.mxu0 %vm683_vm0, %v1613_v17  ;;  %v1659_v62 = vsel %vm683_vm0, %v1613_v17, 0  ;;  %v1884_v43 = vpop.permute.xlu1 %1883 }
 0x412   : > { %3808 = vpow2.f32 %v1387_v52  ;;  %3419 = vmatpush3.bf16.xpose.msra.mxu0 %v1659_v62  ;;  %2056 = vrot.lane.b32.xlu0 %v4005_v14, %s4060_s29 }
 0x414   : > { %v1615_v5 = vpop.permute.xlu0 %1614 }
 0x415   : > { %3557 = vmatprep.subr.msk.bf16.mxu0 %vm683_vm0, %v1615_v5  ;;  %v1662_v10 = vsel %vm683_vm0, %v1615_v5, 0 }
 0x418   : > { %v1585_v28 = vpop.permute.xlu0 %1584 }
 0x41a   : > { %3421 = vmatpush3.bf16.xpose.msra.mxu0 %v1662_v10 }
 0x41b   : > { %v4732_v54 = vpop.eup %3806 }
 0x41c   : > { %v4734_v26 = vpop.eup %3808  ;;  %v1429_v15 = vpack.c.bf16 %v4732_v54, %v4728_v12  ;;  %v1589_v56 = vpop.permute.xlu0 %1588 }
 0x41d   : > { %v1430_v27 = vpack.c.bf16 %v4730_v22, %v4734_v26 }
 0x41e   : > { %3402 = vmatprep.mubr.bf16.mxu0 %v1429_v15 }
 0x41f   : > { %3403 = vmatmul.mubr.bf16.gmra.mrb[28].mxu0 %v1430_v27  ;;  %v1888_v27 = vpop.permute.xlu1 %1887 }
 0x420   : > { %3422 = vmatprep.mubr.msk.bf16.mxu0 %vm683_vm0, %v1585_v28  ;;  %v1593_v53 = vpop.permute.xlu0 %1592 }
 0x424   : > { %v1597_v32 = vpop.permute.xlu0 %1596 }
 0x427   : > { %3423 = vmatmul.mubr.msk.bf16.vlgmr.msra.gmra.mrb[32].mxu0 %vm683_vm0, %v1587_v2  ;;  %v1890_v2 = vpop.permute.xlu1 %1889 }
 0x428   : > { %3426 = vmatprep.mubr.msk.bf16.mxu0 %vm683_vm0, %v1589_v56  ;;  %v1882_v52 = vpop.permute.xlu0 %1881 }
 0x429   : > { %3438 = vmatprep.subr.bf16.mxu1 %v1882_v52 }
 0x42a   : > { %3439 = vmatpush3.bf16.msra.mxu1 %v1882_v52 }
 0x42b   : > { %3440 = vmatprep.subr.bf16.mxu1 %v1884_v43 }
 0x42c   : > { %v1886_v15 = vpop.permute.xlu0 %1885 }
 0x42e   : > { %3441 = vmatpush3.bf16.msra.mxu1 %v1884_v43 }
 0x42f   : > { %3427 = vmatmul.mubr.msk.bf16.gmra.mrb[36].mxu0 %vm683_vm0, %v1591_v59  ;;  %3442 = vmatprep.subr.bf16.mxu1 %v1886_v15 }
 0x430   : > { %3430 = vmatprep.mubr.msk.bf16.mxu0 %vm683_vm0, %v1593_v53 }
 0x432   : > { %3443 = vmatpush3.bf16.msra.mxu1 %v1886_v15 }
 0x433   : > { %3444 = vmatprep.subr.bf16.mxu1 %v1888_v27 }
 0x436   : > { %3445 = vmatpush3.bf16.msra.mxu1 %v1888_v27 }
 0x437   : > { %3431 = vmatmul.mubr.msk.bf16.gmra.mrb[40].mxu0 %vm683_vm0, %v1595_v48  ;;  %3446 = vmatprep.subr.bf16.mxu1 %v1890_v2  ;;  %v1892_v48 = vpop.permute.xlu1 %1891 }
 0x438   : > { %3434 = vmatprep.mubr.msk.bf16.mxu0 %vm683_vm0, %v1597_v32  ;;  %v1894_v32 = vpop.permute.xlu0 %1893 }
 0x43a   : > { %3447 = vmatpush3.bf16.msra.mxu1 %v1890_v2 }
 0x43b   : > { %3448 = vmatprep.subr.bf16.mxu1 %v1892_v48  ;;  %v1896_v14 = vpop.permute.xlu1 %1895 }
 0x43e   : > { %3449 = vmatpush3.bf16.msra.mxu1 %v1892_v48 }
 0x43f   : > { %3435 = vmatmul.mubr.msk.bf16.gmra.mrb[44].mxu0 %vm683_vm0, %v1599_v23  ;;  %3450 = vmatprep.subr.bf16.mxu1 %v1894_v32 }
 0x442   : > { %3451 = vmatpush3.bf16.msra.mxu1 %v1894_v32 }
 0x443   : > { %3452 = vmatprep.subr.bf16.mxu1 %v1896_v14 }
 0x446   : > { %3453 = vmatpush3.bf16.msra.mxu1 %v1896_v14 }
 0x45f   : > { %v4780_v52 = vpop.permute.xlu0 %2050 }
 0x460   : > { %3558 = vmatprep.subr.msk.bf16.mxu1 %vm683_vm0, %v4780_v52 }
 0x4ab   : > { %v4756_v17 = vpop.f32.mrb[16].mxu0 }
 0x4ac   : > { %5448 = vst [vmem:[#allocation24_spill] sm:$0xff] %v4756_v17  ;;  %v4758_v62 = vpop.f32.mrb[17].mxu0 }
 0x4ad   : > { %5449 = vst [vmem:[#allocation25_spill] sm:$0xff] %v4758_v62  ;;  %v4760_v5 = vpop.f32.mrb[18].mxu0 }
 0x4ae   : > { %5450 = vst [vmem:[#allocation26_spill] sm:$0xff] %v4760_v5  ;;  %v4762_v10 = vpop.f32.mrb[19].mxu0 }
 0x4af   : > { %5451 = vst [vmem:[#allocation27_spill] sm:$0xff] %v4762_v10 }
 0x4b3   : > { %v4764_v28 = vpop.f32.mrb[20].mxu0 }
 0x4b4   : > { %5452 = vst [vmem:[#allocation28_spill] sm:$0xff] %v4764_v28  ;;  %v4766_v56 = vpop.f32.mrb[21].mxu0  ;;  %v4006_v28 = vld [vmem:[%s4204_s25 + $0x28] sm:$0xff]  }
 0x4b5   : > { %5453 = vst [vmem:[#allocation29_spill] sm:$0xff] %v4766_v56  ;;  %v4768_v59 = vpop.f32.mrb[22].mxu0  ;;  %v4008_v56 = vld [vmem:[%s4312_s27 + $0x8] sm:$0xff]  }
 0x4b6   : > { %5454 = vst [vmem:[#allocation30_spill] sm:$0xff] %v4768_v59  ;;  %v4770_v53 = vpop.f32.mrb[23].mxu0 }
 0x4b7   : > { %5455 = vst [vmem:[#allocation31_spill] sm:$0xff] %v4770_v53  ;;  %v4007_v53 = vld [vmem:[%s4204_s25 + $0x20] sm:$0xff]  }
 0x4c0   : > { %v4772_v23 = vpop.f32.mrb[24].mxu0 }
 0x4c1   : > { %5456 = vst [vmem:[#allocation32_spill] sm:$0xff] %v4772_v23  ;;  %v4774_v0 = vpop.f32.mrb[25].mxu0 }
 0x4c2   : > { %5457 = vst [vmem:[#allocation33_spill] sm:$0xff] %v4774_v0  ;;  %v4776_v31 = vpop.f32.mrb[26].mxu0 }
 0x4c3   : > { %5458 = vst [vmem:[#allocation34_spill] sm:$0xff] %v4776_v31  ;;  %v4778_v34 = vpop.f32.mrb[27].mxu0 }
 0x4c4   : > { %5459 = vst [vmem:[#allocation35_spill] sm:$0xff] %v4778_v34 }
 0x4f2   : > { %v4784_v43 = vpop.f32.mrb[28].mxu0 }
 0x4f3   : > { %5460 = vst [vmem:[#allocation36_spill] sm:$0xff] %v4784_v43  ;;  %v4786_v15 = vpop.f32.mrb[29].mxu0 }
 0x4f4   : > { %5461 = vst [vmem:[#allocation37_spill] sm:$0xff] %v4786_v15  ;;  %v4788_v27 = vpop.f32.mrb[30].mxu0 }
 0x4f5   : > { %5462 = vst [vmem:[#allocation38_spill] sm:$0xff] %v4788_v27  ;;  %v4790_v2 = vpop.f32.mrb[31].mxu0 }
 0x4f6   : > { %5463 = vst [vmem:[#allocation39_spill] sm:$0xff] %v4790_v2 }
 0x4fa   : > { %v4792_v48 = vpop.f32.mrb[32].mxu0 }
 0x4fb   : > { %1765 = vmax.xlane.f32.xlu0 %v4792_v48  ;;  %v4795_v32 = vpop.f32.mrb[33].mxu0 }
 0x4fc   : > { %v4797_v35 = vpop.f32.mrb[34].mxu0 }
 0x4fd   : > { %v4799_v14 = vpop.f32.mrb[35].mxu0 }
 0x4fe   : > { %1763 = vmax.xlane.f32.xlu1 %v4799_v14 }
 0x4ff   : > { %1761 = vmax.xlane.f32.xlu0 %v4795_v32 }
 0x502   : > { %v4803_v7 = vpop.f32.mrb[36].mxu0 }
 0x503   : > { %1767 = vmax.xlane.f32.xlu0 %v4797_v35  ;;  %1773 = vmax.xlane.f32.xlu1 %v4803_v7  ;;  %v4807_v20 = vpop.f32.mrb[37].mxu0 }
 0x504   : > { %v4809_v27 = vpop.f32.mrb[38].mxu0 }
 0x505   : > { %v4811_v43 = vpop.f32.mrb[39].mxu0 }
 0x507   : > { %1769 = vmax.xlane.f32.xlu1 %v4807_v20  ;;  %1771 = vmax.xlane.f32.xlu0 %v4811_v43 }
 0x50a   : > { %v4815_v49 = vpop.f32.mrb[40].mxu0 }
 0x50b   : > { %1775 = vmax.xlane.f32.xlu1 %v4809_v27  ;;  %1781 = vmax.xlane.f32.xlu0 %v4815_v49  ;;  %v4819_v2 = vpop.f32.mrb[41].mxu0 }
 0x50c   : > { %v4821_v15 = vpop.f32.mrb[42].mxu0 }
 0x50d   : > { %v4823_v31 = vpop.f32.mrb[43].mxu0 }
 0x50f   : > { %1777 = vmax.xlane.f32.xlu1 %v4819_v2 }
 0x512   : > { %v4826_v23 = vpop.f32.mrb[44].mxu0 }
 0x513   : > { %1783 = vmax.xlane.f32.xlu1 %v4821_v15  ;;  %v4829_v34 = vpop.f32.mrb[45].mxu0 }
 0x514   : > { %1785 = vmax.xlane.f32.xlu0 %v4829_v34  ;;  %v4832_v0 = vpop.f32.mrb[46].mxu0 }
 0x515   : > { %v4834_v59 = vpop.f32.mrb[47].mxu0 }
 0x517   : > { %1779 = vmax.xlane.f32.xlu1 %v4823_v31 }
 0x51b   : > { %1789 = vmax.xlane.f32.xlu1 %v4826_v23 }
 0x51f   : > { %1791 = vmax.xlane.f32.xlu1 %v4832_v0 }
 0x52a   : > { %2060 = vrot.lane.b32.xlu0 %v4006_v28, %s4060_s29  ;;  %v4009_v28 = vld [vmem:[%s4312_s27 + $0x20] sm:$0xff]  }
 0x530   : > { %2058 = vrot.lane.b32.xlu1 %v4007_v53, %s4060_s29  ;;  %v4014_v53 = vld [vmem:[%s4312_s27 + $0x18] sm:$0xff]  }
 0x534   : > { %2036 = vrot.lane.b32.xlu1 %v4280_v18, %s4060_s29  ;;  %v4010_v18 = vld [vmem:[%s4204_s25 + $0x30] sm:$0xff]  }
 0x538   : > { %2040 = vrot.lane.b32.xlu1 %v4290_v30, %s4060_s29  ;;  %v4011_v30 = vld [vmem:[%s4204_s25 + $0x38] sm:$0xff]  }
 0x53c   : > { %2044 = vrot.lane.b32.xlu1 %v4299_v41, %s4060_s29  ;;  %v4012_v41 = vld [vmem:[%s4312_s27] sm:$0xff]  }
 0x540   : > { %2048 = vrot.lane.b32.xlu1 %v4307_v47, %s4060_s29  ;;  %v4013_v47 = vld [vmem:[%s4312_s27 + $0x10] sm:$0xff]  }
 0x544   : > { %2333 = vrot.lane.b32.xlu1 %v4008_v56, %s4060_s29  ;;  %v4872_v56 = vpop.permute.xlu0 %2052 }
 0x548   : > { %2339 = vrot.lane.b32.xlu1 %v4009_v28, %s4060_s29 }
 0x549   : > { %1787 = vmax.xlane.f32.xlu0 %v4834_v59 }
 0x55f   : > { %2062 = vrot.lane.b32.xlu0 %v4010_v18, %s4060_s29 }
 0x563   : > { %2064 = vrot.lane.b32.xlu0 %v4011_v30, %s4060_s29 }
 0x567   : > { %2034 = vrot.lane.b32.xlu0 %v4235_v58, %s4060_s29  ;;  %v4015_v58 = vld [vmem:[%s4312_s27 + $0x28] sm:$0xff]  }
 0x56b   : > { %2038 = vrot.lane.b32.xlu0 %v4282_v21, %s4060_s29  ;;  %v4878_v21 = vpop.permute.xlu0 %2056 }
 0x56f   : > { %2042 = vrot.lane.b32.xlu0 %v4292_v33, %s4060_s29  ;;  %v4880_v33 = vpop.permute.xlu1 %2054 }
 0x573   : > { %2046 = vrot.lane.b32.xlu0 %v4301_v44, %s4060_s29 }
 0x577   : > { %2331 = vrot.lane.b32.xlu0 %v4012_v41, %s4060_s29 }
 0x57b   : > { %2335 = vrot.lane.b32.xlu0 %v4013_v47, %s4060_s29 }
 0x57f   : > { %2337 = vrot.lane.b32.xlu0 %v4014_v53, %s4060_s29 }
 0x583   : > { %2341 = vrot.lane.b32.xlu0 %v4015_v58, %s4060_s29 }
 0x588   : > { %v1766_v28 = vpop.xlane.xlu0 %1765 }
 0x589   : > { %v1795_v18 = vsub.f32 %v4792_v48, %v1766_v28 }
 0x58b   : > { %v1764_v44 = vpop.xlane.xlu1 %1763  ;;  %v1813_v5 = vmul.f32 1.442695, %v1795_v18 }
 0x58c   : > { %v1794_v30 = vsub.f32 %v4799_v14, %v1764_v44  ;;  %v1762_v41 = vpop.xlane.xlu0 %1761 }
 0x58d   : > { %v1793_v47 = vsub.f32 %v4795_v32, %v1762_v41 }
 0x58e   : > { %v1811_v11 = vmul.f32 1.442695, %v1794_v30 }
 0x58f   : > { %v1809_v40 = vmul.f32 1.442695, %v1793_v47 }
 0x590   : > { %3810 = vpow2.f32 %v1811_v11  ;;  %v1768_v53 = vpop.xlane.xlu0 %1767  ;;  %v1774_v17 = vpop.xlane.xlu1 %1773 }
 0x591   : > { %3812 = vpow2.f32 %v1809_v40  ;;  %v1796_v58 = vsub.f32 %v4797_v35, %v1768_v53  ;;  %v1799_v48 = vsub.f32 %v4803_v7, %v1774_v17  ;;  %v2091_v53 = vsel %vm683_vm0, %v4780_v52, 0 }
 0x592   : > { %3814 = vpow2.f32 %v1813_v5 }
 0x593   : > { %v1815_v29 = vmul.f32 1.442695, %v1796_v58  ;;  %v1821_v11 = vmul.f32 1.442695, %v1799_v48 }
 0x594   : > { %v1772_v10 = vpop.xlane.xlu0 %1771  ;;  %v1770_v62 = vpop.xlane.xlu1 %1769 }
 0x595   : > { %3816 = vpow2.f32 %v1815_v29  ;;  %v1798_v14 = vsub.f32 %v4811_v43, %v1772_v10  ;;  %v1797_v32 = vsub.f32 %v4807_v20, %v1770_v62 }
 0x597   : > { %v1819_v28 = vmul.f32 1.442695, %v1798_v14  ;;  %v1817_v44 = vmul.f32 1.442695, %v1797_v32 }
 0x598   : > { %v1776_v18 = vpop.xlane.xlu1 %1775  ;;  %v1782_v62 = vpop.xlane.xlu0 %1781 }
 0x599   : > { %3818 = vpow2.f32 %v1819_v28  ;;  %v1800_v40 = vsub.f32 %v4809_v27, %v1776_v18  ;;  %v1803_v47 = vsub.f32 %v4815_v49, %v1782_v62  ;;  %v2097_v62 = vsel %vm683_vm0, %v4880_v33, 0 }
 0x59a   : > { %v4890_v30 = vpop.eup %3810  ;;  %3820 = vpow2.f32 %v1817_v44 }
 0x59b   : > { %v4892_v35 = vpop.eup %3812  ;;  %v1823_v5 = vmul.f32 1.442695, %v1800_v40  ;;  %3822 = vpow2.f32 %v1821_v11 }
 0x59c   : > { %v1778_v29 = vpop.xlane.xlu1 %1777  ;;  %v1873_v7 = vpack.c.bf16 %v4890_v30, %v4892_v35  ;;  %v4896_v17 = vpop.eup %3814 }
 0x59d   : > { %3824 = vpow2.f32 %v1823_v5  ;;  %v1801_v10 = vsub.f32 %v4819_v2, %v1778_v29 }
 0x59e   : > { %3454 = vmatprep.mubr.bf16.mxu1 %v1873_v7 }
 0x59f   : > { %v4898_v20 = vpop.eup %3816  ;;  %v1825_v48 = vmul.f32 1.442695, %v1801_v10 }
 0x5a0   : > { %v1784_v43 = vpop.xlane.xlu1 %1783  ;;  %v1874_v27 = vpack.c.bf16 %v4898_v20, %v4896_v17 }
 0x5a1   : > { %v1804_v41 = vsub.f32 %v4821_v15, %v1784_v43  ;;  %v1829_v15 = vmul.f32 1.442695, %v1803_v47  ;;  %3826 = vpow2.f32 %v1825_v48  ;;  %v2100_v47 = vsel %vm683_vm0, %v4878_v21, 0 }
 0x5a2   : > { %3455 = vmatmul.mubr.bf16.vlgmr.msra.gmra.mrb[32].mxu1 %v1874_v27 }
 0x5a3   : > { %v4907_v58 = vpop.eup %3818  ;;  %3471 = vmatpush3.bf16.xpose.msra.mxu1 %v2091_v53  ;;  %v1831_v32 = vmul.f32 1.442695, %v1804_v41 }
 0x5a4   : > { %v4909_v14 = vpop.eup %3820  ;;  %3559 = vmatprep.subr.msk.bf16.mxu1 %vm683_vm0, %v4872_v56  ;;  %v1780_v2 = vpop.xlane.xlu1 %1779 }
 0x5a5   : > { %v1802_v28 = vsub.f32 %v4823_v31, %v1780_v2  ;;  %v1875_v49 = vpack.c.bf16 %v4907_v58, %v4909_v14  ;;  %v4916_v44 = vpop.eup %3822  ;;  %3828 = vpow2.f32 %v1831_v32  ;;  %v2094_v31 = vsel %vm683_vm0, %v4872_v56, 0 }
 0x5a7   : > { %v1827_v52 = vmul.f32 1.442695, %v1802_v28  ;;  %3458 = vmatprep.mubr.bf16.mxu1 %v1875_v49  ;;  %v4918_v18 = vpop.eup %3824 }
 0x5a8   : > { %v1876_v11 = vpack.c.bf16 %v4918_v18, %v4916_v44  ;;  %v1790_v40 = vpop.xlane.xlu1 %1789 }
 0x5a9   : > { %3830 = vpow2.f32 %v1827_v52  ;;  %v1807_v49 = vsub.f32 %v4826_v23, %v1790_v40 }
 0x5aa   : > { %3832 = vpow2.f32 %v1829_v15  ;;  %3459 = vmatmul.mubr.bf16.gmra.mrb[36].mxu1 %v1876_v11 }
 0x5ab   : > { %3473 = vmatpush3.bf16.xpose.msra.mxu1 %v2094_v31  ;;  %v4926_v5 = vpop.eup %3826  ;;  %v1837_v31 = vmul.f32 1.442695, %v1807_v49 }
 0x5ac   : > { %3560 = vmatprep.subr.msk.bf16.mxu1 %vm683_vm0, %v4880_v33  ;;  %v1792_v27 = vpop.xlane.xlu1 %1791  ;;  %v1786_v33 = vpop.xlane.xlu0 %1785 }
 0x5ad   : > { %v1805_v2 = vsub.f32 %v4829_v34, %v1786_v33  ;;  %v1808_v28 = vsub.f32 %v4832_v0, %v1792_v27 }
 0x5af   : > { %v4928_v29 = vpop.eup %3828  ;;  %v1839_v15 = vmul.f32 1.442695, %v1808_v28 }
 0x5b0   : > { %v2059_v41 = vpop.permute.xlu1 %2058  ;;  %v2061_v48 = vpop.permute.xlu0 %2060 }
 0x5b1   : > { %v2103_v53 = vsel %vm683_vm0, %v2059_v41, 0  ;;  %v2106_v32 = vsel %vm683_vm0, %v2061_v48, 0 }
 0x5b3   : > { %v4930_v7 = vpop.eup %3830  ;;  %3475 = vmatpush3.bf16.xpose.msra.mxu1 %v2097_v62 }
 0x5b4   : > { %v4934_v10 = vpop.eup %3832  ;;  %v1877_v56 = vpack.c.bf16 %v4930_v7, %v4926_v5  ;;  %3561 = vmatprep.subr.msk.bf16.mxu1 %vm683_vm0, %v4878_v21  ;;  %v1833_v21 = vmul.f32 1.442695, %v1805_v2 }
 0x5b5   : > { %v1878_v43 = vpack.c.bf16 %v4928_v29, %v4934_v10 }
 0x5b6   : > { %3462 = vmatprep.mubr.bf16.mxu1 %v1877_v56  ;;  %3834 = vpow2.f32 %v1833_v21 }
 0x5b7   : > { %3463 = vmatmul.mubr.bf16.gmra.mrb[40].mxu1 %v1878_v43  ;;  %3836 = vpow2.f32 %v1839_v15 }
 0x5bb   : > { %3477 = vmatpush3.bf16.xpose.msra.mxu1 %v2100_v47 }
 0x5bc   : > { %3562 = vmatprep.subr.msk.bf16.mxu1 %vm683_vm0, %v2059_v41 }
 0x5c0   : > { %v4956_v34 = vpop.eup %3834 }
 0x5c3   : > { %3479 = vmatpush3.bf16.xpose.msra.mxu1 %v2103_v53  ;;  %v2037_v53 = vpop.permute.xlu1 %2036 }
 0x5c4   : > { %3563 = vmatprep.subr.msk.bf16.mxu1 %vm683_vm0, %v2061_v48 }
 0x5cb   : > { %3481 = vmatpush3.bf16.xpose.msra.mxu1 %v2106_v32  ;;  %v2041_v32 = vpop.permute.xlu1 %2040 }
 0x5cf   : > { %v2045_v28 = vpop.permute.xlu1 %2044 }
 0x5d3   : > { %v2049_v21 = vpop.permute.xlu1 %2048 }
 0x5d6   : > { %v1788_v52 = vpop.xlane.xlu0 %1787 }
 0x5d7   : > { %v1806_v11 = vsub.f32 %v4834_v59, %v1788_v52  ;;  %v4958_v59 = vpop.eup %3836 }
 0x5d9   : > { %v1835_v62 = vmul.f32 1.442695, %v1806_v11 }
 0x5da   : > { %v2063_v56 = vpop.permute.xlu0 %2062 }
 0x5db   : > { %3838 = vpow2.f32 %v1835_v62  ;;  %3564 = vmatprep.subr.msk.bf16.mxu1 %vm683_vm0, %v2063_v56  ;;  %v2109_v43 = vsel %vm683_vm0, %v2063_v56, 0  ;;  %v2334_v56 = vpop.permute.xlu1 %2333 }
 0x5dc   : > { %3840 = vpow2.f32 %v1837_v31  ;;  %3483 = vmatpush3.bf16.xpose.msra.mxu1 %v2109_v43 }
 0x5de   : > { %v2065_v0 = vpop.permute.xlu0 %2064 }
 0x5df   : > { %3565 = vmatprep.subr.msk.bf16.mxu1 %vm683_vm0, %v2065_v0  ;;  %v2112_v23 = vsel %vm683_vm0, %v2065_v0, 0 }
 0x5e2   : > { %v2035_v33 = vpop.permute.xlu0 %2034 }
 0x5e4   : > { %3485 = vmatpush3.bf16.xpose.msra.mxu1 %v2112_v23 }
 0x5e5   : > { %v4960_v40 = vpop.eup %3838 }
 0x5e6   : > { %v4962_v27 = vpop.eup %3840  ;;  %v1879_v41 = vpack.c.bf16 %v4960_v40, %v4956_v34  ;;  %v2039_v48 = vpop.permute.xlu0 %2038 }
 0x5e7   : > { %v1880_v47 = vpack.c.bf16 %v4958_v59, %v4962_v27 }
 0x5e8   : > { %3466 = vmatprep.mubr.bf16.mxu1 %v1879_v41 }
 0x5e9   : > { %3467 = vmatmul.mubr.bf16.gmra.mrb[44].mxu1 %v1880_v47 }
 0x5ea   : > { %3486 = vmatprep.mubr.msk.bf16.mxu1 %vm683_vm0, %v2035_v33  ;;  %v2043_v2 = vpop.permute.xlu0 %2042 }
 0x5ee   : > { %v2047_v49 = vpop.permute.xlu0 %2046 }
 0x5f1   : > { %3487 = vmatmul.mubr.msk.bf16.vlgmr.msra.gmra.mrb[48].mxu1 %vm683_vm0, %v2037_v53  ;;  %v2340_v53 = vpop.permute.xlu1 %2339 }
 0x5f2   : > { %3490 = vmatprep.mubr.msk.bf16.mxu1 %vm683_vm0, %v2039_v48  ;;  %v2332_v62 = vpop.permute.xlu0 %2331 }
 0x5f3   : > { %3502 = vmatprep.subr.bf16.mxu0 %v2332_v62 }
 0x5f4   : > { %3503 = vmatpush3.bf16.msra.mxu0 %v2332_v62 }
 0x5f5   : > { %3504 = vmatprep.subr.bf16.mxu0 %v2334_v56 }
 0x5f6   : > { %v2336_v43 = vpop.permute.xlu0 %2335 }
 0x5f8   : > { %3505 = vmatpush3.bf16.msra.mxu0 %v2334_v56 }
 0x5f9   : > { %3491 = vmatmul.mubr.msk.bf16.gmra.mrb[52].mxu1 %vm683_vm0, %v2041_v32  ;;  %3506 = vmatprep.subr.bf16.mxu0 %v2336_v43 }
 0x5fa   : > { %3494 = vmatprep.mubr.msk.bf16.mxu1 %vm683_vm0, %v2043_v2  ;;  %v2338_v33 = vpop.permute.xlu0 %2337 }
 0x5fc   : > { %3507 = vmatpush3.bf16.msra.mxu0 %v2336_v43 }
 0x5fd   : > { %3508 = vmatprep.subr.bf16.mxu0 %v2338_v33 }
 0x600   : > { %3509 = vmatpush3.bf16.msra.mxu0 %v2338_v33 }
 0x601   : > { %3495 = vmatmul.mubr.msk.bf16.gmra.mrb[56].mxu1 %vm683_vm0, %v2045_v28  ;;  %3510 = vmatprep.subr.bf16.mxu0 %v2340_v53 }
 0x602   : > { %3498 = vmatprep.mubr.msk.bf16.mxu1 %vm683_vm0, %v2047_v49 }
 0x604   : > { %3511 = vmatpush3.bf16.msra.mxu0 %v2340_v53 }
 0x609   : > { %3499 = vmatmul.mubr.msk.bf16.gmra.mrb[60].mxu1 %vm683_vm0, %v2049_v21 }
 0x675   : > { %v4976_v15 = vpop.f32.mrb[32].mxu1 }
 0x676   : > { %5464 = vst [vmem:[#allocation40_spill] sm:$0xff] %v4976_v15  ;;  %v4978_v52 = vpop.f32.mrb[33].mxu1  ;;  %v4016_v15 = vld [vmem:[%s4312_s27 + $0x30] sm:$0xff]  }
 0x677   : > { %v4980_v11 = vpop.f32.mrb[34].mxu1 }
 0x678   : > { %5465 = vst [vmem:[#allocation41_spill] sm:$0xff] %v4980_v11  ;;  %v4982_v31 = vpop.f32.mrb[35].mxu1 }
 0x679   : > { %5466 = vst [vmem:[#allocation42_spill] sm:$0xff] %v4982_v31  ;;  %v4017_v31 = vld [vmem:[%s4312_s27 + $0x38] sm:$0xff]  }
 0x67d   : > { %v4984_v0 = vpop.f32.mrb[36].mxu1 }
 0x67e   : > { %5467 = vst [vmem:[#allocation43_spill] sm:$0xff] %v4984_v0  ;;  %v4986_v23 = vpop.f32.mrb[37].mxu1 }
 0x67f   : > { %5468 = vst [vmem:[#allocation44_spill] sm:$0xff] %v4986_v23  ;;  %v4988_v41 = vpop.f32.mrb[38].mxu1 }
 0x680   : > { %5469 = vst [vmem:[#allocation45_spill] sm:$0xff] %v4988_v41  ;;  %v4990_v47 = vpop.f32.mrb[39].mxu1 }
 0x681   : > { %5470 = vst [vmem:[#allocation46_spill] sm:$0xff] %v4990_v47 }
 0x68a   : > { %v4992_v48 = vpop.f32.mrb[40].mxu1 }
 0x68b   : > { %5471 = vst [vmem:[#allocation47_spill] sm:$0xff] %v4992_v48  ;;  %v4994_v32 = vpop.f32.mrb[41].mxu1 }
 0x68c   : > { %5472 = vst [vmem:[#allocation48_spill] sm:$0xff] %v4994_v32  ;;  %v4996_v2 = vpop.f32.mrb[42].mxu1 }
 0x68d   : > { %5473 = vst [vmem:[#allocation49_spill] sm:$0xff] %v4996_v2  ;;  %v4998_v28 = vpop.f32.mrb[43].mxu1  ;;  %v2342_v2 = vpop.permute.xlu0 %2341 }
 0x68e   : > { %5474 = vst [vmem:[#allocation50_spill] sm:$0xff] %v4998_v28  ;;  %3512 = vmatprep.subr.bf16.mxu0 %v2342_v2 }
 0x68f   : > { %3513 = vmatpush3.bf16.msra.mxu0 %v2342_v2 }
 0x6bc   : > { %v5000_v49 = vpop.f32.mrb[44].mxu1 }
 0x6bd   : > { %5475 = vst [vmem:[#allocation51_spill] sm:$0xff] %v5000_v49  ;;  %v5002_v21 = vpop.f32.mrb[45].mxu1 }
 0x6be   : > { %5476 = vst [vmem:[#allocation52_spill] sm:$0xff] %v5002_v21  ;;  %v5004_v62 = vpop.f32.mrb[46].mxu1 }
 0x6bf   : > { %5477 = vst [vmem:[#allocation53_spill] sm:$0xff] %v5004_v62  ;;  %v5006_v56 = vpop.f32.mrb[47].mxu1 }
 0x6c0   : > { %5478 = vst [vmem:[#allocation54_spill] sm:$0xff] %v5006_v56 }
 0x6c4   : > { %v5008_v43 = vpop.f32.mrb[48].mxu1 }
 0x6c5   : > { %2215 = vmax.xlane.f32.xlu1 %v5008_v43  ;;  %v5011_v33 = vpop.f32.mrb[49].mxu1 }
 0x6c6   : > { %2211 = vmax.xlane.f32.xlu0 %v5011_v33  ;;  %v5014_v53 = vpop.f32.mrb[50].mxu1 }
 0x6c7   : > { %v5016_v48 = vpop.f32.mrb[51].mxu1 }
 0x6c9   : > { %2217 = vmax.xlane.f32.xlu1 %v5014_v53 }
 0x6cc   : > { %v5019_v62 = vpop.f32.mrb[52].mxu1 }
 0x6cd   : > { %2213 = vmax.xlane.f32.xlu1 %v5016_v48  ;;  %v5022_v49 = vpop.f32.mrb[53].mxu1 }
 0x6ce   : > { %2219 = vmax.xlane.f32.xlu0 %v5022_v49  ;;  %v5025_v56 = vpop.f32.mrb[54].mxu1 }
 0x6cf   : > { %v5027_v21 = vpop.f32.mrb[55].mxu1 }
 0x6d1   : > { %2223 = vmax.xlane.f32.xlu1 %v5019_v62 }
 0x6d4   : > { %v5030_v28 = vpop.f32.mrb[56].mxu1 }
 0x6d5   : > { %2225 = vmax.xlane.f32.xlu1 %v5025_v56  ;;  %v5033_v2 = vpop.f32.mrb[57].mxu1 }
 0x6d6   : > { %v5035_v32 = vpop.f32.mrb[58].mxu1 }
 0x6d7   : > { %2233 = vmax.xlane.f32.xlu0 %v5035_v32  ;;  %v5038_v41 = vpop.f32.mrb[59].mxu1 }
 0x6d9   : > { %2221 = vmax.xlane.f32.xlu1 %v5027_v21 }
 0x6db   : > { %2229 = vmax.xlane.f32.xlu0 %v5038_v41 }
 0x6dc   : > { %v5042_v0 = vpop.f32.mrb[60].mxu1 }
 0x6dd   : > { %2231 = vmax.xlane.f32.xlu1 %v5030_v28  ;;  %v5045_v47 = vpop.f32.mrb[61].mxu1 }
 0x6de   : > { %v5047_v23 = vpop.f32.mrb[62].mxu1 }
 0x6df   : > { %2241 = vmax.xlane.f32.xlu0 %v5047_v23  ;;  %v5050_v11 = vpop.f32.mrb[63].mxu1 }
 0x6e1   : > { %2227 = vmax.xlane.f32.xlu1 %v5033_v2 }
 0x6e3   : > { %2237 = vmax.xlane.f32.xlu0 %v5050_v11 }
 0x6f2   : > { %2343 = vrot.lane.b32.xlu1 %v4016_v15, %s4060_s29 }
 0x6f9   : > { %2345 = vrot.lane.b32.xlu0 %v4017_v31, %s4060_s29 }
 0x716   : > { %2235 = vmax.xlane.f32.xlu1 %v5045_v47 }
 0x718   : > { %1393 = vadd.xlane.f32.xlu0 %v4662_v55 }
 0x71a   : > { %2239 = vmax.xlane.f32.xlu1 %v5042_v0 }
 0x71c   : > { %1411 = vadd.xlane.f32.xlu0 %v4706_v45 }
 0x71e   : > { %1391 = vadd.xlane.f32.xlu1 %v4664_v13 }
 0x720   : > { %1415 = vadd.xlane.f32.xlu0 %v4728_v12 }
 0x722   : > { %1395 = vadd.xlane.f32.xlu1 %v4668_v24 }
 0x724   : > { %1419 = vadd.xlane.f32.xlu0 %v4734_v26 }
 0x726   : > { %1397 = vadd.xlane.f32.xlu1 %v4670_v60 }
 0x728   : > { %1841 = vadd.xlane.f32.xlu0 %v4892_v35 }
 0x72a   : > { %1399 = vadd.xlane.f32.xlu1 %v4681_v57 }
 0x72c   : > { %1845 = vadd.xlane.f32.xlu0 %v4896_v17 }
 0x72e   : > { %1401 = vadd.xlane.f32.xlu1 %v4679_v50 }
 0x730   : > { %1849 = vadd.xlane.f32.xlu0 %v4909_v14 }
 0x732   : > { %1403 = vadd.xlane.f32.xlu1 %v4688_v25 }
 0x734   : > { %1853 = vadd.xlane.f32.xlu0 %v4916_v44 }
 0x736   : > { %1405 = vadd.xlane.f32.xlu1 %v4690_v4 }
 0x738   : > { %1857 = vadd.xlane.f32.xlu0 %v4926_v5 }
 0x73a   : > { %1407 = vadd.xlane.f32.xlu1 %v4698_v9 }
 0x73c   : > { %1861 = vadd.xlane.f32.xlu0 %v4934_v10 }
 0x73e   : > { %1409 = vadd.xlane.f32.xlu1 %v4702_v6 }
 0x740   : > { %1865 = vadd.xlane.f32.xlu0 %v4956_v34 }
 0x742   : > { %1413 = vadd.xlane.f32.xlu1 %v4700_v51 }
 0x744   : > { %1869 = vadd.xlane.f32.xlu0 %v4962_v27 }
 0x746   : > { %1417 = vadd.xlane.f32.xlu1 %v4732_v54 }
 0x748   : > { %909 = vadd.xlane.f32.xlu0 %v4440_v36 }
 0x74a   : > { %1421 = vadd.xlane.f32.xlu1 %v4730_v22 }
 0x74c   : > { %913 = vadd.xlane.f32.xlu0 %v4446_v39 }
 0x74e   : > { %1843 = vadd.xlane.f32.xlu1 %v4890_v30 }
 0x750   : > { %917 = vadd.xlane.f32.xlu0 %v4470_v46 }
 0x752   : > { %1847 = vadd.xlane.f32.xlu1 %v4898_v20  ;;  %v2216_v55 = vpop.xlane.xlu1 %2215 }
 0x753   : > { %v2245_v13 = vsub.f32 %v5008_v43, %v2216_v55  ;;  %v2212_v24 = vpop.xlane.xlu0 %2211 }
 0x754   : > { %v2243_v60 = vsub.f32 %v5011_v33, %v2212_v24  ;;  %921 = vadd.xlane.f32.xlu0 %v4472_v63 }
 0x755   : > { %v2263_v50 = vmul.f32 1.442695, %v2245_v13 }
 0x756   : > { %v2259_v36 = vmul.f32 1.442695, %v2243_v60  ;;  %1851 = vadd.xlane.f32.xlu1 %v4907_v58  ;;  %v2218_v57 = vpop.xlane.xlu1 %2217 }
 0x757   : > { %3842 = vpow2.f32 %v2263_v50  ;;  %v2246_v39 = vsub.f32 %v5014_v53, %v2218_v57 }
 0x758   : > { %925 = vadd.xlane.f32.xlu0 %v4476_v3  ;;  %3844 = vpow2.f32 %v2259_v36 }
 0x759   : > { %v2265_v46 = vmul.f32 1.442695, %v2246_v39 }
 0x75a   : > { %1855 = vadd.xlane.f32.xlu1 %v4918_v18  ;;  %v2214_v25 = vpop.xlane.xlu1 %2213 }
 0x75b   : > { %3846 = vpow2.f32 %v2265_v46  ;;  %v2244_v4 = vsub.f32 %v5016_v48, %v2214_v25  ;;  %v2220_v9 = vpop.xlane.xlu0 %2219 }
 0x75c   : > { %v2247_v51 = vsub.f32 %v5022_v49, %v2220_v9 }
 0x75d   : > { %v2261_v63 = vmul.f32 1.442695, %v2244_v4 }
 0x75e   : > { %1859 = vadd.xlane.f32.xlu1 %v4930_v7  ;;  %v2224_v6 = vpop.xlane.xlu1 %2223  ;;  %v2267_v22 = vmul.f32 1.442695, %v2247_v51 }
 0x75f   : > { %3848 = vpow2.f32 %v2261_v63  ;;  %v2249_v45 = vsub.f32 %v5019_v62, %v2224_v6 }
 0x761   : > { %v5100_v12 = vpop.eup %3842  ;;  %v2271_v3 = vmul.f32 1.442695, %v2249_v45 }
 0x762   : > { %1863 = vadd.xlane.f32.xlu1 %v4928_v29  ;;  %2295 = vadd.xlane.f32.xlu0 %v5100_v12  ;;  %v2226_v54 = vpop.xlane.xlu1 %2225  ;;  %v3845_v30 = vpop.eup %3844 }
 0x763   : > { %3850 = vpow2.f32 %v2271_v3  ;;  %v2250_v26 = vsub.f32 %v5025_v56, %v2226_v54 }
 0x764   : > { %v2234_v35 = vpop.xlane.xlu0 %2233  ;;  %3852 = vpow2.f32 %v2267_v22 }
 0x765   : > { %v3847_v17 = vpop.eup %3846  ;;  %v2273_v20 = vmul.f32 1.442695, %v2250_v26  ;;  %v2254_v58 = vsub.f32 %v5035_v32, %v2234_v35  ;;  %v5479_v35 = vld [vmem:[#allocation25_spill] sm:$0xff] }
 0x766   : > { %1867 = vadd.xlane.f32.xlu1 %v4960_v40  ;;  %2291 = vadd.xlane.f32.xlu0 %v3845_v30  ;;  %v2222_v14 = vpop.xlane.xlu1 %2221  ;;  %v2324_v44 = vpack.c.bf16 %v3847_v17, %v5100_v12 }
 0x767   : > { %3854 = vpow2.f32 %v2273_v20  ;;  %v2248_v18 = vsub.f32 %v5027_v21, %v2222_v14  ;;  %v2281_v10 = vmul.f32 1.442695, %v2254_v58  ;;  %v5480_v20 = vld [vmem:[#allocation27_spill] sm:$0xff] }
 0x768   : > { %v2230_v5 = vpop.xlane.xlu0 %2229 }
 0x769   : > { %v3849_v29 = vpop.eup %3848  ;;  %v2269_v7 = vmul.f32 1.442695, %v2248_v18  ;;  %v2252_v34 = vsub.f32 %v5038_v41, %v2230_v5 }
 0x76a   : > { %1871 = vadd.xlane.f32.xlu1 %v4958_v59  ;;  %v2232_v27 = vpop.xlane.xlu1 %2231  ;;  %v2323_v15 = vpack.c.bf16 %v3849_v29, %v3845_v30 }
 0x76b   : > { %3856 = vpow2.f32 %v2269_v7  ;;  %v2253_v40 = vsub.f32 %v5030_v28, %v2232_v27  ;;  %v2277_v49 = vmul.f32 1.442695, %v2252_v34  ;;  %v5482_v27 = vld [vmem:[#allocation24_spill] sm:$0xff] }
 0x76c   : > { %v2242_v31 = vpop.xlane.xlu0 %2241  ;;  %3518 = vmatprep.mubr.bf16.mxu0 %v2323_v15  ;;  %3858 = vpow2.f32 %v2281_v10  ;;  %v5481_v10 = vld [vmem:[#allocation5_spill] sm:$0xff] }
 0x76d   : > { %v3851_v48 = vpop.eup %3850  ;;  %v2279_v32 = vmul.f32 1.442695, %v2253_v40  ;;  %v5483_v40 = vld [vmem:[#allocation26_spill] sm:$0xff] }
 0x76e   : > { %911 = vadd.xlane.f32.xlu1 %v4444_v38  ;;  %2303 = vadd.xlane.f32.xlu0 %v3851_v48  ;;  %v2228_v21 = vpop.xlane.xlu1 %2227  ;;  %v3853_v62 = vpop.eup %3852 }
 0x76f   : > { %3860 = vpow2.f32 %v2279_v32  ;;  %v2251_v41 = vsub.f32 %v5033_v2, %v2228_v21 }
 0x770   : > { %v2238_v59 = vpop.xlane.xlu0 %2237  ;;  %3862 = vpow2.f32 %v2277_v49  ;;  %v5484_v49 = vld [vmem:[#allocation6_spill] sm:$0xff] }
 0x771   : > { %v3855_v56 = vpop.eup %3854  ;;  %v2275_v43 = vmul.f32 1.442695, %v2251_v41  ;;  %v2256_v36 = vsub.f32 %v5050_v11, %v2238_v59 }
 0x772   : > { %915 = vadd.xlane.f32.xlu1 %v4442_v37  ;;  %2299 = vadd.xlane.f32.xlu0 %v3853_v62  ;;  %v2344_v28 = vpop.permute.xlu1 %2343  ;;  %v2326_v33 = vpack.c.bf16 %v3855_v56, %v3851_v48 }
 0x773   : > { %3864 = vpow2.f32 %v2275_v43  ;;  %3514 = vmatprep.subr.bf16.mxu0 %v2344_v28  ;;  %v2285_v57 = vmul.f32 1.442695, %v2256_v36  ;;  %v5489_v36 = vld [vmem:[#allocation30_spill] sm:$0xff] }
 0x774   : > { %3515 = vmatpush3.bf16.msra.mxu0 %v2344_v28  ;;  %v2346_v53 = vpop.permute.xlu0 %2345  ;;  %v5486_v28 = vld [vmem:[#allocation29_spill] sm:$0xff] }
 0x775   : > { %v3857_v38 = vpop.eup %3856  ;;  %3516 = vmatprep.subr.bf16.mxu0 %v2346_v53 }
 0x776   : > { %919 = vadd.xlane.f32.xlu1 %v4478_v61  ;;  %v2325_v55 = vpack.c.bf16 %v3857_v38, %v3853_v62  ;;  %v3859_v2 = vpop.eup %3858  ;;  %v2258_v61 = vsub.f32 %v5047_v23, %v2242_v31 }
 0x778   : > { %3517 = vmatpush3.bf16.msra.mxu0 %v2346_v53  ;;  %v5487_v53 = vld [vmem:[#allocation31_spill] sm:$0xff] }
 0x779   : > { %v3861_v13 = vpop.eup %3860 }
 0x77a   : > { %923 = vadd.xlane.f32.xlu1 %v4474_v1  ;;  %2311 = vadd.xlane.f32.xlu0 %v3861_v13  ;;  %v2328_v24 = vpack.c.bf16 %v3859_v2, %v3861_v13  ;;  %v3863_v37 = vpop.eup %3862  ;;  %v2289_v1 = vmul.f32 1.442695, %v2258_v61  ;;  %v5488_v61 = vld [vmem:[#allocation28_spill] sm:$0xff] }
 0x77b   : > { %3519 = vmatmul.mubr.bf16.vlgmr.msra.gmra.mrb[48].mxu0 %v2324_v44 }
 0x77c   : > { %3522 = vmatprep.mubr.bf16.mxu0 %v2325_v55  ;;  %3866 = vpow2.f32 %v2289_v1 }
 0x77d   : > { %v3865_v60 = vpop.eup %3864  ;;  %3868 = vpow2.f32 %v2285_v57 }
 0x77e   : > { %927 = vadd.xlane.f32.xlu1 %v4481_v19  ;;  %2307 = vadd.xlane.f32.xlu0 %v3865_v60  ;;  %v2327_v50 = vpack.c.bf16 %v3863_v37, %v3865_v60 }
 0x782   : > { %2297 = vadd.xlane.f32.xlu1 %v3847_v17 }
 0x783   : > { %3523 = vmatmul.mubr.bf16.gmra.mrb[52].mxu0 %v2326_v33 }
 0x784   : > { %3526 = vmatprep.mubr.bf16.mxu0 %v2327_v50 }
 0x786   : > { %2293 = vadd.xlane.f32.xlu1 %v3849_v29  ;;  %v3867_v19 = vpop.eup %3866 }
 0x787   : > { %v3869_v39 = vpop.eup %3868 }
 0x78a   : > { %2305 = vadd.xlane.f32.xlu1 %v3855_v56  ;;  %v5485_v56 = vld [vmem:[#allocation7_spill] sm:$0xff] }
 0x78b   : > { %3527 = vmatmul.mubr.bf16.gmra.mrb[56].mxu0 %v2328_v24 }
 0x78e   : > { %2301 = vadd.xlane.f32.xlu1 %v3857_v38 }
 0x792   : > { %2313 = vadd.xlane.f32.xlu1 %v3859_v2 }
 0x796   : > { %2309 = vadd.xlane.f32.xlu1 %v3863_v37 }
 0x79a   : > { %931 = vadd.xlane.f32.xlu1 %v4494_v16 }
 0x79e   : > { %2321 = vadd.xlane.f32.xlu1 %v3867_v19 }
 0x7a2   : > { %2317 = vadd.xlane.f32.xlu1 %v3869_v39 }
 0x7a3   : > { %v2236_v46 = vpop.xlane.xlu1 %2235 }
 0x7a4   : > { %v2255_v25 = vsub.f32 %v5045_v47, %v2236_v46 }
 0x7a5   : > { %v1394_v23 = vpop.xlane.xlu0 %1393 }
 0x7a6   : > { %v2283_v4 = vmul.f32 1.442695, %v2255_v25  ;;  %935 = vadd.xlane.f32.xlu1 %v4506_v8 }
 0x7a7   : > { %v2240_v9 = vpop.xlane.xlu1 %2239 }
 0x7a8   : > { %3870 = vpow2.f32 %v2283_v4  ;;  %v2257_v11 = vsub.f32 %v5042_v0, %v2240_v9 }
 0x7a9   : > { %v1412_v63 = vpop.xlane.xlu0 %1411  ;;  %3872 = vrcp.f32 %v1394_v23 }
 0x7aa   : > { %v2287_v51 = vmul.f32 1.442695, %v2257_v11  ;;  %939 = vadd.xlane.f32.xlu1 %v4504_v42  ;;  %v5490_v11 = vld [vmem:[#allocation33_spill] sm:$0xff] }
 0x7ab   : > { %v1392_v16 = vpop.xlane.xlu1 %1391 }
 0x7ac   : > { %3874 = vpow2.f32 %v2287_v51  ;;  %v5491_v51 = vld [vmem:[#allocation35_spill] sm:$0xff] }
 0x7ad   : > { %3876 = vrcp.f32 %v1392_v16  ;;  %v1416_v6 = vpop.xlane.xlu0 %1415 }
 0x7af   : > { %v1396_v45 = vpop.xlane.xlu1 %1395 }
 0x7b0   : > { %3878 = vrcp.f32 %v1396_v45 }
 0x7b1   : > { %v5125_v12 = vpop.xlane.xlu0 %1419 }
 0x7b2   : > { %v3871_v47 = vpop.eup %3870 }
 0x7b3   : > { %v1398_v3 = vpop.xlane.xlu1 %1397  ;;  %v2329_v8 = vpack.c.bf16 %v3869_v39, %v3871_v47  ;;  %v3873_v22 = vpop.eup %3872 }
 0x7b4   : > { %3880 = vrcp.f32 %v1398_v3  ;;  %v5133_v58 = vmul.f32 %v3873_v22, %v5480_v20 }
 0x7b5   : > { %v5127_v54 = vpop.xlane.xlu0 %1841  ;;  %3530 = vmatprep.mubr.bf16.mxu0 %v2329_v8 }
 0x7b6   : > { %v3875_v0 = vpop.eup %3874 }
 0x7b7   : > { %v3877_v26 = vpop.eup %3876  ;;  %2319 = vadd.xlane.f32.xlu0 %v3875_v0  ;;  %v1400_v42 = vpop.xlane.xlu1 %1399  ;;  %v2330_v30 = vpack.c.bf16 %v3867_v19, %v3875_v0  ;;  %v5493_v0 = vld [vmem:[#allocation34_spill] sm:$0xff] }
 0x7b8   : > { %v5130_v17 = vmul.f32 %v3877_v26, %v5479_v35  ;;  %3882 = vrcp.f32 %v1400_v42 }
 0x7b9   : > { %v5135_v14 = vpop.xlane.xlu0 %1845  ;;  %3531 = vmatmul.mubr.bf16.gmra.mrb[60].mxu0 %v2330_v30 }
 0x7ba   : > { %v3610_v44 = vpack.i.bf16 %v5133_v58, %v5130_v17  ;;  %v3879_v5 = vpop.eup %3878 }
 0x7bb   : > { %2315 = vadd.xlane.f32.xlu0 %v3871_v47  ;;  %v1402_v18 = vpop.xlane.xlu1 %1401  ;;  %v1570_v15 = vmul.f32 %v3879_v5, %v5482_v27  ;;  %v5494_v5 = vld [vmem:[#allocation37_spill] sm:$0xff] }
 0x7bc   : > { %3884 = vrcp.f32 %v1402_v18 }
 0x7bd   : > { %v5139_v29 = vpop.xlane.xlu0 %1849 }
 0x7be   : > { %v3881_v7 = vpop.eup %3880 }
 0x7bf   : > { %929 = vadd.xlane.f32.xlu0 %v5481_v10  ;;  %v1404_v34 = vpop.xlane.xlu1 %1403  ;;  %v1571_v31 = vmul.f32 %v3881_v7, %v5483_v40  ;;  %v5495_v10 = vld [vmem:[#allocation39_spill] sm:$0xff]  ;;  %v5496_v40 = vld [vmem:[#allocation9_spill] sm:$0xff] }
 0x7c0   : > { %3886 = vrcp.f32 %v1404_v34 }
 0x7c1   : > { %v5144_v48 = vpop.xlane.xlu0 %1853  ;;  %v3615_v32 = vpack.i.bf16 %v1571_v31, %v1570_v15 }
 0x7c2   : > { %v3883_v41 = vpop.eup %3882 }
 0x7c3   : > { %933 = vadd.xlane.f32.xlu0 %v5484_v49  ;;  %3616 = vrot.lane.b32.xlu1 %v3615_v32, %s4060_s29  ;;  %v1406_v21 = vpop.xlane.xlu1 %1405  ;;  %v1572_v33 = vmul.f32 %v3883_v41, %v5486_v28  ;;  %v5497_v32 = vld [vmem:[#allocation36_spill] sm:$0xff] }
 0x7c4   : > { %3888 = vrcp.f32 %v1406_v21  ;;  %v5498_v21 = vld [vmem:[#allocation38_spill] sm:$0xff] }
 0x7c5   : > { %v5148_v62 = vpop.xlane.xlu0 %1857 }
 0x7c6   : > { %v3885_v59 = vpop.eup %3884 }
 0x7c7   : > { %937 = vadd.xlane.f32.xlu0 %v5485_v56  ;;  %v1408_v43 = vpop.xlane.xlu1 %1407  ;;  %v1573_v38 = vmul.f32 %v3885_v59, %v5487_v53 }
 0x7c8   : > { %3890 = vrcp.f32 %v1408_v43  ;;  %v5499_v43 = vld [vmem:[#allocation8_spill] sm:$0xff] }
 0x7c9   : > { %v5153_v55 = vpop.xlane.xlu0 %1861  ;;  %v3620_v2 = vpack.i.bf16 %v1573_v38, %v1572_v33 }
 0x7ca   : > { %v3887_v24 = vpop.eup %3886 }
 0x7cb   : > { %3621 = vrot.lane.b32.xlu1 %v3620_v2, %s4060_s29  ;;  %v1410_v13 = vpop.xlane.xlu1 %1409  ;;  %v1574_v1 = vmul.f32 %v3887_v24, %v5488_v61 }
 0x7cc   : > { %3892 = vrcp.f32 %v1410_v13  ;;  %v5500_v13 = vld [vmem:[#allocation42_spill] sm:$0xff] }
 0x7cd   : > { %v5156_v37 = vpop.xlane.xlu0 %1865  ;;  %3894 = vrcp.f32 %v1412_v63 }
 0x7ce   : > { %v3889_v60 = vpop.eup %3888 }
 0x7cf   : > { %v1414_v50 = vpop.xlane.xlu1 %1413  ;;  %v1575_v57 = vmul.f32 %v3889_v60, %v5489_v36 }
 0x7d0   : > { %3896 = vrcp.f32 %v1414_v50  ;;  %v5501_v50 = vld [vmem:[#allocation13_spill] sm:$0xff] }
 0x7d1   : > { %v5160_v19 = vpop.xlane.xlu0 %1869  ;;  %v3625_v39 = vpack.i.bf16 %v1575_v57, %v1574_v1  ;;  %3898 = vrcp.f32 %v1416_v6 }
 0x7d2   : > { %v3891_v25 = vpop.eup %3890 }
 0x7d3   : > { %v1418_v46 = vpop.xlane.xlu1 %1417  ;;  %v1576_v63 = vmul.f32 %v3891_v25, %v5490_v11 }
 0x7d4   : > { %3900 = vrcp.f32 %v1418_v46 }
 0x7d5   : > { %3902 = vrcp.f32 %v5125_v12  ;;  %v910_v23 = vpop.xlane.xlu0 %909  ;;  %v5492_v12 = vld [vmem:[#allocation32_spill] sm:$0xff] }
 0x7d6   : > { %v3893_v4 = vpop.eup %3892  ;;  %3904 = vrcp.f32 %v910_v23 }
 0x7d7   : > { %v1422_v9 = vpop.xlane.xlu1 %1421  ;;  %v1577_v16 = vmul.f32 %v3893_v4, %v5491_v51  ;;  %v3895_v45 = vpop.eup %3894 }
 0x7d8   : > { %3906 = vrcp.f32 %v1422_v9  ;;  %v1578_v22 = vmul.f32 %v3895_v45, %v5492_v12  ;;  %v5504_v9 = vld [vmem:[#allocation12_spill] sm:$0xff]  ;;  %v5507_v12 = vld [vmem:[#allocation17_spill] sm:$0xff] }
 0x7d9   : > { %3908 = vrcp.f32 %v5127_v54  ;;  %v914_v47 = vpop.xlane.xlu0 %913  ;;  %v3630_v3 = vpack.i.bf16 %v1577_v16, %v1576_v63  ;;  %v5505_v16 = vld [vmem:[#allocation44_spill] sm:$0xff] }
 0x7da   : > { %v3897_v6 = vpop.eup %3896  ;;  %3910 = vrcp.f32 %v914_v47  ;;  %v5506_v47 = vld [vmem:[#allocation46_spill] sm:$0xff] }
 0x7db   : > { %3631 = vrot.lane.b32.xlu1 %v3630_v3, %s4060_s29  ;;  %v1844_v8 = vpop.xlane.xlu1 %1843  ;;  %v1579_v26 = vmul.f32 %v3897_v6, %v5493_v0  ;;  %v3899_v42 = vpop.eup %3898 }
 0x7dc   : > { %3912 = vrcp.f32 %v1844_v8  ;;  %v1580_v7 = vmul.f32 %v3899_v42, %v5494_v5 }
 0x7dd   : > { %3914 = vrcp.f32 %v5135_v14  ;;  %v918_v30 = vpop.xlane.xlu0 %917  ;;  %3611 = vrot.lane.b32.xlu0 %v3610_v44, %s4060_s29  ;;  %v3635_v54 = vpack.i.bf16 %v1579_v26, %v1578_v22 }
 0x7de   : > { %v3901_v35 = vpop.eup %3900  ;;  %3916 = vrcp.f32 %v918_v30  ;;  %v5509_v30 = vld [vmem:[#allocation45_spill] sm:$0xff] }
 0x7df   : > { %v3903_v20 = vpop.eup %3902  ;;  %v1848_v18 = vpop.xlane.xlu1 %1847  ;;  %v1581_v34 = vmul.f32 %v3901_v35, %v5495_v10 }
 0x7e0   : > { %v3905_v27 = vpop.eup %3904  ;;  %3918 = vrcp.f32 %v1848_v18  ;;  %v1582_v49 = vmul.f32 %v3903_v20, %v5497_v32 }
 0x7e1   : > { %3920 = vrcp.f32 %v5139_v29  ;;  %v922_v14 = vpop.xlane.xlu0 %921  ;;  %3626 = vrot.lane.b32.xlu0 %v3625_v39, %s4060_s29  ;;  %v3640_v15 = vpack.i.bf16 %v1581_v34, %v1580_v7  ;;  %v5179_v17 = vmul.f32 %v3905_v27, %v5496_v40  ;;  %v5502_v39 = vld [vmem:[#allocation40_spill] sm:$0xff]  ;;  %v5511_v34 = vld [vmem:[#allocation50_spill] sm:$0xff] }
 0x7e2   : > { %v3907_v58 = vpop.eup %3906  ;;  %3922 = vrcp.f32 %v922_v14  ;;  %v5510_v7 = vld [vmem:[#allocation48_spill] sm:$0xff] }
 0x7e3   : > { %v3909_v44 = vpop.eup %3908  ;;  %3641 = vrot.lane.b32.xlu1 %v3640_v15, %s4060_s29  ;;  %v1852_v31 = vpop.xlane.xlu1 %1851  ;;  %v1583_v41 = vmul.f32 %v3907_v58, %v5498_v21  ;;  %v5512_v58 = vld [vmem:[#allocation47_spill] sm:$0xff] }
 0x7e4   : > { %v3911_v59 = vpop.eup %3910  ;;  %3924 = vrcp.f32 %v1852_v31  ;;  %v2018_v2 = vmul.f32 %v3909_v44, %v4978_v52  ;;  %v5503_v52 = vld [vmem:[#allocation41_spill] sm:$0xff] }
 0x7e5   : > { %3926 = vrcp.f32 %v5144_v48  ;;  %v926_v29 = vpop.xlane.xlu0 %925  ;;  %3636 = vrot.lane.b32.xlu0 %v3635_v54, %s4060_s29  ;;  %v3645_v56 = vpack.i.bf16 %v1583_v41, %v1582_v49  ;;  %v5187_v28 = vmul.f32 %v3911_v59, %v5499_v43  ;;  %v5513_v31 = vld [vmem:[#allocation49_spill] sm:$0xff]  ;;  %v5515_v43 = vld [vmem:[#allocation54_spill] sm:$0xff] }
 0x7e6   : > { %v3913_v33 = vpop.eup %3912  ;;  %3928 = vrcp.f32 %v926_v29  ;;  %v5514_v29 = vld [vmem:[#allocation52_spill] sm:$0xff] }
 0x7e7   : > { %v3915_v53 = vpop.eup %3914  ;;  %v1856_v38 = vpop.xlane.xlu1 %1855  ;;  %v2019_v24 = vmul.f32 %v3913_v33, %v5500_v13  ;;  %v5516_v13 = vld [vmem:[#allocation51_spill] sm:$0xff] }
 0x7e8   : > { %v3917_v60 = vpop.eup %3916  ;;  %3930 = vrcp.f32 %v1856_v38  ;;  %v2020_v46 = vmul.f32 %v3915_v53, %v5502_v39 }
 0x7e9   : > { %3646 = vrot.lane.b32.xlu0 %v3645_v56, %s4060_s29  ;;  %v3650_v48 = vpack.i.bf16 %v2019_v24, %v2018_v2  ;;  %v5193_v61 = vmul.f32 %v3917_v60, %v5501_v50  ;;  %3932 = vrcp.f32 %v5148_v62  ;;  %v5517_v60 = vld [vmem:[#allocation53_spill] sm:$0xff] }
 0x7ea   : > { %v3919_v1 = vpop.eup %3918 }
 0x7eb   : > { %v3921_v36 = vpop.eup %3920  ;;  %3651 = vrot.lane.b32.xlu1 %v3650_v48, %s4059_s28  ;;  %v1860_v57 = vpop.xlane.xlu1 %1859  ;;  %v2021_v25 = vmul.f32 %v3919_v1, %v5503_v52 }
 0x7ec   : > { %v3923_v23 = vpop.eup %3922  ;;  %3934 = vrcp.f32 %v1860_v57  ;;  %v2022_v45 = vmul.f32 %v3921_v36, %v5505_v16  ;;  %v5518_v57 = vld [vmem:[#allocation11_spill] sm:$0xff] }
 0x7ed   : > { %v3655_v4 = vpack.i.bf16 %v2021_v25, %v2020_v46  ;;  %v5200_v11 = vmul.f32 %v3923_v23, %v5504_v9  ;;  %3936 = vrcp.f32 %v5153_v55  ;;  %v5508_v55 = vld [vmem:[#allocation43_spill] sm:$0xff]  ;;  %v5519_v25 = vld [vmem:[#allocation10_spill] sm:$0xff] }
 0x7ee   : > { %v3925_v63 = vpop.eup %3924 }
 0x7ef   : > { %v3927_v51 = vpop.eup %3926  ;;  %3656 = vrot.lane.b32.xlu0 %v3655_v4, %s4059_s28  ;;  %v1864_v62 = vpop.xlane.xlu1 %1863  ;;  %v2023_v3 = vmul.f32 %v3925_v63, %v5506_v47  ;;  %v5520_v63 = vld [vmem:[#allocation15_spill] sm:$0xff] }
 0x7f0   : > { %v3929_v6 = vpop.eup %3928  ;;  %3938 = vrcp.f32 %v1864_v62  ;;  %v2024_v42 = vmul.f32 %v3927_v51, %v5508_v55 }
 0x7f1   : > { %v3660_v8 = vpack.i.bf16 %v2023_v3, %v2022_v45  ;;  %v5207_v22 = vmul.f32 %v3929_v6, %v5507_v12  ;;  %3940 = vrcp.f32 %v5156_v37  ;;  %v5521_v45 = vld [vmem:[#allocation14_spill] sm:$0xff] }
 0x7f2   : > { %v3931_v0 = vpop.eup %3930 }
 0x7f3   : > { %3661 = vrot.lane.b32.xlu1 %v3660_v8, %s4059_s28  ;;  %v1868_v26 = vpop.xlane.xlu1 %1867  ;;  %v2025_v54 = vmul.f32 %v3931_v0, %v5509_v30  ;;  %v3933_v35 = vpop.eup %3932  ;;  %v5522_v8 = vld [vmem:[#allocation19_spill] sm:$0xff] }
 0x7f4   : > { %3942 = vrcp.f32 %v1868_v26  ;;  %v2026_v10 = vmul.f32 %v3933_v35, %v5510_v7 }
 0x7f5   : > { %v3665_v20 = vpack.i.bf16 %v2025_v54, %v2024_v42  ;;  %3944 = vrcp.f32 %v5160_v19  ;;  %v2296_v42 = vpop.xlane.xlu0 %2295 }
 0x7f6   : > { %v3935_v18 = vpop.eup %3934 }
 0x7f7   : > { %3666 = vrot.lane.b32.xlu0 %v3665_v20, %s4059_s28  ;;  %v1872_v5 = vpop.xlane.xlu1 %1871  ;;  %v2027_v37 = vmul.f32 %v3935_v18, %v5511_v34  ;;  %v3937_v27 = vpop.eup %3936 }
 0x7f8   : > { %3946 = vrcp.f32 %v1872_v5  ;;  %v2028_v44 = vmul.f32 %v3937_v27, %v5512_v58 }
 0x7f9   : > { %v3670_v14 = vpack.i.bf16 %v2027_v37, %v2026_v10  ;;  %v2292_v35 = vpop.xlane.xlu0 %2291  ;;  %v5523_v10 = vld [vmem:[#allocation18_spill] sm:$0xff] }
 0x7fa   : > { %v3939_v15 = vpop.eup %3938 }
 0x7fb   : > { %3671 = vrot.lane.b32.xlu1 %v3670_v14, %s4059_s28  ;;  %v912_v40 = vpop.xlane.xlu1 %911  ;;  %v2029_v32 = vmul.f32 %v3939_v15, %v5513_v31  ;;  %v3941_v49 = vpop.eup %3940 }
 0x7fc   : > { %3948 = vrcp.f32 %v912_v40  ;;  %v2030_v56 = vmul.f32 %v3941_v49, %v5514_v29  ;;  %v5524_v40 = vld [vmem:[#allocation23_spill] sm:$0xff] }
 0x7fd   : > { %v3675_v19 = vpack.i.bf16 %v2029_v32, %v2028_v44  ;;  %v2304_v18 = vpop.xlane.xlu0 %2303  ;;  %v5525_v32 = vld [vmem:[#allocation22_spill] sm:$0xff] }
 0x7fe   : > { %v3943_v21 = vpop.eup %3942 }
 0x7ff   : > { %v916_v41 = vpop.xlane.xlu1 %915  ;;  %v3945_v59 = vpop.eup %3944  ;;  %3676 = vrot.lane.b32.xlu0 %v3675_v19, %s4059_s28  ;;  %v2031_v33 = vmul.f32 %v3943_v21, %v5515_v43 }
 0x800   : > { %3950 = vrcp.f32 %v916_v41  ;;  %v2032_v24 = vmul.f32 %v3945_v59, %v5516_v13 }
 0x801   : > { %v3680_v38 = vpack.i.bf16 %v2031_v33, %v2030_v56  ;;  %v2300_v37 = vpop.xlane.xlu0 %2299 }
 0x802   : > { %v3947_v53 = vpop.eup %3946 }
 0x803   : > { %v920_v2 = vpop.xlane.xlu1 %919  ;;  %v2033_v48 = vmul.f32 %v3947_v53, %v5517_v60  ;;  %3681 = vrot.lane.b32.xlu1 %v3680_v38, %s4059_s28 }
 0x804   : > { %3952 = vrcp.f32 %v920_v2 }
 0x805   : > { %v3685_v50 = vpack.i.bf16 %v2033_v48, %v2032_v24 }
 0x806   : > { %v3949_v1 = vpop.eup %3948 }
 0x807   : > { %3686 = vrot.lane.b32.xlu0 %v3685_v50, %s4059_s28  ;;  %v924_v36 = vpop.xlane.xlu1 %923  ;;  %v5228_v39 = vmul.f32 %v3949_v1, %v5518_v57  ;;  %v2312_v14 = vpop.xlane.xlu0 %2311 }
 0x808   : > { %3954 = vrcp.f32 %v924_v36 }
 0x80a   : > { %v3951_v46 = vpop.eup %3950 }
 0x80b   : > { %v928_v52 = vpop.xlane.xlu1 %927  ;;  %v5231_v23 = vmul.f32 %v3951_v46, %v5519_v25  ;;  %v2308_v44 = vpop.xlane.xlu0 %2307 }
 0x80c   : > { %3956 = vrcp.f32 %v928_v52 }
 0x80e   : > { %v3953_v4 = vpop.eup %3952 }
 0x80f   : > { %v2298_v9 = vpop.xlane.xlu1 %2297  ;;  %v5234_v51 = vmul.f32 %v3953_v4, %v5520_v63 }
 0x812   : > { %v3955_v62 = vpop.eup %3954 }
 0x813   : > { %v2294_v16 = vpop.xlane.xlu1 %2293  ;;  %v5237_v47 = vmul.f32 %v3955_v62, %v5521_v45 }
 0x816   : > { %v3957_v3 = vpop.eup %3956 }
 0x817   : > { %v2306_v6 = vpop.xlane.xlu1 %2305  ;;  %v5240_v12 = vmul.f32 %v3957_v3, %v5522_v8 }
 0x81b   : > { %v2302_v0 = vpop.xlane.xlu1 %2301 }
 0x81f   : > { %v2314_v26 = vpop.xlane.xlu1 %2313 }
 0x823   : > { %v2310_v55 = vpop.xlane.xlu1 %2309 }
 0x827   : > { %v932_v30 = vpop.xlane.xlu1 %931 }
 0x828   : > { %3958 = vrcp.f32 %v932_v30 }
 0x82b   : > { %v5242_v54 = vpop.xlane.xlu1 %2321 }
 0x82f   : > { %v5244_v20 = vpop.xlane.xlu1 %2317 }
 0x832   : > { %v3959_v5 = vpop.eup %3958 }
 0x833   : > { %v936_v7 = vpop.xlane.xlu1 %935  ;;  %v5247_v34 = vmul.f32 %v3959_v5, %v5523_v10 }
 0x834   : > { %3960 = vrcp.f32 %v936_v7 }
 0x837   : > { %v940_v27 = vpop.xlane.xlu1 %939 }
 0x838   : > { %3962 = vrcp.f32 %v940_v27 }
 0x839   : > { %3964 = vrcp.f32 %v2296_v42 }
 0x83a   : > { %3966 = vrcp.f32 %v2292_v35 }
 0x83b   : > { %3968 = vrcp.f32 %v2298_v9  ;;  %v5255_v21 = vpop.permute.xlu1 %3616 }
 0x83c   : > { %3970 = vrcp.f32 %v2294_v16 }
 0x83d   : > { %3972 = vrcp.f32 %v2304_v18 }
 0x83e   : > { %v3961_v15 = vpop.eup %3960  ;;  %3974 = vrcp.f32 %v2300_v37  ;;  %v5526_v37 = vld [vmem:[#allocation21_spill] sm:$0xff] }
 0x83f   : > { %v1123_v58 = vmul.f32 %v3961_v15, %v5524_v40  ;;  %v5261_v29 = vpop.permute.xlu1 %3621  ;;  %3976 = vrcp.f32 %v2306_v6 }
 0x840   : > { %3978 = vrcp.f32 %v2302_v0 }
 0x842   : > { %v3963_v31 = vpop.eup %3962 }
 0x843   : > { %v5251_v49 = vmul.f32 %v3963_v31, %v5525_v32  ;;  %v3965_v56 = vpop.eup %3964 }
 0x844   : > { %v5253_v19 = vpop.xlane.xlu0 %2319  ;;  %v3967_v33 = vpop.eup %3966 }
 0x845   : > { %v3969_v38 = vpop.eup %3968 }
 0x846   : > { %v3971_v24 = vpop.eup %3970 }
 0x847   : > { %v3973_v9 = vpop.eup %3972 }
 0x848   : > { %v5257_v41 = vpop.xlane.xlu0 %2315  ;;  %v3975_v16 = vpop.eup %3974 }
 0x849   : > { %v3977_v3 = vpop.eup %3976 }
 0x84a   : > { %v3979_v42 = vpop.eup %3978 }
 0x84c   : > { %v5259_v59 = vpop.xlane.xlu0 %929 }
 0x84d   : > { %v5263_v60 = vpop.permute.xlu1 %3631 }
 0x84e   : > { %v3520_v43 = vpop.f32.mrb[48].mxu0 }
 0x84f   : > { %v2389_v53 = vpop.f32.mrb[49].mxu0  ;;  %v2470_v48 = vmul.f32 %v3965_v56, %v3520_v43 }
 0x850   : > { %v3521_v2 = vpop.f32.mrb[50].mxu0  ;;  %v934_v13 = vpop.xlane.xlu0 %933  ;;  %v2468_v36 = vmul.f32 %v3967_v33, %v2389_v53 }
 0x851   : > { %v2471_v50 = vmul.f32 %v3969_v38, %v3521_v2  ;;  %3980 = vrcp.f32 %v934_v13  ;;  %v2392_v1 = vpop.f32.mrb[51].mxu0  ;;  %v5527_v38 = vld [vmem:[#allocation20_spill] sm:$0xff] }
 0x852   : > { %v2469_v57 = vmul.f32 %v3971_v24, %v2392_v1  ;;  %3982 = vrcp.f32 %v2312_v14 }
 0x853   : > { %v3690_v46 = vpack.i.bf16 %v2471_v50, %v2470_v48  ;;  %3984 = vrcp.f32 %v2308_v44 }
 0x854   : > { %v3695_v52 = vpack.i.bf16 %v2469_v57, %v2468_v36  ;;  %v938_v25 = vpop.xlane.xlu0 %937 }
 0x855   : > { %3986 = vrcp.f32 %v938_v25  ;;  %3691 = vrot.lane.b32.xlu0 %v3690_v46, %s4058_s12  ;;  %v3642_v4 = vpop.permute.xlu1 %3641 }
 0x856   : > { %3988 = vrcp.f32 %v2314_v26  ;;  %v3644_v63 = vunpack.i.h.bf16 %v3642_v4  ;;  %v3524_v62 = vpop.f32.mrb[52].mxu0  ;;  %3696 = vrot.lane.b32.xlu1 %v3695_v52, %s4058_s12  ;;  %v3643_v14 = vunpack.i.l.bf16 %v3642_v4 }
 0x857   : > { %3990 = vrcp.f32 %v2310_v55  ;;  %v2405_v45 = vpop.f32.mrb[53].mxu0  ;;  %v2474_v30 = vmul.f32 %v3973_v9, %v3524_v62 }
 0x858   : > { %v2689_v6 = vsel %vm683_vm0, %v1123_v58, %v3644_v63  ;;  %v3525_v8 = vpop.f32.mrb[54].mxu0  ;;  %v5268_v0 = vpop.permute.xlu0 %3611  ;;  %v2472_v5 = vmul.f32 %v3975_v16, %v2405_v45  ;;  %3992 = vrcp.f32 %v5242_v54 }
 0x859   : > { %v2475_v35 = vmul.f32 %v3977_v3, %v3525_v8  ;;  %v2408_v18 = vpop.f32.mrb[55].mxu0  ;;  %3994 = vrcp.f32 %v5244_v20 }
 0x85a   : > { %v2473_v7 = vmul.f32 %v3979_v42, %v2408_v18  ;;  %3996 = vrcp.f32 %v5253_v19  ;;  %v3619_v19 = vunpack.i.h.bf16 %v5255_v21 }
 0x85b   : > { %v3981_v26 = vpop.eup %3980  ;;  %v3700_v10 = vpack.i.bf16 %v2475_v35, %v2474_v30  ;;  %3998 = vrcp.f32 %v5257_v41  ;;  %v3618_v41 = vunpack.i.l.bf16 %v5255_v21  ;;  %v3624_v21 = vunpack.i.h.bf16 %v5261_v29 }
 0x85c   : > { %v1122_v27 = vmul.f32 %v3981_v26, %v5526_v37  ;;  %v3705_v15 = vpack.i.bf16 %v2473_v7, %v2472_v5  ;;  %v5271_v55 = vpop.permute.xlu0 %3626  ;;  %v3983_v40 = vpop.eup %3982  ;;  %4000 = vrcp.f32 %v5259_v59 }
 0x85d   : > { %3701 = vrot.lane.b32.xlu0 %v3700_v10, %s4058_s12  ;;  %v3985_v58 = vpop.eup %3984  ;;  %v5284_v16 = vpop.permute.xlu1 %3651 }
 0x85e   : > { %v2688_v44 = vsel %vm683_vm0, %v1122_v27, %v3643_v14  ;;  %v3528_v31 = vpop.f32.mrb[56].mxu0  ;;  %3706 = vrot.lane.b32.xlu1 %v3705_v15, %s4058_s12 }
 0x85f   : > { %v3987_v32 = vpop.eup %3986  ;;  %v2421_v56 = vpop.f32.mrb[57].mxu0  ;;  %v2478_v24 = vmul.f32 %v3983_v40, %v3528_v31 }
 0x860   : > { %v3989_v43 = vpop.eup %3988  ;;  %v3529_v33 = vpop.f32.mrb[58].mxu0  ;;  %v1124_v2 = vmul.f32 %v3987_v32, %v5527_v38  ;;  %v2476_v1 = vmul.f32 %v3985_v58, %v2421_v56 }
 0x861   : > { %v5276_v53 = vpop.permute.xlu0 %3636  ;;  %v3991_v13 = vpop.eup %3990  ;;  %v2479_v48 = vmul.f32 %v3989_v43, %v3529_v33 }
 0x862   : > { %v2424_v50 = vpop.f32.mrb[59].mxu0  ;;  %v3993_v14 = vpop.eup %3992 }
 0x863   : > { %v2477_v36 = vmul.f32 %v3991_v13, %v2424_v50  ;;  %v3710_v57 = vpack.i.bf16 %v2479_v48, %v2478_v24  ;;  %v3995_v15 = vpop.eup %3994  ;;  %v3613_v13 = vunpack.i.l.bf16 %v5268_v0  ;;  %v3654_v50 = vunpack.i.h.bf16 %v5284_v16 }
 0x864   : > { %v3997_v58 = vpop.eup %3996 }
 0x865   : > { %v3715_v46 = vpack.i.bf16 %v2477_v36, %v2476_v1  ;;  %v3647_v52 = vpop.permute.xlu0 %3646  ;;  %3711 = vrot.lane.b32.xlu0 %v3710_v57, %s4058_s12  ;;  %v5286_v45 = vpop.permute.xlu1 %3661  ;;  %v3653_v1 = vunpack.i.l.bf16 %v5284_v16  ;;  %v2679_v36 = vsel %vm683_vm0, %v5231_v23, %v3619_v19  ;;  %v2678_v57 = vsel %vm683_vm0, %v5187_v28, %v3618_v41 }
 0x866   : > { %v3649_v25 = vunpack.i.h.bf16 %v3647_v52  ;;  %v3648_v4 = vunpack.i.l.bf16 %v3647_v52  ;;  %v3999_v31 = vpop.eup %3998  ;;  %v3633_v41 = vunpack.i.l.bf16 %v5263_v60 }
 0x867   : > { %3716 = vrot.lane.b32.xlu1 %v3715_v46, %s4058_s12 }
 0x868   : > { %v2690_v9 = vsel %vm683_vm0, %v1124_v2, %v3648_v4  ;;  %v2691_v63 = vsel %vm683_vm0, %v5251_v49, %v3649_v25  ;;  %v3614_v2 = vunpack.i.h.bf16 %v5268_v0  ;;  %v2676_v0 = vsel %vm683_vm0, %v5179_v17, %v3613_v13 }
 0x869   : > { %v3657_v62 = vpop.permute.xlu0 %3656  ;;  %v2693_v59 = vsel %vm2692_vm1, %v2676_v0, %v3653_v1 }
 0x86a   : > { %v3659_v24 = vunpack.i.h.bf16 %v3657_v62  ;;  %v3658_v48 = vunpack.i.l.bf16 %v3657_v62  ;;  %v2677_v52 = vsel %vm683_vm0, %v5228_v39, %v3614_v2 }
 0x86b   : > { %v2694_v16 = vsel %vm2692_vm1, %v2677_v52, %v3654_v50  ;;  %v3638_v50 = vunpack.i.l.bf16 %v5276_v53 }
 0x86c   : > { %v2695_v23 = vsel %vm2692_vm1, %v2678_v57, %v3658_v48  ;;  %v3639_v48 = vunpack.i.h.bf16 %v5276_v53 }
 0x86d   : > { %v5288_v3 = vpop.permute.xlu0 %3666  ;;  %v5290_v8 = vpop.permute.xlu1 %3671 }
 0x86e   : > { %v3674_v0 = vunpack.i.h.bf16 %v5290_v8 }
 0x871   : > { %v5292_v42 = vpop.permute.xlu0 %3676 }
 0x872   : > { %v3678_v57 = vunpack.i.l.bf16 %v5292_v42 }
 0x875   : > { %v3682_v30 = vpop.permute.xlu1 %3681 }
 0x876   : > { %v3684_v35 = vunpack.i.h.bf16 %v3682_v30  ;;  %v3683_v18 = vunpack.i.l.bf16 %v3682_v30  ;;  %v3623_v30 = vunpack.i.l.bf16 %v5261_v29  ;;  %v2681_v29 = vsel %vm683_vm0, %v5234_v51, %v3624_v21  ;;  %v5528_v21 = vld [vmem:[#allocation16_spill] sm:$0xff] }
 0x878   : > { %v5295_v5 = vsel %vm2692_vm1, %v2688_v44, %v3683_v18  ;;  %v5298_v49 = vsel %vm2692_vm1, %v2689_v6, %v3684_v35 }
 0x879   : > { %v3687_v7 = vpop.permute.xlu0 %3686 }
 0x87a   : > { %v3689_v26 = vunpack.i.h.bf16 %v3687_v7  ;;  %v3688_v10 = vunpack.i.l.bf16 %v3687_v7 }
 0x87c   : > { %v5301_v37 = vsel %vm2692_vm1, %v2690_v9, %v3688_v10  ;;  %v5304_v27 = vsel %vm2692_vm1, %v2691_v63, %v3689_v26  ;;  %v2696_v63 = vsel %vm2692_vm1, %v2679_v36, %v3659_v24  ;;  %v3629_v26 = vunpack.i.h.bf16 %v5271_v55 }
 0x87d   : > { %v3628_v10 = vunpack.i.l.bf16 %v5271_v55  ;;  %v3679_v36 = vunpack.i.h.bf16 %v5292_v42  ;;  %v2687_v42 = vsel %vm683_vm0, %v5247_v34, %v3639_v48 }
 0x88c   : > { %v3532_v6 = vpop.f32.mrb[60].mxu0 }
 0x88d   : > { %v2437_v40 = vpop.f32.mrb[61].mxu0  ;;  %v2482_v32 = vmul.f32 %v3997_v58, %v3532_v6  ;;  %v3669_v6 = vunpack.i.h.bf16 %v5288_v3  ;;  %v3663_v58 = vunpack.i.l.bf16 %v5286_v45 }
 0x88e   : > { %v3533_v44 = vpop.f32.mrb[62].mxu0  ;;  %v2480_v33 = vmul.f32 %v3999_v31, %v2437_v40  ;;  %v3664_v40 = vunpack.i.h.bf16 %v5286_v45  ;;  %v3634_v31 = vunpack.i.h.bf16 %v5263_v60  ;;  %v4001_v45 = vpop.eup %4000  ;;  %v3673_v60 = vunpack.i.l.bf16 %v5290_v8 }
 0x88f   : > { %v2483_v56 = vmul.f32 %v3993_v14, %v3533_v44  ;;  %v2440_v43 = vpop.f32.mrb[63].mxu0  ;;  %v2680_v44 = vsel %vm683_vm0, %v5193_v61, %v3623_v30 }
 0x890   : > { %v2481_v54 = vmul.f32 %v3995_v15, %v2440_v43  ;;  %v3668_v15 = vunpack.i.l.bf16 %v5288_v3  ;;  %v2683_v3 = vsel %vm683_vm0, %v5237_v47, %v3629_v26  ;;  %v2698_v19 = vsel %vm2692_vm1, %v2681_v29, %v3664_v40 }
 0x891   : > { %v3725_v38 = vpack.i.bf16 %v2483_v56, %v2482_v32  ;;  %v2682_v32 = vsel %vm683_vm0, %v5200_v11, %v3628_v10  ;;  %v2700_v51 = vsel %vm2692_vm1, %v2683_v3, %v3669_v6  ;;  %v2685_v52 = vsel %vm683_vm0, %v5240_v12, %v3634_v31 }
 0x892   : > { %v3720_v20 = vpack.i.bf16 %v2481_v54, %v2480_v33  ;;  %v2699_v54 = vsel %vm2692_vm1, %v2682_v32, %v3668_v15 }
 0x893   : > { %3726 = vrot.lane.b32.xlu0 %v3725_v38, %s4058_s12 }
 0x894   : > { %3721 = vrot.lane.b32.xlu1 %v3720_v20, %s4058_s12  ;;  %v2697_v20 = vsel %vm2692_vm1, %v2680_v44, %v3663_v58 }
 0x8c7   : > { %v3692_v46 = vpop.permute.xlu0 %3691 }
 0x8c8   : > { %v3694_v25 = vunpack.i.h.bf16 %v3692_v46  ;;  %v3693_v4 = vunpack.i.l.bf16 %v3692_v46  ;;  %v3697_v9 = vpop.permute.xlu1 %3696  ;;  %v1120_v46 = vmul.f32 %v4001_v45, %v5528_v21 }
 0x8c9   : > { %v3699_v28 = vunpack.i.h.bf16 %v3697_v9  ;;  %v3698_v62 = vunpack.i.l.bf16 %v3697_v9 }
 0x8ca   : > { %v2712_v17 = vsel %vm2709_vm2, %v2695_v23, %v3693_v4  ;;  %v2713_v39 = vsel %vm2709_vm2, %v2696_v63, %v3694_v25  ;;  %v2684_v25 = vsel %vm683_vm0, %v5207_v22, %v3633_v41  ;;  %v2686_v4 = vsel %vm683_vm0, %v1120_v46, %v3638_v50 }
 0x8cb   : > { %v3104_v35 = vpack.c.bf16 %v2713_v39, %v2712_v17  ;;  %v2710_v18 = vsel %vm2709_vm2, %v2693_v59, %v3698_v62  ;;  %v2711_v7 = vsel %vm2709_vm2, %v2694_v16, %v3699_v28  ;;  %v2703_v8 = vsel %vm2692_vm1, %v2686_v4, %v3678_v57 }
 0x8cc   : > { %v3099_v14 = vpack.c.bf16 %v2711_v7, %v2710_v18  ;;  %v2704_v28 = vsel %vm2692_vm1, %v2687_v42, %v3679_v36  ;;  %v2701_v16 = vsel %vm2692_vm1, %v2684_v25, %v3673_v60  ;;  %v2702_v22 = vsel %vm2692_vm1, %v2685_v52, %v3674_v0 }
 0x8cd   : > { %3143 = vst [vmem:[%s5337_s5 + $0x8] sm:$0xff] %v3104_v35  }
 0x8ce   : > { %3100 = vst [vmem:[%s5337_s5] sm:$0xff] %v3099_v14  }
 0x8cf   : > { %v3702_v55 = vpop.permute.xlu0 %3701 }
 0x8d0   : > { %v3704_v56 = vunpack.i.h.bf16 %v3702_v55  ;;  %v3703_v43 = vunpack.i.l.bf16 %v3702_v55  ;;  %v3707_v33 = vpop.permute.xlu1 %3706 }
 0x8d1   : > { %v3709_v38 = vunpack.i.h.bf16 %v3707_v33  ;;  %v3708_v61 = vunpack.i.l.bf16 %v3707_v33 }
 0x8d2   : > { %v2717_v11 = vsel %vm2709_vm2, %v2700_v51, %v3704_v56  ;;  %v2716_v47 = vsel %vm2709_vm2, %v2699_v54, %v3703_v43 }
 0x8d3   : > { %v3114_v2 = vpack.c.bf16 %v2717_v11, %v2716_v47  ;;  %v2714_v13 = vsel %vm2709_vm2, %v2697_v20, %v3708_v61  ;;  %v2715_v24 = vsel %vm2709_vm2, %v2698_v19, %v3709_v38 }
 0x8d4   : > { %v3109_v1 = vpack.c.bf16 %v2715_v24, %v2714_v13 }
 0x8d5   : > { %3145 = vst [vmem:[%s5337_s5 + $0x18] sm:$0xff] %v3114_v2  }
 0x8d6   : > { %3144 = vst [vmem:[%s5337_s5 + $0x10] sm:$0xff] %v3109_v1  }
 0x8d7   : > { %v3712_v53 = vpop.permute.xlu0 %3711 }
 0x8d8   : > { %v3714_v9 = vunpack.i.h.bf16 %v3712_v53  ;;  %v3713_v23 = vunpack.i.l.bf16 %v3712_v53 }
 0x8d9   : > { %v3717_v63 = vpop.permute.xlu1 %3716 }
 0x8da   : > { %v3719_v62 = vunpack.i.h.bf16 %v3717_v63  ;;  %v3718_v12 = vunpack.i.l.bf16 %v3717_v63  ;;  %v2720_v59 = vsel %vm2709_vm2, %v2703_v8, %v3713_v23  ;;  %v2721_v17 = vsel %vm2709_vm2, %v2704_v28, %v3714_v9 }
 0x8db   : > { %v3124_v34 = vpack.c.bf16 %v2721_v17, %v2720_v59 }
 0x8dc   : > { %v2718_v39 = vsel %vm2709_vm2, %v2701_v16, %v3718_v12  ;;  %v2719_v30 = vsel %vm2709_vm2, %v2702_v22, %v3719_v62 }
 0x8dd   : > { %v3119_v35 = vpack.c.bf16 %v2719_v30, %v2718_v39  ;;  %3147 = vst [vmem:[%s5337_s5 + $0x28] sm:$0xff] %v3124_v34  }
 0x8df   : > { %3146 = vst [vmem:[%s5337_s5 + $0x20] sm:$0xff] %v3119_v35  }
 0x905   : > { %v3727_v18 = vpop.permute.xlu0 %3726 }
 0x906   : > { %v3729_v7 = vunpack.i.h.bf16 %v3727_v18  ;;  %v3728_v26 = vunpack.i.l.bf16 %v3727_v18  ;;  %v3722_v10 = vpop.permute.xlu1 %3721 }
 0x907   : > { %v3724_v14 = vunpack.i.h.bf16 %v3722_v10  ;;  %v3723_v6 = vunpack.i.l.bf16 %v3722_v10 }
 0x908   : > { %v2724_v15 = vsel %vm2709_vm2, %v5301_v37, %v3728_v26  ;;  %v2725_v40 = vsel %vm2709_vm2, %v5304_v27, %v3729_v7 }
 0x909   : > { %v3134_v58 = vpack.c.bf16 %v2725_v40, %v2724_v15  ;;  %v2722_v29 = vsel %vm2709_vm2, %v5295_v5, %v3723_v6  ;;  %v2723_v44 = vsel %vm2709_vm2, %v5298_v49, %v3724_v14 }
 0x90a   : > { %v3129_v31 = vpack.c.bf16 %v2723_v44, %v2722_v29 }
 0x90b   : > { %3149 = vst [vmem:[%s5337_s5 + $0x38] sm:$0xff] %v3134_v58  }
 0x90c   : > { %3148 = vst [vmem:[%s5337_s5 + $0x30] sm:$0xff] %v3129_v31  }
 0x90d PF: > { %s13_s16 = sadd.s32 1, %s4056_s16   ;;  %s5529_s12 = smov %s4044_s13 }
 0x90e   : > { %p10_p10 = scmp.ge.s32.totalorder %s13_s16, 4   ;;  %s5530_s13 = smov %s4120_s21 }
 0x90f   : > { %s5531_s14 = smov %s4052_s15  ;;  %s5532_s15 = smov %s5534_s17 }
 0x910   :  { %12 = sbr.rel (!%p10_p10) target bundleno = 3 (0x3), region = 206 }

</bundles_post_ra>
